<compile_context>
chip_gen: v7x
topology: tpu7x:2x2x1
jax: 0.10.0
libtpu: 0.0.40
codegen_flags: <defaults>
</compile_context>

<pallas_src>
import functools

import jax
import jax.numpy as jnp
from jax.experimental import pallas as pl
from jax.experimental.pallas import tpu as pltpu


def _sigmoid(x):
    # Explicit form (exp lowers cleanly in Mosaic); also used by the pure-JAX
    # reference so kernel vs. reference match at matched precision.
    return 1.0 / (1.0 + jnp.exp(-x))


# ---------------------------------------------------------------------------
# Pallas kernel: one full bidirectional LSTM layer (both directions, all T).
# ---------------------------------------------------------------------------
def _bilstm_layer_kernel(x_ref, wih_ref, whh_f_ref, whh_b_ref, b_ref,
                         out_ref, gx_ref):
    T, B, Din = x_ref.shape
    H4 = whh_f_ref.shape[1]          # 4H
    H = H4 // 4

    # --- hoisted input projection, both directions, bias folded in ---------
    # One big MXU matmul: (T*B, Din) @ (Din, 8H) in bf16, f32 accumulate.
    x2 = x_ref[...].reshape(T * B, Din).astype(jnp.bfloat16)
    gx = jnp.dot(x2, wih_ref[...], preferred_element_type=jnp.float32)
    gx_ref[...] = (gx + b_ref[...]).reshape(T, B, 2 * H4)

    def gate_update(gates, c):
        # One full-width sigmoid over (B, 4H); tanh only on the g slice.
        sig = _sigmoid(gates)
        i_g = sig[:, 0 * H:1 * H]
        f_g = sig[:, 1 * H:2 * H]
        o_g = sig[:, 3 * H:4 * H]
        g_g = jnp.tanh(gates[:, 2 * H:3 * H])
        c_new = f_g * c + i_g * g_g
        h_new = o_g * jnp.tanh(c_new)
        return h_new, c_new

    def step(t, carry):
        h_f, c_f, h_b, c_b = carry
        gx_f = gx_ref[t, :, 0:H4]                 # fwd gates_x at time t
        gx_b = gx_ref[T - 1 - t, :, H4:2 * H4]    # bwd gates_x at time T-1-t

        gates_f = gx_f + jnp.dot(h_f.astype(jnp.bfloat16), whh_f_ref[...],
                                 preferred_element_type=jnp.float32)
        gates_b = gx_b + jnp.dot(h_b.astype(jnp.bfloat16), whh_b_ref[...],
                                 preferred_element_type=jnp.float32)

        h_f, c_f = gate_update(gates_f, c_f)
        h_b, c_b = gate_update(gates_b, c_b)

        # fwd writes feature block [0, H), bwd writes [H, 2H) — no concat.
        out_ref[t, :, 0:H] = h_f
        out_ref[T - 1 - t, :, H:2 * H] = h_b
        return h_f, c_f, h_b, c_b

    z = jnp.zeros((B, H), jnp.float32)
    jax.lax.fori_loop(0, T, step, (z, z, z, z), unroll=True)


def bilstm_layer(x, w_ih, w_hh_f, w_hh_b, b, num_hiddens):
    """One bidirectional LSTM layer.

    x:       (T, B, Din) float32
    w_ih:    (Din, 8H)   float32  [fwd 4H | bwd 4H], gate order [i, f, g, o]
    w_hh_f:  (H, 4H)     float32
    w_hh_b:  (H, 4H)     float32
    b:       (1, 8H)     float32  (b_ih + b_hh per direction, stacked)
    returns  (T, B, 2H)  float32  (PyTorch bidirectional output layout)
    """
    T, B, _ = x.shape
    H = num_hiddens
    return pl.pallas_call(
        _bilstm_layer_kernel,
        out_shape=jax.ShapeDtypeStruct((T, B, 2 * H), jnp.float32),
        in_specs=[pl.BlockSpec(memory_space=pltpu.MemorySpace.VMEM)] * 5,
        out_specs=pl.BlockSpec(memory_space=pltpu.MemorySpace.VMEM),
        scratch_shapes=[pltpu.VMEM((T, B, 8 * H), jnp.float32)],  # gates_x
    )(x, w_ih.astype(jnp.bfloat16), w_hh_f.astype(jnp.bfloat16),
      w_hh_b.astype(jnp.bfloat16), b)


# ---------------------------------------------------------------------------
# Model: parameter construction + forward pass
# ---------------------------------------------------------------------------
def init_params(key, vocab_size, embed_size, num_hiddens, num_layers):
    H = num_hiddens
    n_keys = 3 + num_layers * 8          # emb + 8 per layer + w_dec + b_dec
    keys = iter(jax.random.split(key, n_keys))
    params = {
        "embedding": jax.random.normal(next(keys), (vocab_size, embed_size),
                                       jnp.float32) * 0.1,
        "lstm": [],
    }
    for layer in range(num_layers):
        din = embed_size if layer == 0 else 2 * H
        w_ih_f = jax.random.normal(next(keys), (din, 4 * H), jnp.float32) * 0.1
        w_hh_f = jax.random.normal(next(keys), (H, 4 * H), jnp.float32) * 0.1
        b_ih_f = jax.random.normal(next(keys), (4 * H,), jnp.float32) * 0.1
        b_hh_f = jax.random.normal(next(keys), (4 * H,), jnp.float32) * 0.1
        w_ih_b = jax.random.normal(next(keys), (din, 4 * H), jnp.float32) * 0.1
        w_hh_b = jax.random.normal(next(keys), (H, 4 * H), jnp.float32) * 0.1
        b_ih_b = jax.random.normal(next(keys), (4 * H,), jnp.float32) * 0.1
        b_hh_b = jax.random.normal(next(keys), (4 * H,), jnp.float32) * 0.1
        params["lstm"].append({
            "w_ih": jnp.concatenate([w_ih_f, w_ih_b], axis=1),        # (din, 8H)
            "w_hh_f": w_hh_f,
            "w_hh_b": w_hh_b,
            "b": jnp.concatenate([b_ih_f + b_hh_f,
                                  b_ih_b + b_hh_b])[None, :],          # (1, 8H)
        })
    params["w_dec"] = jax.random.normal(next(keys), (4 * H, 2), jnp.float32) * 0.1
    params["b_dec"] = jax.random.normal(next(keys), (1, 2), jnp.float32) * 0.1
    return params


@functools.partial(jax.jit, static_argnames=("num_hiddens", "num_layers"))
def birnn_forward(params, tokens, num_hiddens, num_layers):
    # tokens: (B, T) int32  ->  embeddings: (T, B, E) (== embedding(inputs.T))
    x = jnp.take(params["embedding"], tokens.T, axis=0)
    for layer in range(num_layers):
        p = params["lstm"][layer]
        x = bilstm_layer(x, p["w_ih"], p["w_hh_f"], p["w_hh_b"], p["b"],
                         num_hiddens)                       # (T, B, 2H)
    encoding = jnp.concatenate([x[0], x[-1]], axis=-1)      # (B, 4H)
    # Decoder left to XLA per perf review: a dedicated pallas_call for a
    # (B, 4H) @ (4H, 2) projection is dominated by launch overhead.
    return encoding @ params["w_dec"] + params["b_dec"]     # (B, 2)


# ---------------------------------------------------------------------------
# Pure-JAX reference (matched bf16 matmul precision) for a correctness check
# ---------------------------------------------------------------------------
def _bilstm_layer_ref(x, w_ih, w_hh_f, w_hh_b, b, H):
    T, B, Din = x.shape
    x2 = x.reshape(T * B, Din).astype(jnp.bfloat16)
    gx = jnp.dot(x2, w_ih.astype(jnp.bfloat16),
                 preferred_element_type=jnp.float32) + b
    gx = gx.reshape(T, B, 8 * H)

    def scan_dir(gx_dir, w_hh):
        def step(carry, gx_t):
            h, c = carry
            gates = gx_t + jnp.dot(h.astype(jnp.bfloat16),
                                   w_hh.astype(jnp.bfloat16),
                                   preferred_element_type=jnp.float32)
            sig = _sigmoid(gates)
            i_g, f_g, o_g = sig[:, :H], sig[:, H:2 * H], sig[:, 3 * H:4 * H]
            g_g = jnp.tanh(gates[:, 2 * H:3 * H])
            c = f_g * c + i_g * g_g
            h = o_g * jnp.tanh(c)
            return (h, c), h

        init = (jnp.zeros((B, H), jnp.float32), jnp.zeros((B, H), jnp.float32))
        _, hs = jax.lax.scan(step, init, gx_dir)
        return hs

    h_f = scan_dir(gx[:, :, :4 * H], w_hh_f)
    h_b = scan_dir(gx[::-1, :, 4 * H:], w_hh_b)[::-1]
    return jnp.concatenate([h_f, h_b], axis=-1)


def birnn_ref(params, tokens, num_hiddens, num_layers):
    x = jnp.take(params["embedding"], tokens.T, axis=0)
    for layer in range(num_layers):
        p = params["lstm"][layer]
        x = _bilstm_layer_ref(x, p["w_ih"], p["w_hh_f"], p["w_hh_b"], p["b"],
                              num_hiddens)
    encoding = jnp.concatenate([x[0], x[-1]], axis=-1)
    return encoding @ params["w_dec"] + params["b_dec"]


if __name__ == "__main__":
    vocab_size = 50
    embed_size = 32
    num_hiddens = 32
    num_layers = 2
    batch = 8
    seq_len = 8

    key = jax.random.PRNGKey(0)
    k_param, k_tok = jax.random.split(key)
    params = init_params(k_param, vocab_size, embed_size, num_hiddens,
                         num_layers)
    tokens = jax.random.randint(k_tok, (batch, seq_len), 0, vocab_size,
                                dtype=jnp.int32)

    out = birnn_forward(params, tokens, num_hiddens=num_hiddens,
                        num_layers=num_layers)
    out = jax.block_until_ready(out)
    assert out.shape == (batch, 2), out.shape

    ref = jax.block_until_ready(
        birnn_ref(params, tokens, num_hiddens, num_layers))
    assert jnp.allclose(out, ref, rtol=1e-2, atol=1e-2), (out, ref)

    print("KERNEL_OK")
</pallas_src>

<mosaic_0001>
module attributes {stable_mosaic.version = 11 : i64} {
  func.func @_bilstm_layer_kernel(%arg0: memref<8x8x32xf32, #tpu.memory_space<vmem>>, %arg1: memref<32x256xbf16, #tpu.memory_space<vmem>>, %arg2: memref<32x128xbf16, #tpu.memory_space<vmem>>, %arg3: memref<32x128xbf16, #tpu.memory_space<vmem>>, %arg4: memref<1x256xf32, #tpu.memory_space<vmem>>, %arg5: memref<8x8x64xf32, #tpu.memory_space<vmem>>, %arg6: memref<8x8x256xf32, #tpu.memory_space<vmem>>) attributes {dimension_semantics = [], scalar_prefetch = 0 : i64, scratch_operands = 1 : i64, tpu.core_type = #tpu.core_type<tc>} {
    %c0 = arith.constant 0 : index
    %c0_0 = arith.constant 0 : index
    %c0_1 = arith.constant 0 : index
    %0 = vector.load %arg0[%c0, %c0_0, %c0_1] : memref<8x8x32xf32, #tpu.memory_space<vmem>>, vector<8x8x32xf32>
    %1 = vector.shape_cast %0 : vector<8x8x32xf32> to vector<64x32xf32>
    %2 = arith.truncf %1 : vector<64x32xf32> to vector<64x32xbf16>
    %c0_2 = arith.constant 0 : index
    %c0_3 = arith.constant 0 : index
    %3 = vector.load %arg1[%c0_2, %c0_3] : memref<32x256xbf16, #tpu.memory_space<vmem>>, vector<32x256xbf16>
    %cst = arith.constant dense<0.000000e+00> : vector<64x256xf32>
    %4 = tpu.matmul %2, %3, %cst {dimension_numbers = #tpu.dot_dimension_numbers<[1], [0], [0], [1], [0, 0, 1, 1], [], []>} : vector<64x32xbf16>, vector<32x256xbf16>, vector<64x256xf32> -> vector<64x256xf32>
    %c0_4 = arith.constant 0 : index
    %c0_5 = arith.constant 0 : index
    %5 = vector.load %arg4[%c0_4, %c0_5] : memref<1x256xf32, #tpu.memory_space<vmem>>, vector<1x256xf32>
    %6 = vector.broadcast %5 : vector<1x256xf32> to vector<64x256xf32>
    %7 = arith.addf %4, %6 : vector<64x256xf32>
    %8 = vector.shape_cast %7 : vector<64x256xf32> to vector<8x8x256xf32>
    %c0_6 = arith.constant 0 : index
    %c0_7 = arith.constant 0 : index
    %c0_8 = arith.constant 0 : index
    %9 = vector.load %arg6[%c0_6, %c0_7, %c0_8] : memref<8x8x256xf32, #tpu.memory_space<vmem>>, vector<8x8x256xf32>
    tpu.vector_store %arg6[%c0_6, %c0_7, %c0_8], %8 {strides = array<i32>} : memref<8x8x256xf32, #tpu.memory_space<vmem>>, vector<8x8x256xf32>,
    %cst_9 = arith.constant 0.000000e+00 : f32
    %10 = vector.broadcast %cst_9 : f32 to vector<8x32xf32>
    %c0_i32 = arith.constant 0 : i32
    %11 = arith.index_cast %c0_i32 : i32 to index
    %c0_10 = arith.constant 0 : index
    %c0_11 = arith.constant 0 : index
    %12 = vector.load %arg6[%11, %c0_10, %c0_11] : memref<8x8x256xf32, #tpu.memory_space<vmem>>, vector<1x8x128xf32>
    %13 = vector.shape_cast %12 : vector<1x8x128xf32> to vector<8x128xf32>
    %c7_i32 = arith.constant 7 : i32
    %14 = arith.subi %c7_i32, %c0_i32 : i32
    %15 = arith.index_cast %14 : i32 to index
    %c0_12 = arith.constant 0 : index
    %c128 = arith.constant 128 : index
    %16 = vector.load %arg6[%15, %c0_12, %c128] : memref<8x8x256xf32, #tpu.memory_space<vmem>>, vector<1x8x128xf32>
    %17 = vector.shape_cast %16 : vector<1x8x128xf32> to vector<8x128xf32>
    %18 = arith.truncf %10 : vector<8x32xf32> to vector<8x32xbf16>
    %c0_13 = arith.constant 0 : index
    %c0_14 = arith.constant 0 : index
    %19 = vector.load %arg2[%c0_13, %c0_14] : memref<32x128xbf16, #tpu.memory_space<vmem>>, vector<32x128xbf16>
    %cst_15 = arith.constant dense<0.000000e+00> : vector<8x128xf32>
    %20 = tpu.matmul %18, %19, %cst_15 {dimension_numbers = #tpu.dot_dimension_numbers<[1], [0], [0], [1], [0, 0, 1, 1], [], []>} : vector<8x32xbf16>, vector<32x128xbf16>, vector<8x128xf32> -> vector<8x128xf32>
    %21 = arith.addf %13, %20 : vector<8x128xf32>
    %22 = arith.truncf %10 : vector<8x32xf32> to vector<8x32xbf16>
    %c0_16 = arith.constant 0 : index
    %c0_17 = arith.constant 0 : index
    %23 = vector.load %arg3[%c0_16, %c0_17] : memref<32x128xbf16, #tpu.memory_space<vmem>>, vector<32x128xbf16>
    %cst_18 = arith.constant dense<0.000000e+00> : vector<8x128xf32>
    %24 = tpu.matmul %22, %23, %cst_18 {dimension_numbers = #tpu.dot_dimension_numbers<[1], [0], [0], [1], [0, 0, 1, 1], [], []>} : vector<8x32xbf16>, vector<32x128xbf16>, vector<8x128xf32> -> vector<8x128xf32>
    %25 = arith.addf %17, %24 : vector<8x128xf32>
    %cst_19 = arith.constant 0.000000e+00 : f32
    %26 = vector.broadcast %cst_19 : f32 to vector<8x128xf32>
    %27 = arith.subf %26, %21 : vector<8x128xf32>
    %28 = math.exp %27 : vector<8x128xf32>
    %cst_20 = arith.constant 1.000000e+00 : f32
    %29 = vector.broadcast %cst_20 : f32 to vector<8x128xf32>
    %30 = arith.addf %29, %28 : vector<8x128xf32>
    %cst_21 = arith.constant 1.000000e+00 : f32
    %31 = vector.broadcast %cst_21 : f32 to vector<8x128xf32>
    %32 = arith.divf %31, %30 : vector<8x128xf32>
    %33 = vector.extract_strided_slice %32 {offsets = [0, 0], sizes = [8, 32], strides = [1, 1]} : vector<8x128xf32> to vector<8x32xf32>
    %34 = vector.extract_strided_slice %32 {offsets = [0, 32], sizes = [8, 32], strides = [1, 1]} : vector<8x128xf32> to vector<8x32xf32>
    %35 = vector.extract_strided_slice %32 {offsets = [0, 96], sizes = [8, 32], strides = [1, 1]} : vector<8x128xf32> to vector<8x32xf32>
    %36 = vector.extract_strided_slice %21 {offsets = [0, 64], sizes = [8, 32], strides = [1, 1]} : vector<8x128xf32> to vector<8x32xf32>
    %37 = math.tanh %36 : vector<8x32xf32>
    %38 = arith.mulf %34, %10 : vector<8x32xf32>
    %39 = arith.mulf %33, %37 : vector<8x32xf32>
    %40 = arith.addf %38, %39 : vector<8x32xf32>
    %41 = math.tanh %40 : vector<8x32xf32>
    %42 = arith.mulf %35, %41 : vector<8x32xf32>
    %cst_22 = arith.constant 0.000000e+00 : f32
    %43 = vector.broadcast %cst_22 : f32 to vector<8x128xf32>
    %44 = arith.subf %43, %25 : vector<8x128xf32>
    %45 = math.exp %44 : vector<8x128xf32>
    %cst_23 = arith.constant 1.000000e+00 : f32
    %46 = vector.broadcast %cst_23 : f32 to vector<8x128xf32>
    %47 = arith.addf %46, %45 : vector<8x128xf32>
    %cst_24 = arith.constant 1.000000e+00 : f32
    %48 = vector.broadcast %cst_24 : f32 to vector<8x128xf32>
    %49 = arith.divf %48, %47 : vector<8x128xf32>
    %50 = vector.extract_strided_slice %49 {offsets = [0, 0], sizes = [8, 32], strides = [1, 1]} : vector<8x128xf32> to vector<8x32xf32>
    %51 = vector.extract_strided_slice %49 {offsets = [0, 32], sizes = [8, 32], strides = [1, 1]} : vector<8x128xf32> to vector<8x32xf32>
    %52 = vector.extract_strided_slice %49 {offsets = [0, 96], sizes = [8, 32], strides = [1, 1]} : vector<8x128xf32> to vector<8x32xf32>
    %53 = vector.extract_strided_slice %25 {offsets = [0, 64], sizes = [8, 32], strides = [1, 1]} : vector<8x128xf32> to vector<8x32xf32>
    %54 = math.tanh %53 : vector<8x32xf32>
    %55 = arith.mulf %51, %10 : vector<8x32xf32>
    %56 = arith.mulf %50, %54 : vector<8x32xf32>
    %57 = arith.addf %55, %56 : vector<8x32xf32>
    %58 = math.tanh %57 : vector<8x32xf32>
    %59 = arith.mulf %52, %58 : vector<8x32xf32>
    %60 = arith.index_cast %c0_i32 : i32 to index
    %c0_25 = arith.constant 0 : index
    %c0_26 = arith.constant 0 : index
    %61 = vector.load %arg5[%60, %c0_25, %c0_26] : memref<8x8x64xf32, #tpu.memory_space<vmem>>, vector<1x8x32xf32>
    %62 = vector.shape_cast %61 : vector<1x8x32xf32> to vector<8x32xf32>
    %63 = vector.shape_cast %42 : vector<8x32xf32> to vector<1x8x32xf32>
    tpu.vector_store %arg5[%60, %c0_25, %c0_26], %63 {strides = array<i32>} : memref<8x8x64xf32, #tpu.memory_space<vmem>>, vector<1x8x32xf32>,
    %c7_i32_27 = arith.constant 7 : i32
    %64 = arith.subi %c7_i32_27, %c0_i32 : i32
    %65 = arith.index_cast %64 : i32 to index
    %c0_28 = arith.constant 0 : index
    %c32 = arith.constant 32 : index
    %66 = vector.load %arg5[%65, %c0_28, %c32] : memref<8x8x64xf32, #tpu.memory_space<vmem>>, vector<1x8x32xf32>
    %67 = vector.shape_cast %66 : vector<1x8x32xf32> to vector<8x32xf32>
    %68 = vector.shape_cast %59 : vector<8x32xf32> to vector<1x8x32xf32>
    tpu.vector_store %arg5[%65, %c0_28, %c32], %68 {strides = array<i32>} : memref<8x8x64xf32, #tpu.memory_space<vmem>>, vector<1x8x32xf32>,
    %c1_i32 = arith.constant 1 : i32
    %69 = arith.index_cast %c1_i32 : i32 to index
    %c0_29 = arith.constant 0 : index
    %c0_30 = arith.constant 0 : index
    %70 = vector.load %arg6[%69, %c0_29, %c0_30] : memref<8x8x256xf32, #tpu.memory_space<vmem>>, vector<1x8x128xf32>
    %71 = vector.shape_cast %70 : vector<1x8x128xf32> to vector<8x128xf32>
    %c7_i32_31 = arith.constant 7 : i32
    %72 = arith.subi %c7_i32_31, %c1_i32 : i32
    %73 = arith.index_cast %72 : i32 to index
    %c0_32 = arith.constant 0 : index
    %c128_33 = arith.constant 128 : index
    %74 = vector.load %arg6[%73, %c0_32, %c128_33] : memref<8x8x256xf32, #tpu.memory_space<vmem>>, vector<1x8x128xf32>
    %75 = vector.shape_cast %74 : vector<1x8x128xf32> to vector<8x128xf32>
    %76 = arith.truncf %42 : vector<8x32xf32> to vector<8x32xbf16>
    %c0_34 = arith.constant 0 : index
    %c0_35 = arith.constant 0 : index
    %77 = vector.load %arg2[%c0_34, %c0_35] : memref<32x128xbf16, #tpu.memory_space<vmem>>, vector<32x128xbf16>
    %cst_36 = arith.constant dense<0.000000e+00> : vector<8x128xf32>
    %78 = tpu.matmul %76, %77, %cst_36 {dimension_numbers = #tpu.dot_dimension_numbers<[1], [0], [0], [1], [0, 0, 1, 1], [], []>} : vector<8x32xbf16>, vector<32x128xbf16>, vector<8x128xf32> -> vector<8x128xf32>
    %79 = arith.addf %71, %78 : vector<8x128xf32>
    %80 = arith.truncf %59 : vector<8x32xf32> to vector<8x32xbf16>
    %c0_37 = arith.constant 0 : index
    %c0_38 = arith.constant 0 : index
    %81 = vector.load %arg3[%c0_37, %c0_38] : memref<32x128xbf16, #tpu.memory_space<vmem>>, vector<32x128xbf16>
    %cst_39 = arith.constant dense<0.000000e+00> : vector<8x128xf32>
    %82 = tpu.matmul %80, %81, %cst_39 {dimension_numbers = #tpu.dot_dimension_numbers<[1], [0], [0], [1], [0, 0, 1, 1], [], []>} : vector<8x32xbf16>, vector<32x128xbf16>, vector<8x128xf32> -> vector<8x128xf32>
    %83 = arith.addf %75, %82 : vector<8x128xf32>
    %cst_40 = arith.constant 0.000000e+00 : f32
    %84 = vector.broadcast %cst_40 : f32 to vector<8x128xf32>
    %85 = arith.subf %84, %79 : vector<8x128xf32>
    %86 = math.exp %85 : vector<8x128xf32>
    %cst_41 = arith.constant 1.000000e+00 : f32
    %87 = vector.broadcast %cst_41 : f32 to vector<8x128xf32>
    %88 = arith.addf %87, %86 : vector<8x128xf32>
    %cst_42 = arith.constant 1.000000e+00 : f32
    %89 = vector.broadcast %cst_42 : f32 to vector<8x128xf32>
    %90 = arith.divf %89, %88 : vector<8x128xf32>
    %91 = vector.extract_strided_slice %90 {offsets = [0, 0], sizes = [8, 32], strides = [1, 1]} : vector<8x128xf32> to vector<8x32xf32>
    %92 = vector.extract_strided_slice %90 {offsets = [0, 32], sizes = [8, 32], strides = [1, 1]} : vector<8x128xf32> to vector<8x32xf32>
    %93 = vector.extract_strided_slice %90 {offsets = [0, 96], sizes = [8, 32], strides = [1, 1]} : vector<8x128xf32> to vector<8x32xf32>
    %94 = vector.extract_strided_slice %79 {offsets = [0, 64], sizes = [8, 32], strides = [1, 1]} : vector<8x128xf32> to vector<8x32xf32>
    %95 = math.tanh %94 : vector<8x32xf32>
    %96 = arith.mulf %92, %40 : vector<8x32xf32>
    %97 = arith.mulf %91, %95 : vector<8x32xf32>
    %98 = arith.addf %96, %97 : vector<8x32xf32>
    %99 = math.tanh %98 : vector<8x32xf32>
    %100 = arith.mulf %93, %99 : vector<8x32xf32>
    %cst_43 = arith.constant 0.000000e+00 : f32
    %101 = vector.broadcast %cst_43 : f32 to vector<8x128xf32>
    %102 = arith.subf %101, %83 : vector<8x128xf32>
    %103 = math.exp %102 : vector<8x128xf32>
    %cst_44 = arith.constant 1.000000e+00 : f32
    %104 = vector.broadcast %cst_44 : f32 to vector<8x128xf32>
    %105 = arith.addf %104, %103 : vector<8x128xf32>
    %cst_45 = arith.constant 1.000000e+00 : f32
    %106 = vector.broadcast %cst_45 : f32 to vector<8x128xf32>
    %107 = arith.divf %106, %105 : vector<8x128xf32>
    %108 = vector.extract_strided_slice %107 {offsets = [0, 0], sizes = [8, 32], strides = [1, 1]} : vector<8x128xf32> to vector<8x32xf32>
    %109 = vector.extract_strided_slice %107 {offsets = [0, 32], sizes = [8, 32], strides = [1, 1]} : vector<8x128xf32> to vector<8x32xf32>
    %110 = vector.extract_strided_slice %107 {offsets = [0, 96], sizes = [8, 32], strides = [1, 1]} : vector<8x128xf32> to vector<8x32xf32>
    %111 = vector.extract_strided_slice %83 {offsets = [0, 64], sizes = [8, 32], strides = [1, 1]} : vector<8x128xf32> to vector<8x32xf32>
    %112 = math.tanh %111 : vector<8x32xf32>
    %113 = arith.mulf %109, %57 : vector<8x32xf32>
    %114 = arith.mulf %108, %112 : vector<8x32xf32>
    %115 = arith.addf %113, %114 : vector<8x32xf32>
    %116 = math.tanh %115 : vector<8x32xf32>
    %117 = arith.mulf %110, %116 : vector<8x32xf32>
    %118 = arith.index_cast %c1_i32 : i32 to index
    %c0_46 = arith.constant 0 : index
    %c0_47 = arith.constant 0 : index
    %119 = vector.load %arg5[%118, %c0_46, %c0_47] : memref<8x8x64xf32, #tpu.memory_space<vmem>>, vector<1x8x32xf32>
    %120 = vector.shape_cast %119 : vector<1x8x32xf32> to vector<8x32xf32>
    %121 = vector.shape_cast %100 : vector<8x32xf32> to vector<1x8x32xf32>
    tpu.vector_store %arg5[%118, %c0_46, %c0_47], %121 {strides = array<i32>} : memref<8x8x64xf32, #tpu.memory_space<vmem>>, vector<1x8x32xf32>,
    %c7_i32_48 = arith.constant 7 : i32
    %122 = arith.subi %c7_i32_48, %c1_i32 : i32
    %123 = arith.index_cast %122 : i32 to index
    %c0_49 = arith.constant 0 : index
    %c32_50 = arith.constant 32 : index
    %124 = vector.load %arg5[%123, %c0_49, %c32_50] : memref<8x8x64xf32, #tpu.memory_space<vmem>>, vector<1x8x32xf32>
    %125 = vector.shape_cast %124 : vector<1x8x32xf32> to vector<8x32xf32>
    %126 = vector.shape_cast %117 : vector<8x32xf32> to vector<1x8x32xf32>
    tpu.vector_store %arg5[%123, %c0_49, %c32_50], %126 {strides = array<i32>} : memref<8x8x64xf32, #tpu.memory_space<vmem>>, vector<1x8x32xf32>,
    %c2_i32 = arith.constant 2 : i32
    %127 = arith.index_cast %c2_i32 : i32 to index
    %c0_51 = arith.constant 0 : index
    %c0_52 = arith.constant 0 : index
    %128 = vector.load %arg6[%127, %c0_51, %c0_52] : memref<8x8x256xf32, #tpu.memory_space<vmem>>, vector<1x8x128xf32>
    %129 = vector.shape_cast %128 : vector<1x8x128xf32> to vector<8x128xf32>
    %c7_i32_53 = arith.constant 7 : i32
    %130 = arith.subi %c7_i32_53, %c2_i32 : i32
    %131 = arith.index_cast %130 : i32 to index
    %c0_54 = arith.constant 0 : index
    %c128_55 = arith.constant 128 : index
    %132 = vector.load %arg6[%131, %c0_54, %c128_55] : memref<8x8x256xf32, #tpu.memory_space<vmem>>, vector<1x8x128xf32>
    %133 = vector.shape_cast %132 : vector<1x8x128xf32> to vector<8x128xf32>
    %134 = arith.truncf %100 : vector<8x32xf32> to vector<8x32xbf16>
    %c0_56 = arith.constant 0 : index
    %c0_57 = arith.constant 0 : index
    %135 = vector.load %arg2[%c0_56, %c0_57] : memref<32x128xbf16, #tpu.memory_space<vmem>>, vector<32x128xbf16>
    %cst_58 = arith.constant dense<0.000000e+00> : vector<8x128xf32>
    %136 = tpu.matmul %134, %135, %cst_58 {dimension_numbers = #tpu.dot_dimension_numbers<[1], [0], [0], [1], [0, 0, 1, 1], [], []>} : vector<8x32xbf16>, vector<32x128xbf16>, vector<8x128xf32> -> vector<8x128xf32>
    %137 = arith.addf %129, %136 : vector<8x128xf32>
    %138 = arith.truncf %117 : vector<8x32xf32> to vector<8x32xbf16>
    %c0_59 = arith.constant 0 : index
    %c0_60 = arith.constant 0 : index
    %139 = vector.load %arg3[%c0_59, %c0_60] : memref<32x128xbf16, #tpu.memory_space<vmem>>, vector<32x128xbf16>
    %cst_61 = arith.constant dense<0.000000e+00> : vector<8x128xf32>
    %140 = tpu.matmul %138, %139, %cst_61 {dimension_numbers = #tpu.dot_dimension_numbers<[1], [0], [0], [1], [0, 0, 1, 1], [], []>} : vector<8x32xbf16>, vector<32x128xbf16>, vector<8x128xf32> -> vector<8x128xf32>
    %141 = arith.addf %133, %140 : vector<8x128xf32>
    %cst_62 = arith.constant 0.000000e+00 : f32
    %142 = vector.broadcast %cst_62 : f32 to vector<8x128xf32>
    %143 = arith.subf %142, %137 : vector<8x128xf32>
    %144 = math.exp %143 : vector<8x128xf32>
    %cst_63 = arith.constant 1.000000e+00 : f32
    %145 = vector.broadcast %cst_63 : f32 to vector<8x128xf32>
    %146 = arith.addf %145, %144 : vector<8x128xf32>
    %cst_64 = arith.constant 1.000000e+00 : f32
    %147 = vector.broadcast %cst_64 : f32 to vector<8x128xf32>
    %148 = arith.divf %147, %146 : vector<8x128xf32>
    %149 = vector.extract_strided_slice %148 {offsets = [0, 0], sizes = [8, 32], strides = [1, 1]} : vector<8x128xf32> to vector<8x32xf32>
    %150 = vector.extract_strided_slice %148 {offsets = [0, 32], sizes = [8, 32], strides = [1, 1]} : vector<8x128xf32> to vector<8x32xf32>
    %151 = vector.extract_strided_slice %148 {offsets = [0, 96], sizes = [8, 32], strides = [1, 1]} : vector<8x128xf32> to vector<8x32xf32>
    %152 = vector.extract_strided_slice %137 {offsets = [0, 64], sizes = [8, 32], strides = [1, 1]} : vector<8x128xf32> to vector<8x32xf32>
    %153 = math.tanh %152 : vector<8x32xf32>
    %154 = arith.mulf %150, %98 : vector<8x32xf32>
    %155 = arith.mulf %149, %153 : vector<8x32xf32>
    %156 = arith.addf %154, %155 : vector<8x32xf32>
    %157 = math.tanh %156 : vector<8x32xf32>
    %158 = arith.mulf %151, %157 : vector<8x32xf32>
    %cst_65 = arith.constant 0.000000e+00 : f32
    %159 = vector.broadcast %cst_65 : f32 to vector<8x128xf32>
    %160 = arith.subf %159, %141 : vector<8x128xf32>
    %161 = math.exp %160 : vector<8x128xf32>
    %cst_66 = arith.constant 1.000000e+00 : f32
    %162 = vector.broadcast %cst_66 : f32 to vector<8x128xf32>
    %163 = arith.addf %162, %161 : vector<8x128xf32>
    %cst_67 = arith.constant 1.000000e+00 : f32
    %164 = vector.broadcast %cst_67 : f32 to vector<8x128xf32>
    %165 = arith.divf %164, %163 : vector<8x128xf32>
    %166 = vector.extract_strided_slice %165 {offsets = [0, 0], sizes = [8, 32], strides = [1, 1]} : vector<8x128xf32> to vector<8x32xf32>
    %167 = vector.extract_strided_slice %165 {offsets = [0, 32], sizes = [8, 32], strides = [1, 1]} : vector<8x128xf32> to vector<8x32xf32>
    %168 = vector.extract_strided_slice %165 {offsets = [0, 96], sizes = [8, 32], strides = [1, 1]} : vector<8x128xf32> to vector<8x32xf32>
    %169 = vector.extract_strided_slice %141 {offsets = [0, 64], sizes = [8, 32], strides = [1, 1]} : vector<8x128xf32> to vector<8x32xf32>
    %170 = math.tanh %169 : vector<8x32xf32>
    %171 = arith.mulf %167, %115 : vector<8x32xf32>
    %172 = arith.mulf %166, %170 : vector<8x32xf32>
    %173 = arith.addf %171, %172 : vector<8x32xf32>
    %174 = math.tanh %173 : vector<8x32xf32>
    %175 = arith.mulf %168, %174 : vector<8x32xf32>
    %176 = arith.index_cast %c2_i32 : i32 to index
    %c0_68 = arith.constant 0 : index
    %c0_69 = arith.constant 0 : index
    %177 = vector.load %arg5[%176, %c0_68, %c0_69] : memref<8x8x64xf32, #tpu.memory_space<vmem>>, vector<1x8x32xf32>
    %178 = vector.shape_cast %177 : vector<1x8x32xf32> to vector<8x32xf32>
    %179 = vector.shape_cast %158 : vector<8x32xf32> to vector<1x8x32xf32>
    tpu.vector_store %arg5[%176, %c0_68, %c0_69], %179 {strides = array<i32>} : memref<8x8x64xf32, #tpu.memory_space<vmem>>, vector<1x8x32xf32>,
    %c7_i32_70 = arith.constant 7 : i32
    %180 = arith.subi %c7_i32_70, %c2_i32 : i32
    %181 = arith.index_cast %180 : i32 to index
    %c0_71 = arith.constant 0 : index
    %c32_72 = arith.constant 32 : index
    %182 = vector.load %arg5[%181, %c0_71, %c32_72] : memref<8x8x64xf32, #tpu.memory_space<vmem>>, vector<1x8x32xf32>
    %183 = vector.shape_cast %182 : vector<1x8x32xf32> to vector<8x32xf32>
    %184 = vector.shape_cast %175 : vector<8x32xf32> to vector<1x8x32xf32>
    tpu.vector_store %arg5[%181, %c0_71, %c32_72], %184 {strides = array<i32>} : memref<8x8x64xf32, #tpu.memory_space<vmem>>, vector<1x8x32xf32>,
    %c3_i32 = arith.constant 3 : i32
    %185 = arith.index_cast %c3_i32 : i32 to index
    %c0_73 = arith.constant 0 : index
    %c0_74 = arith.constant 0 : index
    %186 = vector.load %arg6[%185, %c0_73, %c0_74] : memref<8x8x256xf32, #tpu.memory_space<vmem>>, vector<1x8x128xf32>
    %187 = vector.shape_cast %186 : vector<1x8x128xf32> to vector<8x128xf32>
    %c7_i32_75 = arith.constant 7 : i32
    %188 = arith.subi %c7_i32_75, %c3_i32 : i32
    %189 = arith.index_cast %188 : i32 to index
    %c0_76 = arith.constant 0 : index
    %c128_77 = arith.constant 128 : index
    %190 = vector.load %arg6[%189, %c0_76, %c128_77] : memref<8x8x256xf32, #tpu.memory_space<vmem>>, vector<1x8x128xf32>
    %191 = vector.shape_cast %190 : vector<1x8x128xf32> to vector<8x128xf32>
    %192 = arith.truncf %158 : vector<8x32xf32> to vector<8x32xbf16>
    %c0_78 = arith.constant 0 : index
    %c0_79 = arith.constant 0 : index
    %193 = vector.load %arg2[%c0_78, %c0_79] : memref<32x128xbf16, #tpu.memory_space<vmem>>, vector<32x128xbf16>
    %cst_80 = arith.constant dense<0.000000e+00> : vector<8x128xf32>
    %194 = tpu.matmul %192, %193, %cst_80 {dimension_numbers = #tpu.dot_dimension_numbers<[1], [0], [0], [1], [0, 0, 1, 1], [], []>} : vector<8x32xbf16>, vector<32x128xbf16>, vector<8x128xf32> -> vector<8x128xf32>
    %195 = arith.addf %187, %194 : vector<8x128xf32>
    %196 = arith.truncf %175 : vector<8x32xf32> to vector<8x32xbf16>
    %c0_81 = arith.constant 0 : index
    %c0_82 = arith.constant 0 : index
    %197 = vector.load %arg3[%c0_81, %c0_82] : memref<32x128xbf16, #tpu.memory_space<vmem>>, vector<32x128xbf16>
    %cst_83 = arith.constant dense<0.000000e+00> : vector<8x128xf32>
    %198 = tpu.matmul %196, %197, %cst_83 {dimension_numbers = #tpu.dot_dimension_numbers<[1], [0], [0], [1], [0, 0, 1, 1], [], []>} : vector<8x32xbf16>, vector<32x128xbf16>, vector<8x128xf32> -> vector<8x128xf32>
    %199 = arith.addf %191, %198 : vector<8x128xf32>
    %cst_84 = arith.constant 0.000000e+00 : f32
    %200 = vector.broadcast %cst_84 : f32 to vector<8x128xf32>
    %201 = arith.subf %200, %195 : vector<8x128xf32>
    %202 = math.exp %201 : vector<8x128xf32>
    %cst_85 = arith.constant 1.000000e+00 : f32
    %203 = vector.broadcast %cst_85 : f32 to vector<8x128xf32>
    %204 = arith.addf %203, %202 : vector<8x128xf32>
    %cst_86 = arith.constant 1.000000e+00 : f32
    %205 = vector.broadcast %cst_86 : f32 to vector<8x128xf32>
    %206 = arith.divf %205, %204 : vector<8x128xf32>
    %207 = vector.extract_strided_slice %206 {offsets = [0, 0], sizes = [8, 32], strides = [1, 1]} : vector<8x128xf32> to vector<8x32xf32>
    %208 = vector.extract_strided_slice %206 {offsets = [0, 32], sizes = [8, 32], strides = [1, 1]} : vector<8x128xf32> to vector<8x32xf32>
    %209 = vector.extract_strided_slice %206 {offsets = [0, 96], sizes = [8, 32], strides = [1, 1]} : vector<8x128xf32> to vector<8x32xf32>
    %210 = vector.extract_strided_slice %195 {offsets = [0, 64], sizes = [8, 32], strides = [1, 1]} : vector<8x128xf32> to vector<8x32xf32>
    %211 = math.tanh %210 : vector<8x32xf32>
    %212 = arith.mulf %208, %156 : vector<8x32xf32>
    %213 = arith.mulf %207, %211 : vector<8x32xf32>
    %214 = arith.addf %212, %213 : vector<8x32xf32>
    %215 = math.tanh %214 : vector<8x32xf32>
    %216 = arith.mulf %209, %215 : vector<8x32xf32>
    %cst_87 = arith.constant 0.000000e+00 : f32
    %217 = vector.broadcast %cst_87 : f32 to vector<8x128xf32>
    %218 = arith.subf %217, %199 : vector<8x128xf32>
    %219 = math.exp %218 : vector<8x128xf32>
    %cst_88 = arith.constant 1.000000e+00 : f32
    %220 = vector.broadcast %cst_88 : f32 to vector<8x128xf32>
    %221 = arith.addf %220, %219 : vector<8x128xf32>
    %cst_89 = arith.constant 1.000000e+00 : f32
    %222 = vector.broadcast %cst_89 : f32 to vector<8x128xf32>
    %223 = arith.divf %222, %221 : vector<8x128xf32>
    %224 = vector.extract_strided_slice %223 {offsets = [0, 0], sizes = [8, 32], strides = [1, 1]} : vector<8x128xf32> to vector<8x32xf32>
    %225 = vector.extract_strided_slice %223 {offsets = [0, 32], sizes = [8, 32], strides = [1, 1]} : vector<8x128xf32> to vector<8x32xf32>
    %226 = vector.extract_strided_slice %223 {offsets = [0, 96], sizes = [8, 32], strides = [1, 1]} : vector<8x128xf32> to vector<8x32xf32>
    %227 = vector.extract_strided_slice %199 {offsets = [0, 64], sizes = [8, 32], strides = [1, 1]} : vector<8x128xf32> to vector<8x32xf32>
    %228 = math.tanh %227 : vector<8x32xf32>
    %229 = arith.mulf %225, %173 : vector<8x32xf32>
    %230 = arith.mulf %224, %228 : vector<8x32xf32>
    %231 = arith.addf %229, %230 : vector<8x32xf32>
    %232 = math.tanh %231 : vector<8x32xf32>
    %233 = arith.mulf %226, %232 : vector<8x32xf32>
    %234 = arith.index_cast %c3_i32 : i32 to index
    %c0_90 = arith.constant 0 : index
    %c0_91 = arith.constant 0 : index
    %235 = vector.load %arg5[%234, %c0_90, %c0_91] : memref<8x8x64xf32, #tpu.memory_space<vmem>>, vector<1x8x32xf32>
    %236 = vector.shape_cast %235 : vector<1x8x32xf32> to vector<8x32xf32>
    %237 = vector.shape_cast %216 : vector<8x32xf32> to vector<1x8x32xf32>
    tpu.vector_store %arg5[%234, %c0_90, %c0_91], %237 {strides = array<i32>} : memref<8x8x64xf32, #tpu.memory_space<vmem>>, vector<1x8x32xf32>,
    %c7_i32_92 = arith.constant 7 : i32
    %238 = arith.subi %c7_i32_92, %c3_i32 : i32
    %239 = arith.index_cast %238 : i32 to index
    %c0_93 = arith.constant 0 : index
    %c32_94 = arith.constant 32 : index
    %240 = vector.load %arg5[%239, %c0_93, %c32_94] : memref<8x8x64xf32, #tpu.memory_space<vmem>>, vector<1x8x32xf32>
    %241 = vector.shape_cast %240 : vector<1x8x32xf32> to vector<8x32xf32>
    %242 = vector.shape_cast %233 : vector<8x32xf32> to vector<1x8x32xf32>
    tpu.vector_store %arg5[%239, %c0_93, %c32_94], %242 {strides = array<i32>} : memref<8x8x64xf32, #tpu.memory_space<vmem>>, vector<1x8x32xf32>,
    %c4_i32 = arith.constant 4 : i32
    %243 = arith.index_cast %c4_i32 : i32 to index
    %c0_95 = arith.constant 0 : index
    %c0_96 = arith.constant 0 : index
    %244 = vector.load %arg6[%243, %c0_95, %c0_96] : memref<8x8x256xf32, #tpu.memory_space<vmem>>, vector<1x8x128xf32>
    %245 = vector.shape_cast %244 : vector<1x8x128xf32> to vector<8x128xf32>
    %c7_i32_97 = arith.constant 7 : i32
    %246 = arith.subi %c7_i32_97, %c4_i32 : i32
    %247 = arith.index_cast %246 : i32 to index
    %c0_98 = arith.constant 0 : index
    %c128_99 = arith.constant 128 : index
    %248 = vector.load %arg6[%247, %c0_98, %c128_99] : memref<8x8x256xf32, #tpu.memory_space<vmem>>, vector<1x8x128xf32>
    %249 = vector.shape_cast %248 : vector<1x8x128xf32> to vector<8x128xf32>
    %250 = arith.truncf %216 : vector<8x32xf32> to vector<8x32xbf16>
    %c0_100 = arith.constant 0 : index
    %c0_101 = arith.constant 0 : index
    %251 = vector.load %arg2[%c0_100, %c0_101] : memref<32x128xbf16, #tpu.memory_space<vmem>>, vector<32x128xbf16>
    %cst_102 = arith.constant dense<0.000000e+00> : vector<8x128xf32>
    %252 = tpu.matmul %250, %251, %cst_102 {dimension_numbers = #tpu.dot_dimension_numbers<[1], [0], [0], [1], [0, 0, 1, 1], [], []>} : vector<8x32xbf16>, vector<32x128xbf16>, vector<8x128xf32> -> vector<8x128xf32>
    %253 = arith.addf %245, %252 : vector<8x128xf32>
    %254 = arith.truncf %233 : vector<8x32xf32> to vector<8x32xbf16>
    %c0_103 = arith.constant 0 : index
    %c0_104 = arith.constant 0 : index
    %255 = vector.load %arg3[%c0_103, %c0_104] : memref<32x128xbf16, #tpu.memory_space<vmem>>, vector<32x128xbf16>
    %cst_105 = arith.constant dense<0.000000e+00> : vector<8x128xf32>
    %256 = tpu.matmul %254, %255, %cst_105 {dimension_numbers = #tpu.dot_dimension_numbers<[1], [0], [0], [1], [0, 0, 1, 1], [], []>} : vector<8x32xbf16>, vector<32x128xbf16>, vector<8x128xf32> -> vector<8x128xf32>
    %257 = arith.addf %249, %256 : vector<8x128xf32>
    %cst_106 = arith.constant 0.000000e+00 : f32
    %258 = vector.broadcast %cst_106 : f32 to vector<8x128xf32>
    %259 = arith.subf %258, %253 : vector<8x128xf32>
    %260 = math.exp %259 : vector<8x128xf32>
    %cst_107 = arith.constant 1.000000e+00 : f32
    %261 = vector.broadcast %cst_107 : f32 to vector<8x128xf32>
    %262 = arith.addf %261, %260 : vector<8x128xf32>
    %cst_108 = arith.constant 1.000000e+00 : f32
    %263 = vector.broadcast %cst_108 : f32 to vector<8x128xf32>
    %264 = arith.divf %263, %262 : vector<8x128xf32>
    %265 = vector.extract_strided_slice %264 {offsets = [0, 0], sizes = [8, 32], strides = [1, 1]} : vector<8x128xf32> to vector<8x32xf32>
    %266 = vector.extract_strided_slice %264 {offsets = [0, 32], sizes = [8, 32], strides = [1, 1]} : vector<8x128xf32> to vector<8x32xf32>
    %267 = vector.extract_strided_slice %264 {offsets = [0, 96], sizes = [8, 32], strides = [1, 1]} : vector<8x128xf32> to vector<8x32xf32>
    %268 = vector.extract_strided_slice %253 {offsets = [0, 64], sizes = [8, 32], strides = [1, 1]} : vector<8x128xf32> to vector<8x32xf32>
    %269 = math.tanh %268 : vector<8x32xf32>
    %270 = arith.mulf %266, %214 : vector<8x32xf32>
    %271 = arith.mulf %265, %269 : vector<8x32xf32>
    %272 = arith.addf %270, %271 : vector<8x32xf32>
    %273 = math.tanh %272 : vector<8x32xf32>
    %274 = arith.mulf %267, %273 : vector<8x32xf32>
    %cst_109 = arith.constant 0.000000e+00 : f32
    %275 = vector.broadcast %cst_109 : f32 to vector<8x128xf32>
    %276 = arith.subf %275, %257 : vector<8x128xf32>
    %277 = math.exp %276 : vector<8x128xf32>
    %cst_110 = arith.constant 1.000000e+00 : f32
    %278 = vector.broadcast %cst_110 : f32 to vector<8x128xf32>
    %279 = arith.addf %278, %277 : vector<8x128xf32>
    %cst_111 = arith.constant 1.000000e+00 : f32
    %280 = vector.broadcast %cst_111 : f32 to vector<8x128xf32>
    %281 = arith.divf %280, %279 : vector<8x128xf32>
    %282 = vector.extract_strided_slice %281 {offsets = [0, 0], sizes = [8, 32], strides = [1, 1]} : vector<8x128xf32> to vector<8x32xf32>
    %283 = vector.extract_strided_slice %281 {offsets = [0, 32], sizes = [8, 32], strides = [1, 1]} : vector<8x128xf32> to vector<8x32xf32>
    %284 = vector.extract_strided_slice %281 {offsets = [0, 96], sizes = [8, 32], strides = [1, 1]} : vector<8x128xf32> to vector<8x32xf32>
    %285 = vector.extract_strided_slice %257 {offsets = [0, 64], sizes = [8, 32], strides = [1, 1]} : vector<8x128xf32> to vector<8x32xf32>
    %286 = math.tanh %285 : vector<8x32xf32>
    %287 = arith.mulf %283, %231 : vector<8x32xf32>
    %288 = arith.mulf %282, %286 : vector<8x32xf32>
    %289 = arith.addf %287, %288 : vector<8x32xf32>
    %290 = math.tanh %289 : vector<8x32xf32>
    %291 = arith.mulf %284, %290 : vector<8x32xf32>
    %292 = arith.index_cast %c4_i32 : i32 to index
    %c0_112 = arith.constant 0 : index
    %c0_113 = arith.constant 0 : index
    %293 = vector.load %arg5[%292, %c0_112, %c0_113] : memref<8x8x64xf32, #tpu.memory_space<vmem>>, vector<1x8x32xf32>
    %294 = vector.shape_cast %293 : vector<1x8x32xf32> to vector<8x32xf32>
    %295 = vector.shape_cast %274 : vector<8x32xf32> to vector<1x8x32xf32>
    tpu.vector_store %arg5[%292, %c0_112, %c0_113], %295 {strides = array<i32>} : memref<8x8x64xf32, #tpu.memory_space<vmem>>, vector<1x8x32xf32>,
    %c7_i32_114 = arith.constant 7 : i32
    %296 = arith.subi %c7_i32_114, %c4_i32 : i32
    %297 = arith.index_cast %296 : i32 to index
    %c0_115 = arith.constant 0 : index
    %c32_116 = arith.constant 32 : index
    %298 = vector.load %arg5[%297, %c0_115, %c32_116] : memref<8x8x64xf32, #tpu.memory_space<vmem>>, vector<1x8x32xf32>
    %299 = vector.shape_cast %298 : vector<1x8x32xf32> to vector<8x32xf32>
    %300 = vector.shape_cast %291 : vector<8x32xf32> to vector<1x8x32xf32>
    tpu.vector_store %arg5[%297, %c0_115, %c32_116], %300 {strides = array<i32>} : memref<8x8x64xf32, #tpu.memory_space<vmem>>, vector<1x8x32xf32>,
    %c5_i32 = arith.constant 5 : i32
    %301 = arith.index_cast %c5_i32 : i32 to index
    %c0_117 = arith.constant 0 : index
    %c0_118 = arith.constant 0 : index
    %302 = vector.load %arg6[%301, %c0_117, %c0_118] : memref<8x8x256xf32, #tpu.memory_space<vmem>>, vector<1x8x128xf32>
    %303 = vector.shape_cast %302 : vector<1x8x128xf32> to vector<8x128xf32>
    %c7_i32_119 = arith.constant 7 : i32
    %304 = arith.subi %c7_i32_119, %c5_i32 : i32
    %305 = arith.index_cast %304 : i32 to index
    %c0_120 = arith.constant 0 : index
    %c128_121 = arith.constant 128 : index
    %306 = vector.load %arg6[%305, %c0_120, %c128_121] : memref<8x8x256xf32, #tpu.memory_space<vmem>>, vector<1x8x128xf32>
    %307 = vector.shape_cast %306 : vector<1x8x128xf32> to vector<8x128xf32>
    %308 = arith.truncf %274 : vector<8x32xf32> to vector<8x32xbf16>
    %c0_122 = arith.constant 0 : index
    %c0_123 = arith.constant 0 : index
    %309 = vector.load %arg2[%c0_122, %c0_123] : memref<32x128xbf16, #tpu.memory_space<vmem>>, vector<32x128xbf16>
    %cst_124 = arith.constant dense<0.000000e+00> : vector<8x128xf32>
    %310 = tpu.matmul %308, %309, %cst_124 {dimension_numbers = #tpu.dot_dimension_numbers<[1], [0], [0], [1], [0, 0, 1, 1], [], []>} : vector<8x32xbf16>, vector<32x128xbf16>, vector<8x128xf32> -> vector<8x128xf32>
    %311 = arith.addf %303, %310 : vector<8x128xf32>
    %312 = arith.truncf %291 : vector<8x32xf32> to vector<8x32xbf16>
    %c0_125 = arith.constant 0 : index
    %c0_126 = arith.constant 0 : index
    %313 = vector.load %arg3[%c0_125, %c0_126] : memref<32x128xbf16, #tpu.memory_space<vmem>>, vector<32x128xbf16>
    %cst_127 = arith.constant dense<0.000000e+00> : vector<8x128xf32>
    %314 = tpu.matmul %312, %313, %cst_127 {dimension_numbers = #tpu.dot_dimension_numbers<[1], [0], [0], [1], [0, 0, 1, 1], [], []>} : vector<8x32xbf16>, vector<32x128xbf16>, vector<8x128xf32> -> vector<8x128xf32>
    %315 = arith.addf %307, %314 : vector<8x128xf32>
    %cst_128 = arith.constant 0.000000e+00 : f32
    %316 = vector.broadcast %cst_128 : f32 to vector<8x128xf32>
    %317 = arith.subf %316, %311 : vector<8x128xf32>
    %318 = math.exp %317 : vector<8x128xf32>
    %cst_129 = arith.constant 1.000000e+00 : f32
    %319 = vector.broadcast %cst_129 : f32 to vector<8x128xf32>
    %320 = arith.addf %319, %318 : vector<8x128xf32>
    %cst_130 = arith.constant 1.000000e+00 : f32
    %321 = vector.broadcast %cst_130 : f32 to vector<8x128xf32>
    %322 = arith.divf %321, %320 : vector<8x128xf32>
    %323 = vector.extract_strided_slice %322 {offsets = [0, 0], sizes = [8, 32], strides = [1, 1]} : vector<8x128xf32> to vector<8x32xf32>
    %324 = vector.extract_strided_slice %322 {offsets = [0, 32], sizes = [8, 32], strides = [1, 1]} : vector<8x128xf32> to vector<8x32xf32>
    %325 = vector.extract_strided_slice %322 {offsets = [0, 96], sizes = [8, 32], strides = [1, 1]} : vector<8x128xf32> to vector<8x32xf32>
    %326 = vector.extract_strided_slice %311 {offsets = [0, 64], sizes = [8, 32], strides = [1, 1]} : vector<8x128xf32> to vector<8x32xf32>
    %327 = math.tanh %326 : vector<8x32xf32>
    %328 = arith.mulf %324, %272 : vector<8x32xf32>
    %329 = arith.mulf %323, %327 : vector<8x32xf32>
    %330 = arith.addf %328, %329 : vector<8x32xf32>
    %331 = math.tanh %330 : vector<8x32xf32>
    %332 = arith.mulf %325, %331 : vector<8x32xf32>
    %cst_131 = arith.constant 0.000000e+00 : f32
    %333 = vector.broadcast %cst_131 : f32 to vector<8x128xf32>
    %334 = arith.subf %333, %315 : vector<8x128xf32>
    %335 = math.exp %334 : vector<8x128xf32>
    %cst_132 = arith.constant 1.000000e+00 : f32
    %336 = vector.broadcast %cst_132 : f32 to vector<8x128xf32>
    %337 = arith.addf %336, %335 : vector<8x128xf32>
    %cst_133 = arith.constant 1.000000e+00 : f32
    %338 = vector.broadcast %cst_133 : f32 to vector<8x128xf32>
    %339 = arith.divf %338, %337 : vector<8x128xf32>
    %340 = vector.extract_strided_slice %339 {offsets = [0, 0], sizes = [8, 32], strides = [1, 1]} : vector<8x128xf32> to vector<8x32xf32>
    %341 = vector.extract_strided_slice %339 {offsets = [0, 32], sizes = [8, 32], strides = [1, 1]} : vector<8x128xf32> to vector<8x32xf32>
    %342 = vector.extract_strided_slice %339 {offsets = [0, 96], sizes = [8, 32], strides = [1, 1]} : vector<8x128xf32> to vector<8x32xf32>
    %343 = vector.extract_strided_slice %315 {offsets = [0, 64], sizes = [8, 32], strides = [1, 1]} : vector<8x128xf32> to vector<8x32xf32>
    %344 = math.tanh %343 : vector<8x32xf32>
    %345 = arith.mulf %341, %289 : vector<8x32xf32>
    %346 = arith.mulf %340, %344 : vector<8x32xf32>
    %347 = arith.addf %345, %346 : vector<8x32xf32>
    %348 = math.tanh %347 : vector<8x32xf32>
    %349 = arith.mulf %342, %348 : vector<8x32xf32>
    %350 = arith.index_cast %c5_i32 : i32 to index
    %c0_134 = arith.constant 0 : index
    %c0_135 = arith.constant 0 : index
    %351 = vector.load %arg5[%350, %c0_134, %c0_135] : memref<8x8x64xf32, #tpu.memory_space<vmem>>, vector<1x8x32xf32>
    %352 = vector.shape_cast %351 : vector<1x8x32xf32> to vector<8x32xf32>
    %353 = vector.shape_cast %332 : vector<8x32xf32> to vector<1x8x32xf32>
    tpu.vector_store %arg5[%350, %c0_134, %c0_135], %353 {strides = array<i32>} : memref<8x8x64xf32, #tpu.memory_space<vmem>>, vector<1x8x32xf32>,
    %c7_i32_136 = arith.constant 7 : i32
    %354 = arith.subi %c7_i32_136, %c5_i32 : i32
    %355 = arith.index_cast %354 : i32 to index
    %c0_137 = arith.constant 0 : index
    %c32_138 = arith.constant 32 : index
    %356 = vector.load %arg5[%355, %c0_137, %c32_138] : memref<8x8x64xf32, #tpu.memory_space<vmem>>, vector<1x8x32xf32>
    %357 = vector.shape_cast %356 : vector<1x8x32xf32> to vector<8x32xf32>
    %358 = vector.shape_cast %349 : vector<8x32xf32> to vector<1x8x32xf32>
    tpu.vector_store %arg5[%355, %c0_137, %c32_138], %358 {strides = array<i32>} : memref<8x8x64xf32, #tpu.memory_space<vmem>>, vector<1x8x32xf32>,
    %c6_i32 = arith.constant 6 : i32
    %359 = arith.index_cast %c6_i32 : i32 to index
    %c0_139 = arith.constant 0 : index
    %c0_140 = arith.constant 0 : index
    %360 = vector.load %arg6[%359, %c0_139, %c0_140] : memref<8x8x256xf32, #tpu.memory_space<vmem>>, vector<1x8x128xf32>
    %361 = vector.shape_cast %360 : vector<1x8x128xf32> to vector<8x128xf32>
    %c7_i32_141 = arith.constant 7 : i32
    %362 = arith.subi %c7_i32_141, %c6_i32 : i32
    %363 = arith.index_cast %362 : i32 to index
    %c0_142 = arith.constant 0 : index
    %c128_143 = arith.constant 128 : index
    %364 = vector.load %arg6[%363, %c0_142, %c128_143] : memref<8x8x256xf32, #tpu.memory_space<vmem>>, vector<1x8x128xf32>
    %365 = vector.shape_cast %364 : vector<1x8x128xf32> to vector<8x128xf32>
    %366 = arith.truncf %332 : vector<8x32xf32> to vector<8x32xbf16>
    %c0_144 = arith.constant 0 : index
    %c0_145 = arith.constant 0 : index
    %367 = vector.load %arg2[%c0_144, %c0_145] : memref<32x128xbf16, #tpu.memory_space<vmem>>, vector<32x128xbf16>
    %cst_146 = arith.constant dense<0.000000e+00> : vector<8x128xf32>
    %368 = tpu.matmul %366, %367, %cst_146 {dimension_numbers = #tpu.dot_dimension_numbers<[1], [0], [0], [1], [0, 0, 1, 1], [], []>} : vector<8x32xbf16>, vector<32x128xbf16>, vector<8x128xf32> -> vector<8x128xf32>
    %369 = arith.addf %361, %368 : vector<8x128xf32>
    %370 = arith.truncf %349 : vector<8x32xf32> to vector<8x32xbf16>
    %c0_147 = arith.constant 0 : index
    %c0_148 = arith.constant 0 : index
    %371 = vector.load %arg3[%c0_147, %c0_148] : memref<32x128xbf16, #tpu.memory_space<vmem>>, vector<32x128xbf16>
    %cst_149 = arith.constant dense<0.000000e+00> : vector<8x128xf32>
    %372 = tpu.matmul %370, %371, %cst_149 {dimension_numbers = #tpu.dot_dimension_numbers<[1], [0], [0], [1], [0, 0, 1, 1], [], []>} : vector<8x32xbf16>, vector<32x128xbf16>, vector<8x128xf32> -> vector<8x128xf32>
    %373 = arith.addf %365, %372 : vector<8x128xf32>
    %cst_150 = arith.constant 0.000000e+00 : f32
    %374 = vector.broadcast %cst_150 : f32 to vector<8x128xf32>
    %375 = arith.subf %374, %369 : vector<8x128xf32>
    %376 = math.exp %375 : vector<8x128xf32>
    %cst_151 = arith.constant 1.000000e+00 : f32
    %377 = vector.broadcast %cst_151 : f32 to vector<8x128xf32>
    %378 = arith.addf %377, %376 : vector<8x128xf32>
    %cst_152 = arith.constant 1.000000e+00 : f32
    %379 = vector.broadcast %cst_152 : f32 to vector<8x128xf32>
    %380 = arith.divf %379, %378 : vector<8x128xf32>
    %381 = vector.extract_strided_slice %380 {offsets = [0, 0], sizes = [8, 32], strides = [1, 1]} : vector<8x128xf32> to vector<8x32xf32>
    %382 = vector.extract_strided_slice %380 {offsets = [0, 32], sizes = [8, 32], strides = [1, 1]} : vector<8x128xf32> to vector<8x32xf32>
    %383 = vector.extract_strided_slice %380 {offsets = [0, 96], sizes = [8, 32], strides = [1, 1]} : vector<8x128xf32> to vector<8x32xf32>
    %384 = vector.extract_strided_slice %369 {offsets = [0, 64], sizes = [8, 32], strides = [1, 1]} : vector<8x128xf32> to vector<8x32xf32>
    %385 = math.tanh %384 : vector<8x32xf32>
    %386 = arith.mulf %382, %330 : vector<8x32xf32>
    %387 = arith.mulf %381, %385 : vector<8x32xf32>
    %388 = arith.addf %386, %387 : vector<8x32xf32>
    %389 = math.tanh %388 : vector<8x32xf32>
    %390 = arith.mulf %383, %389 : vector<8x32xf32>
    %cst_153 = arith.constant 0.000000e+00 : f32
    %391 = vector.broadcast %cst_153 : f32 to vector<8x128xf32>
    %392 = arith.subf %391, %373 : vector<8x128xf32>
    %393 = math.exp %392 : vector<8x128xf32>
    %cst_154 = arith.constant 1.000000e+00 : f32
    %394 = vector.broadcast %cst_154 : f32 to vector<8x128xf32>
    %395 = arith.addf %394, %393 : vector<8x128xf32>
    %cst_155 = arith.constant 1.000000e+00 : f32
    %396 = vector.broadcast %cst_155 : f32 to vector<8x128xf32>
    %397 = arith.divf %396, %395 : vector<8x128xf32>
    %398 = vector.extract_strided_slice %397 {offsets = [0, 0], sizes = [8, 32], strides = [1, 1]} : vector<8x128xf32> to vector<8x32xf32>
    %399 = vector.extract_strided_slice %397 {offsets = [0, 32], sizes = [8, 32], strides = [1, 1]} : vector<8x128xf32> to vector<8x32xf32>
    %400 = vector.extract_strided_slice %397 {offsets = [0, 96], sizes = [8, 32], strides = [1, 1]} : vector<8x128xf32> to vector<8x32xf32>
    %401 = vector.extract_strided_slice %373 {offsets = [0, 64], sizes = [8, 32], strides = [1, 1]} : vector<8x128xf32> to vector<8x32xf32>
    %402 = math.tanh %401 : vector<8x32xf32>
    %403 = arith.mulf %399, %347 : vector<8x32xf32>
    %404 = arith.mulf %398, %402 : vector<8x32xf32>
    %405 = arith.addf %403, %404 : vector<8x32xf32>
    %406 = math.tanh %405 : vector<8x32xf32>
    %407 = arith.mulf %400, %406 : vector<8x32xf32>
    %408 = arith.index_cast %c6_i32 : i32 to index
    %c0_156 = arith.constant 0 : index
    %c0_157 = arith.constant 0 : index
    %409 = vector.load %arg5[%408, %c0_156, %c0_157] : memref<8x8x64xf32, #tpu.memory_space<vmem>>, vector<1x8x32xf32>
    %410 = vector.shape_cast %409 : vector<1x8x32xf32> to vector<8x32xf32>
    %411 = vector.shape_cast %390 : vector<8x32xf32> to vector<1x8x32xf32>
    tpu.vector_store %arg5[%408, %c0_156, %c0_157], %411 {strides = array<i32>} : memref<8x8x64xf32, #tpu.memory_space<vmem>>, vector<1x8x32xf32>,
    %c7_i32_158 = arith.constant 7 : i32
    %412 = arith.subi %c7_i32_158, %c6_i32 : i32
    %413 = arith.index_cast %412 : i32 to index
    %c0_159 = arith.constant 0 : index
    %c32_160 = arith.constant 32 : index
    %414 = vector.load %arg5[%413, %c0_159, %c32_160] : memref<8x8x64xf32, #tpu.memory_space<vmem>>, vector<1x8x32xf32>
    %415 = vector.shape_cast %414 : vector<1x8x32xf32> to vector<8x32xf32>
    %416 = vector.shape_cast %407 : vector<8x32xf32> to vector<1x8x32xf32>
    tpu.vector_store %arg5[%413, %c0_159, %c32_160], %416 {strides = array<i32>} : memref<8x8x64xf32, #tpu.memory_space<vmem>>, vector<1x8x32xf32>,
    %c7_i32_161 = arith.constant 7 : i32
    %417 = arith.index_cast %c7_i32_161 : i32 to index
    %c0_162 = arith.constant 0 : index
    %c0_163 = arith.constant 0 : index
    %418 = vector.load %arg6[%417, %c0_162, %c0_163] : memref<8x8x256xf32, #tpu.memory_space<vmem>>, vector<1x8x128xf32>
    %419 = vector.shape_cast %418 : vector<1x8x128xf32> to vector<8x128xf32>
    %c7_i32_164 = arith.constant 7 : i32
    %420 = arith.subi %c7_i32_164, %c7_i32_161 : i32
    %421 = arith.index_cast %420 : i32 to index
    %c0_165 = arith.constant 0 : index
    %c128_166 = arith.constant 128 : index
    %422 = vector.load %arg6[%421, %c0_165, %c128_166] : memref<8x8x256xf32, #tpu.memory_space<vmem>>, vector<1x8x128xf32>
    %423 = vector.shape_cast %422 : vector<1x8x128xf32> to vector<8x128xf32>
    %424 = arith.truncf %390 : vector<8x32xf32> to vector<8x32xbf16>
    %c0_167 = arith.constant 0 : index
    %c0_168 = arith.constant 0 : index
    %425 = vector.load %arg2[%c0_167, %c0_168] : memref<32x128xbf16, #tpu.memory_space<vmem>>, vector<32x128xbf16>
    %cst_169 = arith.constant dense<0.000000e+00> : vector<8x128xf32>
    %426 = tpu.matmul %424, %425, %cst_169 {dimension_numbers = #tpu.dot_dimension_numbers<[1], [0], [0], [1], [0, 0, 1, 1], [], []>} : vector<8x32xbf16>, vector<32x128xbf16>, vector<8x128xf32> -> vector<8x128xf32>
    %427 = arith.addf %419, %426 : vector<8x128xf32>
    %428 = arith.truncf %407 : vector<8x32xf32> to vector<8x32xbf16>
    %c0_170 = arith.constant 0 : index
    %c0_171 = arith.constant 0 : index
    %429 = vector.load %arg3[%c0_170, %c0_171] : memref<32x128xbf16, #tpu.memory_space<vmem>>, vector<32x128xbf16>
    %cst_172 = arith.constant dense<0.000000e+00> : vector<8x128xf32>
    %430 = tpu.matmul %428, %429, %cst_172 {dimension_numbers = #tpu.dot_dimension_numbers<[1], [0], [0], [1], [0, 0, 1, 1], [], []>} : vector<8x32xbf16>, vector<32x128xbf16>, vector<8x128xf32> -> vector<8x128xf32>
    %431 = arith.addf %423, %430 : vector<8x128xf32>
    %cst_173 = arith.constant 0.000000e+00 : f32
    %432 = vector.broadcast %cst_173 : f32 to vector<8x128xf32>
    %433 = arith.subf %432, %427 : vector<8x128xf32>
    %434 = math.exp %433 : vector<8x128xf32>
    %cst_174 = arith.constant 1.000000e+00 : f32
    %435 = vector.broadcast %cst_174 : f32 to vector<8x128xf32>
    %436 = arith.addf %435, %434 : vector<8x128xf32>
    %cst_175 = arith.constant 1.000000e+00 : f32
    %437 = vector.broadcast %cst_175 : f32 to vector<8x128xf32>
    %438 = arith.divf %437, %436 : vector<8x128xf32>
    %439 = vector.extract_strided_slice %438 {offsets = [0, 0], sizes = [8, 32], strides = [1, 1]} : vector<8x128xf32> to vector<8x32xf32>
    %440 = vector.extract_strided_slice %438 {offsets = [0, 32], sizes = [8, 32], strides = [1, 1]} : vector<8x128xf32> to vector<8x32xf32>
    %441 = vector.extract_strided_slice %438 {offsets = [0, 96], sizes = [8, 32], strides = [1, 1]} : vector<8x128xf32> to vector<8x32xf32>
    %442 = vector.extract_strided_slice %427 {offsets = [0, 64], sizes = [8, 32], strides = [1, 1]} : vector<8x128xf32> to vector<8x32xf32>
    %443 = math.tanh %442 : vector<8x32xf32>
    %444 = arith.mulf %440, %388 : vector<8x32xf32>
    %445 = arith.mulf %439, %443 : vector<8x32xf32>
    %446 = arith.addf %444, %445 : vector<8x32xf32>
    %447 = math.tanh %446 : vector<8x32xf32>
    %448 = arith.mulf %441, %447 : vector<8x32xf32>
    %cst_176 = arith.constant 0.000000e+00 : f32
    %449 = vector.broadcast %cst_176 : f32 to vector<8x128xf32>
    %450 = arith.subf %449, %431 : vector<8x128xf32>
    %451 = math.exp %450 : vector<8x128xf32>
    %cst_177 = arith.constant 1.000000e+00 : f32
    %452 = vector.broadcast %cst_177 : f32 to vector<8x128xf32>
    %453 = arith.addf %452, %451 : vector<8x128xf32>
    %cst_178 = arith.constant 1.000000e+00 : f32
    %454 = vector.broadcast %cst_178 : f32 to vector<8x128xf32>
    %455 = arith.divf %454, %453 : vector<8x128xf32>
    %456 = vector.extract_strided_slice %455 {offsets = [0, 0], sizes = [8, 32], strides = [1, 1]} : vector<8x128xf32> to vector<8x32xf32>
    %457 = vector.extract_strided_slice %455 {offsets = [0, 32], sizes = [8, 32], strides = [1, 1]} : vector<8x128xf32> to vector<8x32xf32>
    %458 = vector.extract_strided_slice %455 {offsets = [0, 96], sizes = [8, 32], strides = [1, 1]} : vector<8x128xf32> to vector<8x32xf32>
    %459 = vector.extract_strided_slice %431 {offsets = [0, 64], sizes = [8, 32], strides = [1, 1]} : vector<8x128xf32> to vector<8x32xf32>
    %460 = math.tanh %459 : vector<8x32xf32>
    %461 = arith.mulf %457, %405 : vector<8x32xf32>
    %462 = arith.mulf %456, %460 : vector<8x32xf32>
    %463 = arith.addf %461, %462 : vector<8x32xf32>
    %464 = math.tanh %463 : vector<8x32xf32>
    %465 = arith.mulf %458, %464 : vector<8x32xf32>
    %466 = arith.index_cast %c7_i32_161 : i32 to index
    %c0_179 = arith.constant 0 : index
    %c0_180 = arith.constant 0 : index
    %467 = vector.load %arg5[%466, %c0_179, %c0_180] : memref<8x8x64xf32, #tpu.memory_space<vmem>>, vector<1x8x32xf32>
    %468 = vector.shape_cast %467 : vector<1x8x32xf32> to vector<8x32xf32>
    %469 = vector.shape_cast %448 : vector<8x32xf32> to vector<1x8x32xf32>
    tpu.vector_store %arg5[%466, %c0_179, %c0_180], %469 {strides = array<i32>} : memref<8x8x64xf32, #tpu.memory_space<vmem>>, vector<1x8x32xf32>,
    %c7_i32_181 = arith.constant 7 : i32
    %470 = arith.subi %c7_i32_181, %c7_i32_161 : i32
    %471 = arith.index_cast %470 : i32 to index
    %c0_182 = arith.constant 0 : index
    %c32_183 = arith.constant 32 : index
    %472 = vector.load %arg5[%471, %c0_182, %c32_183] : memref<8x8x64xf32, #tpu.memory_space<vmem>>, vector<1x8x32xf32>
    %473 = vector.shape_cast %472 : vector<1x8x32xf32> to vector<8x32xf32>
    %474 = vector.shape_cast %465 : vector<8x32xf32> to vector<1x8x32xf32>
    tpu.vector_store %arg5[%471, %c0_182, %c32_183], %474 {strides = array<i32>} : memref<8x8x64xf32, #tpu.memory_space<vmem>>, vector<1x8x32xf32>,
    %c8_i32 = arith.constant 8 : i32
    return
  }
}

module attributes {stable_mosaic.version = 11 : i64} {
  func.func @_bilstm_layer_kernel(%arg0: memref<8x8x64xf32, #tpu.memory_space<vmem>>, %arg1: memref<64x256xbf16, #tpu.memory_space<vmem>>, %arg2: memref<32x128xbf16, #tpu.memory_space<vmem>>, %arg3: memref<32x128xbf16, #tpu.memory_space<vmem>>, %arg4: memref<1x256xf32, #tpu.memory_space<vmem>>, %arg5: memref<8x8x64xf32, #tpu.memory_space<vmem>>, %arg6: memref<8x8x256xf32, #tpu.memory_space<vmem>>) attributes {dimension_semantics = [], scalar_prefetch = 0 : i64, scratch_operands = 1 : i64, tpu.core_type = #tpu.core_type<tc>} {
    %c0 = arith.constant 0 : index
    %c0_0 = arith.constant 0 : index
    %c0_1 = arith.constant 0 : index
    %0 = vector.load %arg0[%c0, %c0_0, %c0_1] : memref<8x8x64xf32, #tpu.memory_space<vmem>>, vector<8x8x64xf32>
    %1 = vector.shape_cast %0 : vector<8x8x64xf32> to vector<64x64xf32>
    %2 = arith.truncf %1 : vector<64x64xf32> to vector<64x64xbf16>
    %c0_2 = arith.constant 0 : index
    %c0_3 = arith.constant 0 : index
    %3 = vector.load %arg1[%c0_2, %c0_3] : memref<64x256xbf16, #tpu.memory_space<vmem>>, vector<64x256xbf16>
    %cst = arith.constant dense<0.000000e+00> : vector<64x256xf32>
    %4 = tpu.matmul %2, %3, %cst {dimension_numbers = #tpu.dot_dimension_numbers<[1], [0], [0], [1], [0, 0, 1, 1], [], []>} : vector<64x64xbf16>, vector<64x256xbf16>, vector<64x256xf32> -> vector<64x256xf32>
    %c0_4 = arith.constant 0 : index
    %c0_5 = arith.constant 0 : index
    %5 = vector.load %arg4[%c0_4, %c0_5] : memref<1x256xf32, #tpu.memory_space<vmem>>, vector<1x256xf32>
    %6 = vector.broadcast %5 : vector<1x256xf32> to vector<64x256xf32>
    %7 = arith.addf %4, %6 : vector<64x256xf32>
    %8 = vector.shape_cast %7 : vector<64x256xf32> to vector<8x8x256xf32>
    %c0_6 = arith.constant 0 : index
    %c0_7 = arith.constant 0 : index
    %c0_8 = arith.constant 0 : index
    %9 = vector.load %arg6[%c0_6, %c0_7, %c0_8] : memref<8x8x256xf32, #tpu.memory_space<vmem>>, vector<8x8x256xf32>
    tpu.vector_store %arg6[%c0_6, %c0_7, %c0_8], %8 {strides = array<i32>} : memref<8x8x256xf32, #tpu.memory_space<vmem>>, vector<8x8x256xf32>,
    %cst_9 = arith.constant 0.000000e+00 : f32
    %10 = vector.broadcast %cst_9 : f32 to vector<8x32xf32>
    %c0_i32 = arith.constant 0 : i32
    %11 = arith.index_cast %c0_i32 : i32 to index
    %c0_10 = arith.constant 0 : index
    %c0_11 = arith.constant 0 : index
    %12 = vector.load %arg6[%11, %c0_10, %c0_11] : memref<8x8x256xf32, #tpu.memory_space<vmem>>, vector<1x8x128xf32>
    %13 = vector.shape_cast %12 : vector<1x8x128xf32> to vector<8x128xf32>
    %c7_i32 = arith.constant 7 : i32
    %14 = arith.subi %c7_i32, %c0_i32 : i32
    %15 = arith.index_cast %14 : i32 to index
    %c0_12 = arith.constant 0 : index
    %c128 = arith.constant 128 : index
    %16 = vector.load %arg6[%15, %c0_12, %c128] : memref<8x8x256xf32, #tpu.memory_space<vmem>>, vector<1x8x128xf32>
    %17 = vector.shape_cast %16 : vector<1x8x128xf32> to vector<8x128xf32>
    %18 = arith.truncf %10 : vector<8x32xf32> to vector<8x32xbf16>
    %c0_13 = arith.constant 0 : index
    %c0_14 = arith.constant 0 : index
    %19 = vector.load %arg2[%c0_13, %c0_14] : memref<32x128xbf16, #tpu.memory_space<vmem>>, vector<32x128xbf16>
    %cst_15 = arith.constant dense<0.000000e+00> : vector<8x128xf32>
    %20 = tpu.matmul %18, %19, %cst_15 {dimension_numbers = #tpu.dot_dimension_numbers<[1], [0], [0], [1], [0, 0, 1, 1], [], []>} : vector<8x32xbf16>, vector<32x128xbf16>, vector<8x128xf32> -> vector<8x128xf32>
    %21 = arith.addf %13, %20 : vector<8x128xf32>
    %22 = arith.truncf %10 : vector<8x32xf32> to vector<8x32xbf16>
    %c0_16 = arith.constant 0 : index
    %c0_17 = arith.constant 0 : index
    %23 = vector.load %arg3[%c0_16, %c0_17] : memref<32x128xbf16, #tpu.memory_space<vmem>>, vector<32x128xbf16>
    %cst_18 = arith.constant dense<0.000000e+00> : vector<8x128xf32>
    %24 = tpu.matmul %22, %23, %cst_18 {dimension_numbers = #tpu.dot_dimension_numbers<[1], [0], [0], [1], [0, 0, 1, 1], [], []>} : vector<8x32xbf16>, vector<32x128xbf16>, vector<8x128xf32> -> vector<8x128xf32>
    %25 = arith.addf %17, %24 : vector<8x128xf32>
    %cst_19 = arith.constant 0.000000e+00 : f32
    %26 = vector.broadcast %cst_19 : f32 to vector<8x128xf32>
    %27 = arith.subf %26, %21 : vector<8x128xf32>
    %28 = math.exp %27 : vector<8x128xf32>
    %cst_20 = arith.constant 1.000000e+00 : f32
    %29 = vector.broadcast %cst_20 : f32 to vector<8x128xf32>
    %30 = arith.addf %29, %28 : vector<8x128xf32>
    %cst_21 = arith.constant 1.000000e+00 : f32
    %31 = vector.broadcast %cst_21 : f32 to vector<8x128xf32>
    %32 = arith.divf %31, %30 : vector<8x128xf32>
    %33 = vector.extract_strided_slice %32 {offsets = [0, 0], sizes = [8, 32], strides = [1, 1]} : vector<8x128xf32> to vector<8x32xf32>
    %34 = vector.extract_strided_slice %32 {offsets = [0, 32], sizes = [8, 32], strides = [1, 1]} : vector<8x128xf32> to vector<8x32xf32>
    %35 = vector.extract_strided_slice %32 {offsets = [0, 96], sizes = [8, 32], strides = [1, 1]} : vector<8x128xf32> to vector<8x32xf32>
    %36 = vector.extract_strided_slice %21 {offsets = [0, 64], sizes = [8, 32], strides = [1, 1]} : vector<8x128xf32> to vector<8x32xf32>
    %37 = math.tanh %36 : vector<8x32xf32>
    %38 = arith.mulf %34, %10 : vector<8x32xf32>
    %39 = arith.mulf %33, %37 : vector<8x32xf32>
    %40 = arith.addf %38, %39 : vector<8x32xf32>
    %41 = math.tanh %40 : vector<8x32xf32>
    %42 = arith.mulf %35, %41 : vector<8x32xf32>
    %cst_22 = arith.constant 0.000000e+00 : f32
    %43 = vector.broadcast %cst_22 : f32 to vector<8x128xf32>
    %44 = arith.subf %43, %25 : vector<8x128xf32>
    %45 = math.exp %44 : vector<8x128xf32>
    %cst_23 = arith.constant 1.000000e+00 : f32
    %46 = vector.broadcast %cst_23 : f32 to vector<8x128xf32>
    %47 = arith.addf %46, %45 : vector<8x128xf32>
    %cst_24 = arith.constant 1.000000e+00 : f32
    %48 = vector.broadcast %cst_24 : f32 to vector<8x128xf32>
    %49 = arith.divf %48, %47 : vector<8x128xf32>
    %50 = vector.extract_strided_slice %49 {offsets = [0, 0], sizes = [8, 32], strides = [1, 1]} : vector<8x128xf32> to vector<8x32xf32>
    %51 = vector.extract_strided_slice %49 {offsets = [0, 32], sizes = [8, 32], strides = [1, 1]} : vector<8x128xf32> to vector<8x32xf32>
    %52 = vector.extract_strided_slice %49 {offsets = [0, 96], sizes = [8, 32], strides = [1, 1]} : vector<8x128xf32> to vector<8x32xf32>
    %53 = vector.extract_strided_slice %25 {offsets = [0, 64], sizes = [8, 32], strides = [1, 1]} : vector<8x128xf32> to vector<8x32xf32>
    %54 = math.tanh %53 : vector<8x32xf32>
    %55 = arith.mulf %51, %10 : vector<8x32xf32>
    %56 = arith.mulf %50, %54 : vector<8x32xf32>
    %57 = arith.addf %55, %56 : vector<8x32xf32>
    %58 = math.tanh %57 : vector<8x32xf32>
    %59 = arith.mulf %52, %58 : vector<8x32xf32>
    %60 = arith.index_cast %c0_i32 : i32 to index
    %c0_25 = arith.constant 0 : index
    %c0_26 = arith.constant 0 : index
    %61 = vector.load %arg5[%60, %c0_25, %c0_26] : memref<8x8x64xf32, #tpu.memory_space<vmem>>, vector<1x8x32xf32>
    %62 = vector.shape_cast %61 : vector<1x8x32xf32> to vector<8x32xf32>
    %63 = vector.shape_cast %42 : vector<8x32xf32> to vector<1x8x32xf32>
    tpu.vector_store %arg5[%60, %c0_25, %c0_26], %63 {strides = array<i32>} : memref<8x8x64xf32, #tpu.memory_space<vmem>>, vector<1x8x32xf32>,
    %c7_i32_27 = arith.constant 7 : i32
    %64 = arith.subi %c7_i32_27, %c0_i32 : i32
    %65 = arith.index_cast %64 : i32 to index
    %c0_28 = arith.constant 0 : index
    %c32 = arith.constant 32 : index
    %66 = vector.load %arg5[%65, %c0_28, %c32] : memref<8x8x64xf32, #tpu.memory_space<vmem>>, vector<1x8x32xf32>
    %67 = vector.shape_cast %66 : vector<1x8x32xf32> to vector<8x32xf32>
    %68 = vector.shape_cast %59 : vector<8x32xf32> to vector<1x8x32xf32>
    tpu.vector_store %arg5[%65, %c0_28, %c32], %68 {strides = array<i32>} : memref<8x8x64xf32, #tpu.memory_space<vmem>>, vector<1x8x32xf32>,
    %c1_i32 = arith.constant 1 : i32
    %69 = arith.index_cast %c1_i32 : i32 to index
    %c0_29 = arith.constant 0 : index
    %c0_30 = arith.constant 0 : index
    %70 = vector.load %arg6[%69, %c0_29, %c0_30] : memref<8x8x256xf32, #tpu.memory_space<vmem>>, vector<1x8x128xf32>
    %71 = vector.shape_cast %70 : vector<1x8x128xf32> to vector<8x128xf32>
    %c7_i32_31 = arith.constant 7 : i32
    %72 = arith.subi %c7_i32_31, %c1_i32 : i32
    %73 = arith.index_cast %72 : i32 to index
    %c0_32 = arith.constant 0 : index
    %c128_33 = arith.constant 128 : index
    %74 = vector.load %arg6[%73, %c0_32, %c128_33] : memref<8x8x256xf32, #tpu.memory_space<vmem>>, vector<1x8x128xf32>
    %75 = vector.shape_cast %74 : vector<1x8x128xf32> to vector<8x128xf32>
    %76 = arith.truncf %42 : vector<8x32xf32> to vector<8x32xbf16>
    %c0_34 = arith.constant 0 : index
    %c0_35 = arith.constant 0 : index
    %77 = vector.load %arg2[%c0_34, %c0_35] : memref<32x128xbf16, #tpu.memory_space<vmem>>, vector<32x128xbf16>
    %cst_36 = arith.constant dense<0.000000e+00> : vector<8x128xf32>
    %78 = tpu.matmul %76, %77, %cst_36 {dimension_numbers = #tpu.dot_dimension_numbers<[1], [0], [0], [1], [0, 0, 1, 1], [], []>} : vector<8x32xbf16>, vector<32x128xbf16>, vector<8x128xf32> -> vector<8x128xf32>
    %79 = arith.addf %71, %78 : vector<8x128xf32>
    %80 = arith.truncf %59 : vector<8x32xf32> to vector<8x32xbf16>
    %c0_37 = arith.constant 0 : index
    %c0_38 = arith.constant 0 : index
    %81 = vector.load %arg3[%c0_37, %c0_38] : memref<32x128xbf16, #tpu.memory_space<vmem>>, vector<32x128xbf16>
    %cst_39 = arith.constant dense<0.000000e+00> : vector<8x128xf32>
    %82 = tpu.matmul %80, %81, %cst_39 {dimension_numbers = #tpu.dot_dimension_numbers<[1], [0], [0], [1], [0, 0, 1, 1], [], []>} : vector<8x32xbf16>, vector<32x128xbf16>, vector<8x128xf32> -> vector<8x128xf32>
    %83 = arith.addf %75, %82 : vector<8x128xf32>
    %cst_40 = arith.constant 0.000000e+00 : f32
    %84 = vector.broadcast %cst_40 : f32 to vector<8x128xf32>
    %85 = arith.subf %84, %79 : vector<8x128xf32>
    %86 = math.exp %85 : vector<8x128xf32>
    %cst_41 = arith.constant 1.000000e+00 : f32
    %87 = vector.broadcast %cst_41 : f32 to vector<8x128xf32>
    %88 = arith.addf %87, %86 : vector<8x128xf32>
    %cst_42 = arith.constant 1.000000e+00 : f32
    %89 = vector.broadcast %cst_42 : f32 to vector<8x128xf32>
    %90 = arith.divf %89, %88 : vector<8x128xf32>
    %91 = vector.extract_strided_slice %90 {offsets = [0, 0], sizes = [8, 32], strides = [1, 1]} : vector<8x128xf32> to vector<8x32xf32>
    %92 = vector.extract_strided_slice %90 {offsets = [0, 32], sizes = [8, 32], strides = [1, 1]} : vector<8x128xf32> to vector<8x32xf32>
    %93 = vector.extract_strided_slice %90 {offsets = [0, 96], sizes = [8, 32], strides = [1, 1]} : vector<8x128xf32> to vector<8x32xf32>
    %94 = vector.extract_strided_slice %79 {offsets = [0, 64], sizes = [8, 32], strides = [1, 1]} : vector<8x128xf32> to vector<8x32xf32>
    %95 = math.tanh %94 : vector<8x32xf32>
    %96 = arith.mulf %92, %40 : vector<8x32xf32>
    %97 = arith.mulf %91, %95 : vector<8x32xf32>
    %98 = arith.addf %96, %97 : vector<8x32xf32>
    %99 = math.tanh %98 : vector<8x32xf32>
    %100 = arith.mulf %93, %99 : vector<8x32xf32>
    %cst_43 = arith.constant 0.000000e+00 : f32
    %101 = vector.broadcast %cst_43 : f32 to vector<8x128xf32>
    %102 = arith.subf %101, %83 : vector<8x128xf32>
    %103 = math.exp %102 : vector<8x128xf32>
    %cst_44 = arith.constant 1.000000e+00 : f32
    %104 = vector.broadcast %cst_44 : f32 to vector<8x128xf32>
    %105 = arith.addf %104, %103 : vector<8x128xf32>
    %cst_45 = arith.constant 1.000000e+00 : f32
    %106 = vector.broadcast %cst_45 : f32 to vector<8x128xf32>
    %107 = arith.divf %106, %105 : vector<8x128xf32>
    %108 = vector.extract_strided_slice %107 {offsets = [0, 0], sizes = [8, 32], strides = [1, 1]} : vector<8x128xf32> to vector<8x32xf32>
    %109 = vector.extract_strided_slice %107 {offsets = [0, 32], sizes = [8, 32], strides = [1, 1]} : vector<8x128xf32> to vector<8x32xf32>
    %110 = vector.extract_strided_slice %107 {offsets = [0, 96], sizes = [8, 32], strides = [1, 1]} : vector<8x128xf32> to vector<8x32xf32>
    %111 = vector.extract_strided_slice %83 {offsets = [0, 64], sizes = [8, 32], strides = [1, 1]} : vector<8x128xf32> to vector<8x32xf32>
    %112 = math.tanh %111 : vector<8x32xf32>
    %113 = arith.mulf %109, %57 : vector<8x32xf32>
    %114 = arith.mulf %108, %112 : vector<8x32xf32>
    %115 = arith.addf %113, %114 : vector<8x32xf32>
    %116 = math.tanh %115 : vector<8x32xf32>
    %117 = arith.mulf %110, %116 : vector<8x32xf32>
    %118 = arith.index_cast %c1_i32 : i32 to index
    %c0_46 = arith.constant 0 : index
    %c0_47 = arith.constant 0 : index
    %119 = vector.load %arg5[%118, %c0_46, %c0_47] : memref<8x8x64xf32, #tpu.memory_space<vmem>>, vector<1x8x32xf32>
    %120 = vector.shape_cast %119 : vector<1x8x32xf32> to vector<8x32xf32>
    %121 = vector.shape_cast %100 : vector<8x32xf32> to vector<1x8x32xf32>
    tpu.vector_store %arg5[%118, %c0_46, %c0_47], %121 {strides = array<i32>} : memref<8x8x64xf32, #tpu.memory_space<vmem>>, vector<1x8x32xf32>,
    %c7_i32_48 = arith.constant 7 : i32
    %122 = arith.subi %c7_i32_48, %c1_i32 : i32
    %123 = arith.index_cast %122 : i32 to index
    %c0_49 = arith.constant 0 : index
    %c32_50 = arith.constant 32 : index
    %124 = vector.load %arg5[%123, %c0_49, %c32_50] : memref<8x8x64xf32, #tpu.memory_space<vmem>>, vector<1x8x32xf32>
    %125 = vector.shape_cast %124 : vector<1x8x32xf32> to vector<8x32xf32>
    %126 = vector.shape_cast %117 : vector<8x32xf32> to vector<1x8x32xf32>
    tpu.vector_store %arg5[%123, %c0_49, %c32_50], %126 {strides = array<i32>} : memref<8x8x64xf32, #tpu.memory_space<vmem>>, vector<1x8x32xf32>,
    %c2_i32 = arith.constant 2 : i32
    %127 = arith.index_cast %c2_i32 : i32 to index
    %c0_51 = arith.constant 0 : index
    %c0_52 = arith.constant 0 : index
    %128 = vector.load %arg6[%127, %c0_51, %c0_52] : memref<8x8x256xf32, #tpu.memory_space<vmem>>, vector<1x8x128xf32>
    %129 = vector.shape_cast %128 : vector<1x8x128xf32> to vector<8x128xf32>
    %c7_i32_53 = arith.constant 7 : i32
    %130 = arith.subi %c7_i32_53, %c2_i32 : i32
    %131 = arith.index_cast %130 : i32 to index
    %c0_54 = arith.constant 0 : index
    %c128_55 = arith.constant 128 : index
    %132 = vector.load %arg6[%131, %c0_54, %c128_55] : memref<8x8x256xf32, #tpu.memory_space<vmem>>, vector<1x8x128xf32>
    %133 = vector.shape_cast %132 : vector<1x8x128xf32> to vector<8x128xf32>
    %134 = arith.truncf %100 : vector<8x32xf32> to vector<8x32xbf16>
    %c0_56 = arith.constant 0 : index
    %c0_57 = arith.constant 0 : index
    %135 = vector.load %arg2[%c0_56, %c0_57] : memref<32x128xbf16, #tpu.memory_space<vmem>>, vector<32x128xbf16>
    %cst_58 = arith.constant dense<0.000000e+00> : vector<8x128xf32>
    %136 = tpu.matmul %134, %135, %cst_58 {dimension_numbers = #tpu.dot_dimension_numbers<[1], [0], [0], [1], [0, 0, 1, 1], [], []>} : vector<8x32xbf16>, vector<32x128xbf16>, vector<8x128xf32> -> vector<8x128xf32>
    %137 = arith.addf %129, %136 : vector<8x128xf32>
    %138 = arith.truncf %117 : vector<8x32xf32> to vector<8x32xbf16>
    %c0_59 = arith.constant 0 : index
    %c0_60 = arith.constant 0 : index
    %139 = vector.load %arg3[%c0_59, %c0_60] : memref<32x128xbf16, #tpu.memory_space<vmem>>, vector<32x128xbf16>
    %cst_61 = arith.constant dense<0.000000e+00> : vector<8x128xf32>
    %140 = tpu.matmul %138, %139, %cst_61 {dimension_numbers = #tpu.dot_dimension_numbers<[1], [0], [0], [1], [0, 0, 1, 1], [], []>} : vector<8x32xbf16>, vector<32x128xbf16>, vector<8x128xf32> -> vector<8x128xf32>
    %141 = arith.addf %133, %140 : vector<8x128xf32>
    %cst_62 = arith.constant 0.000000e+00 : f32
    %142 = vector.broadcast %cst_62 : f32 to vector<8x128xf32>
    %143 = arith.subf %142, %137 : vector<8x128xf32>
    %144 = math.exp %143 : vector<8x128xf32>
    %cst_63 = arith.constant 1.000000e+00 : f32
    %145 = vector.broadcast %cst_63 : f32 to vector<8x128xf32>
    %146 = arith.addf %145, %144 : vector<8x128xf32>
    %cst_64 = arith.constant 1.000000e+00 : f32
    %147 = vector.broadcast %cst_64 : f32 to vector<8x128xf32>
    %148 = arith.divf %147, %146 : vector<8x128xf32>
    %149 = vector.extract_strided_slice %148 {offsets = [0, 0], sizes = [8, 32], strides = [1, 1]} : vector<8x128xf32> to vector<8x32xf32>
    %150 = vector.extract_strided_slice %148 {offsets = [0, 32], sizes = [8, 32], strides = [1, 1]} : vector<8x128xf32> to vector<8x32xf32>
    %151 = vector.extract_strided_slice %148 {offsets = [0, 96], sizes = [8, 32], strides = [1, 1]} : vector<8x128xf32> to vector<8x32xf32>
    %152 = vector.extract_strided_slice %137 {offsets = [0, 64], sizes = [8, 32], strides = [1, 1]} : vector<8x128xf32> to vector<8x32xf32>
    %153 = math.tanh %152 : vector<8x32xf32>
    %154 = arith.mulf %150, %98 : vector<8x32xf32>
    %155 = arith.mulf %149, %153 : vector<8x32xf32>
    %156 = arith.addf %154, %155 : vector<8x32xf32>
    %157 = math.tanh %156 : vector<8x32xf32>
    %158 = arith.mulf %151, %157 : vector<8x32xf32>
    %cst_65 = arith.constant 0.000000e+00 : f32
    %159 = vector.broadcast %cst_65 : f32 to vector<8x128xf32>
    %160 = arith.subf %159, %141 : vector<8x128xf32>
    %161 = math.exp %160 : vector<8x128xf32>
    %cst_66 = arith.constant 1.000000e+00 : f32
    %162 = vector.broadcast %cst_66 : f32 to vector<8x128xf32>
    %163 = arith.addf %162, %161 : vector<8x128xf32>
    %cst_67 = arith.constant 1.000000e+00 : f32
    %164 = vector.broadcast %cst_67 : f32 to vector<8x128xf32>
    %165 = arith.divf %164, %163 : vector<8x128xf32>
    %166 = vector.extract_strided_slice %165 {offsets = [0, 0], sizes = [8, 32], strides = [1, 1]} : vector<8x128xf32> to vector<8x32xf32>
    %167 = vector.extract_strided_slice %165 {offsets = [0, 32], sizes = [8, 32], strides = [1, 1]} : vector<8x128xf32> to vector<8x32xf32>
    %168 = vector.extract_strided_slice %165 {offsets = [0, 96], sizes = [8, 32], strides = [1, 1]} : vector<8x128xf32> to vector<8x32xf32>
    %169 = vector.extract_strided_slice %141 {offsets = [0, 64], sizes = [8, 32], strides = [1, 1]} : vector<8x128xf32> to vector<8x32xf32>
    %170 = math.tanh %169 : vector<8x32xf32>
    %171 = arith.mulf %167, %115 : vector<8x32xf32>
    %172 = arith.mulf %166, %170 : vector<8x32xf32>
    %173 = arith.addf %171, %172 : vector<8x32xf32>
    %174 = math.tanh %173 : vector<8x32xf32>
    %175 = arith.mulf %168, %174 : vector<8x32xf32>
    %176 = arith.index_cast %c2_i32 : i32 to index
    %c0_68 = arith.constant 0 : index
    %c0_69 = arith.constant 0 : index
    %177 = vector.load %arg5[%176, %c0_68, %c0_69] : memref<8x8x64xf32, #tpu.memory_space<vmem>>, vector<1x8x32xf32>
    %178 = vector.shape_cast %177 : vector<1x8x32xf32> to vector<8x32xf32>
    %179 = vector.shape_cast %158 : vector<8x32xf32> to vector<1x8x32xf32>
    tpu.vector_store %arg5[%176, %c0_68, %c0_69], %179 {strides = array<i32>} : memref<8x8x64xf32, #tpu.memory_space<vmem>>, vector<1x8x32xf32>,
    %c7_i32_70 = arith.constant 7 : i32
    %180 = arith.subi %c7_i32_70, %c2_i32 : i32
    %181 = arith.index_cast %180 : i32 to index
    %c0_71 = arith.constant 0 : index
    %c32_72 = arith.constant 32 : index
    %182 = vector.load %arg5[%181, %c0_71, %c32_72] : memref<8x8x64xf32, #tpu.memory_space<vmem>>, vector<1x8x32xf32>
    %183 = vector.shape_cast %182 : vector<1x8x32xf32> to vector<8x32xf32>
    %184 = vector.shape_cast %175 : vector<8x32xf32> to vector<1x8x32xf32>
    tpu.vector_store %arg5[%181, %c0_71, %c32_72], %184 {strides = array<i32>} : memref<8x8x64xf32, #tpu.memory_space<vmem>>, vector<1x8x32xf32>,
    %c3_i32 = arith.constant 3 : i32
    %185 = arith.index_cast %c3_i32 : i32 to index
    %c0_73 = arith.constant 0 : index
    %c0_74 = arith.constant 0 : index
    %186 = vector.load %arg6[%185, %c0_73, %c0_74] : memref<8x8x256xf32, #tpu.memory_space<vmem>>, vector<1x8x128xf32>
    %187 = vector.shape_cast %186 : vector<1x8x128xf32> to vector<8x128xf32>
    %c7_i32_75 = arith.constant 7 : i32
    %188 = arith.subi %c7_i32_75, %c3_i32 : i32
    %189 = arith.index_cast %188 : i32 to index
    %c0_76 = arith.constant 0 : index
    %c128_77 = arith.constant 128 : index
    %190 = vector.load %arg6[%189, %c0_76, %c128_77] : memref<8x8x256xf32, #tpu.memory_space<vmem>>, vector<1x8x128xf32>
    %191 = vector.shape_cast %190 : vector<1x8x128xf32> to vector<8x128xf32>
    %192 = arith.truncf %158 : vector<8x32xf32> to vector<8x32xbf16>
    %c0_78 = arith.constant 0 : index
    %c0_79 = arith.constant 0 : index
    %193 = vector.load %arg2[%c0_78, %c0_79] : memref<32x128xbf16, #tpu.memory_space<vmem>>, vector<32x128xbf16>
    %cst_80 = arith.constant dense<0.000000e+00> : vector<8x128xf32>
    %194 = tpu.matmul %192, %193, %cst_80 {dimension_numbers = #tpu.dot_dimension_numbers<[1], [0], [0], [1], [0, 0, 1, 1], [], []>} : vector<8x32xbf16>, vector<32x128xbf16>, vector<8x128xf32> -> vector<8x128xf32>
    %195 = arith.addf %187, %194 : vector<8x128xf32>
    %196 = arith.truncf %175 : vector<8x32xf32> to vector<8x32xbf16>
    %c0_81 = arith.constant 0 : index
    %c0_82 = arith.constant 0 : index
    %197 = vector.load %arg3[%c0_81, %c0_82] : memref<32x128xbf16, #tpu.memory_space<vmem>>, vector<32x128xbf16>
    %cst_83 = arith.constant dense<0.000000e+00> : vector<8x128xf32>
    %198 = tpu.matmul %196, %197, %cst_83 {dimension_numbers = #tpu.dot_dimension_numbers<[1], [0], [0], [1], [0, 0, 1, 1], [], []>} : vector<8x32xbf16>, vector<32x128xbf16>, vector<8x128xf32> -> vector<8x128xf32>
    %199 = arith.addf %191, %198 : vector<8x128xf32>
    %cst_84 = arith.constant 0.000000e+00 : f32
    %200 = vector.broadcast %cst_84 : f32 to vector<8x128xf32>
    %201 = arith.subf %200, %195 : vector<8x128xf32>
    %202 = math.exp %201 : vector<8x128xf32>
    %cst_85 = arith.constant 1.000000e+00 : f32
    %203 = vector.broadcast %cst_85 : f32 to vector<8x128xf32>
    %204 = arith.addf %203, %202 : vector<8x128xf32>
    %cst_86 = arith.constant 1.000000e+00 : f32
    %205 = vector.broadcast %cst_86 : f32 to vector<8x128xf32>
    %206 = arith.divf %205, %204 : vector<8x128xf32>
    %207 = vector.extract_strided_slice %206 {offsets = [0, 0], sizes = [8, 32], strides = [1, 1]} : vector<8x128xf32> to vector<8x32xf32>
    %208 = vector.extract_strided_slice %206 {offsets = [0, 32], sizes = [8, 32], strides = [1, 1]} : vector<8x128xf32> to vector<8x32xf32>
    %209 = vector.extract_strided_slice %206 {offsets = [0, 96], sizes = [8, 32], strides = [1, 1]} : vector<8x128xf32> to vector<8x32xf32>
    %210 = vector.extract_strided_slice %195 {offsets = [0, 64], sizes = [8, 32], strides = [1, 1]} : vector<8x128xf32> to vector<8x32xf32>
    %211 = math.tanh %210 : vector<8x32xf32>
    %212 = arith.mulf %208, %156 : vector<8x32xf32>
    %213 = arith.mulf %207, %211 : vector<8x32xf32>
    %214 = arith.addf %212, %213 : vector<8x32xf32>
    %215 = math.tanh %214 : vector<8x32xf32>
    %216 = arith.mulf %209, %215 : vector<8x32xf32>
    %cst_87 = arith.constant 0.000000e+00 : f32
    %217 = vector.broadcast %cst_87 : f32 to vector<8x128xf32>
    %218 = arith.subf %217, %199 : vector<8x128xf32>
    %219 = math.exp %218 : vector<8x128xf32>
    %cst_88 = arith.constant 1.000000e+00 : f32
    %220 = vector.broadcast %cst_88 : f32 to vector<8x128xf32>
    %221 = arith.addf %220, %219 : vector<8x128xf32>
    %cst_89 = arith.constant 1.000000e+00 : f32
    %222 = vector.broadcast %cst_89 : f32 to vector<8x128xf32>
    %223 = arith.divf %222, %221 : vector<8x128xf32>
    %224 = vector.extract_strided_slice %223 {offsets = [0, 0], sizes = [8, 32], strides = [1, 1]} : vector<8x128xf32> to vector<8x32xf32>
    %225 = vector.extract_strided_slice %223 {offsets = [0, 32], sizes = [8, 32], strides = [1, 1]} : vector<8x128xf32> to vector<8x32xf32>
    %226 = vector.extract_strided_slice %223 {offsets = [0, 96], sizes = [8, 32], strides = [1, 1]} : vector<8x128xf32> to vector<8x32xf32>
    %227 = vector.extract_strided_slice %199 {offsets = [0, 64], sizes = [8, 32], strides = [1, 1]} : vector<8x128xf32> to vector<8x32xf32>
    %228 = math.tanh %227 : vector<8x32xf32>
    %229 = arith.mulf %225, %173 : vector<8x32xf32>
    %230 = arith.mulf %224, %228 : vector<8x32xf32>
    %231 = arith.addf %229, %230 : vector<8x32xf32>
    %232 = math.tanh %231 : vector<8x32xf32>
    %233 = arith.mulf %226, %232 : vector<8x32xf32>
    %234 = arith.index_cast %c3_i32 : i32 to index
    %c0_90 = arith.constant 0 : index
    %c0_91 = arith.constant 0 : index
    %235 = vector.load %arg5[%234, %c0_90, %c0_91] : memref<8x8x64xf32, #tpu.memory_space<vmem>>, vector<1x8x32xf32>
    %236 = vector.shape_cast %235 : vector<1x8x32xf32> to vector<8x32xf32>
    %237 = vector.shape_cast %216 : vector<8x32xf32> to vector<1x8x32xf32>
    tpu.vector_store %arg5[%234, %c0_90, %c0_91], %237 {strides = array<i32>} : memref<8x8x64xf32, #tpu.memory_space<vmem>>, vector<1x8x32xf32>,
    %c7_i32_92 = arith.constant 7 : i32
    %238 = arith.subi %c7_i32_92, %c3_i32 : i32
    %239 = arith.index_cast %238 : i32 to index
    %c0_93 = arith.constant 0 : index
    %c32_94 = arith.constant 32 : index
    %240 = vector.load %arg5[%239, %c0_93, %c32_94] : memref<8x8x64xf32, #tpu.memory_space<vmem>>, vector<1x8x32xf32>
    %241 = vector.shape_cast %240 : vector<1x8x32xf32> to vector<8x32xf32>
    %242 = vector.shape_cast %233 : vector<8x32xf32> to vector<1x8x32xf32>
    tpu.vector_store %arg5[%239, %c0_93, %c32_94], %242 {strides = array<i32>} : memref<8x8x64xf32, #tpu.memory_space<vmem>>, vector<1x8x32xf32>,
    %c4_i32 = arith.constant 4 : i32
    %243 = arith.index_cast %c4_i32 : i32 to index
    %c0_95 = arith.constant 0 : index
    %c0_96 = arith.constant 0 : index
    %244 = vector.load %arg6[%243, %c0_95, %c0_96] : memref<8x8x256xf32, #tpu.memory_space<vmem>>, vector<1x8x128xf32>
    %245 = vector.shape_cast %244 : vector<1x8x128xf32> to vector<8x128xf32>
    %c7_i32_97 = arith.constant 7 : i32
    %246 = arith.subi %c7_i32_97, %c4_i32 : i32
    %247 = arith.index_cast %246 : i32 to index
    %c0_98 = arith.constant 0 : index
    %c128_99 = arith.constant 128 : index
    %248 = vector.load %arg6[%247, %c0_98, %c128_99] : memref<8x8x256xf32, #tpu.memory_space<vmem>>, vector<1x8x128xf32>
    %249 = vector.shape_cast %248 : vector<1x8x128xf32> to vector<8x128xf32>
    %250 = arith.truncf %216 : vector<8x32xf32> to vector<8x32xbf16>
    %c0_100 = arith.constant 0 : index
    %c0_101 = arith.constant 0 : index
    %251 = vector.load %arg2[%c0_100, %c0_101] : memref<32x128xbf16, #tpu.memory_space<vmem>>, vector<32x128xbf16>
    %cst_102 = arith.constant dense<0.000000e+00> : vector<8x128xf32>
    %252 = tpu.matmul %250, %251, %cst_102 {dimension_numbers = #tpu.dot_dimension_numbers<[1], [0], [0], [1], [0, 0, 1, 1], [], []>} : vector<8x32xbf16>, vector<32x128xbf16>, vector<8x128xf32> -> vector<8x128xf32>
    %253 = arith.addf %245, %252 : vector<8x128xf32>
    %254 = arith.truncf %233 : vector<8x32xf32> to vector<8x32xbf16>
    %c0_103 = arith.constant 0 : index
    %c0_104 = arith.constant 0 : index
    %255 = vector.load %arg3[%c0_103, %c0_104] : memref<32x128xbf16, #tpu.memory_space<vmem>>, vector<32x128xbf16>
    %cst_105 = arith.constant dense<0.000000e+00> : vector<8x128xf32>
    %256 = tpu.matmul %254, %255, %cst_105 {dimension_numbers = #tpu.dot_dimension_numbers<[1], [0], [0], [1], [0, 0, 1, 1], [], []>} : vector<8x32xbf16>, vector<32x128xbf16>, vector<8x128xf32> -> vector<8x128xf32>
    %257 = arith.addf %249, %256 : vector<8x128xf32>
    %cst_106 = arith.constant 0.000000e+00 : f32
    %258 = vector.broadcast %cst_106 : f32 to vector<8x128xf32>
    %259 = arith.subf %258, %253 : vector<8x128xf32>
    %260 = math.exp %259 : vector<8x128xf32>
    %cst_107 = arith.constant 1.000000e+00 : f32
    %261 = vector.broadcast %cst_107 : f32 to vector<8x128xf32>
    %262 = arith.addf %261, %260 : vector<8x128xf32>
    %cst_108 = arith.constant 1.000000e+00 : f32
    %263 = vector.broadcast %cst_108 : f32 to vector<8x128xf32>
    %264 = arith.divf %263, %262 : vector<8x128xf32>
    %265 = vector.extract_strided_slice %264 {offsets = [0, 0], sizes = [8, 32], strides = [1, 1]} : vector<8x128xf32> to vector<8x32xf32>
    %266 = vector.extract_strided_slice %264 {offsets = [0, 32], sizes = [8, 32], strides = [1, 1]} : vector<8x128xf32> to vector<8x32xf32>
    %267 = vector.extract_strided_slice %264 {offsets = [0, 96], sizes = [8, 32], strides = [1, 1]} : vector<8x128xf32> to vector<8x32xf32>
    %268 = vector.extract_strided_slice %253 {offsets = [0, 64], sizes = [8, 32], strides = [1, 1]} : vector<8x128xf32> to vector<8x32xf32>
    %269 = math.tanh %268 : vector<8x32xf32>
    %270 = arith.mulf %266, %214 : vector<8x32xf32>
    %271 = arith.mulf %265, %269 : vector<8x32xf32>
    %272 = arith.addf %270, %271 : vector<8x32xf32>
    %273 = math.tanh %272 : vector<8x32xf32>
    %274 = arith.mulf %267, %273 : vector<8x32xf32>
    %cst_109 = arith.constant 0.000000e+00 : f32
    %275 = vector.broadcast %cst_109 : f32 to vector<8x128xf32>
    %276 = arith.subf %275, %257 : vector<8x128xf32>
    %277 = math.exp %276 : vector<8x128xf32>
    %cst_110 = arith.constant 1.000000e+00 : f32
    %278 = vector.broadcast %cst_110 : f32 to vector<8x128xf32>
    %279 = arith.addf %278, %277 : vector<8x128xf32>
    %cst_111 = arith.constant 1.000000e+00 : f32
    %280 = vector.broadcast %cst_111 : f32 to vector<8x128xf32>
    %281 = arith.divf %280, %279 : vector<8x128xf32>
    %282 = vector.extract_strided_slice %281 {offsets = [0, 0], sizes = [8, 32], strides = [1, 1]} : vector<8x128xf32> to vector<8x32xf32>
    %283 = vector.extract_strided_slice %281 {offsets = [0, 32], sizes = [8, 32], strides = [1, 1]} : vector<8x128xf32> to vector<8x32xf32>
    %284 = vector.extract_strided_slice %281 {offsets = [0, 96], sizes = [8, 32], strides = [1, 1]} : vector<8x128xf32> to vector<8x32xf32>
    %285 = vector.extract_strided_slice %257 {offsets = [0, 64], sizes = [8, 32], strides = [1, 1]} : vector<8x128xf32> to vector<8x32xf32>
    %286 = math.tanh %285 : vector<8x32xf32>
    %287 = arith.mulf %283, %231 : vector<8x32xf32>
    %288 = arith.mulf %282, %286 : vector<8x32xf32>
    %289 = arith.addf %287, %288 : vector<8x32xf32>
    %290 = math.tanh %289 : vector<8x32xf32>
    %291 = arith.mulf %284, %290 : vector<8x32xf32>
    %292 = arith.index_cast %c4_i32 : i32 to index
    %c0_112 = arith.constant 0 : index
    %c0_113 = arith.constant 0 : index
    %293 = vector.load %arg5[%292, %c0_112, %c0_113] : memref<8x8x64xf32, #tpu.memory_space<vmem>>, vector<1x8x32xf32>
    %294 = vector.shape_cast %293 : vector<1x8x32xf32> to vector<8x32xf32>
    %295 = vector.shape_cast %274 : vector<8x32xf32> to vector<1x8x32xf32>
    tpu.vector_store %arg5[%292, %c0_112, %c0_113], %295 {strides = array<i32>} : memref<8x8x64xf32, #tpu.memory_space<vmem>>, vector<1x8x32xf32>,
    %c7_i32_114 = arith.constant 7 : i32
    %296 = arith.subi %c7_i32_114, %c4_i32 : i32
    %297 = arith.index_cast %296 : i32 to index
    %c0_115 = arith.constant 0 : index
    %c32_116 = arith.constant 32 : index
    %298 = vector.load %arg5[%297, %c0_115, %c32_116] : memref<8x8x64xf32, #tpu.memory_space<vmem>>, vector<1x8x32xf32>
    %299 = vector.shape_cast %298 : vector<1x8x32xf32> to vector<8x32xf32>
    %300 = vector.shape_cast %291 : vector<8x32xf32> to vector<1x8x32xf32>
    tpu.vector_store %arg5[%297, %c0_115, %c32_116], %300 {strides = array<i32>} : memref<8x8x64xf32, #tpu.memory_space<vmem>>, vector<1x8x32xf32>,
    %c5_i32 = arith.constant 5 : i32
    %301 = arith.index_cast %c5_i32 : i32 to index
    %c0_117 = arith.constant 0 : index
    %c0_118 = arith.constant 0 : index
    %302 = vector.load %arg6[%301, %c0_117, %c0_118] : memref<8x8x256xf32, #tpu.memory_space<vmem>>, vector<1x8x128xf32>
    %303 = vector.shape_cast %302 : vector<1x8x128xf32> to vector<8x128xf32>
    %c7_i32_119 = arith.constant 7 : i32
    %304 = arith.subi %c7_i32_119, %c5_i32 : i32
    %305 = arith.index_cast %304 : i32 to index
    %c0_120 = arith.constant 0 : index
    %c128_121 = arith.constant 128 : index
    %306 = vector.load %arg6[%305, %c0_120, %c128_121] : memref<8x8x256xf32, #tpu.memory_space<vmem>>, vector<1x8x128xf32>
    %307 = vector.shape_cast %306 : vector<1x8x128xf32> to vector<8x128xf32>
    %308 = arith.truncf %274 : vector<8x32xf32> to vector<8x32xbf16>
    %c0_122 = arith.constant 0 : index
    %c0_123 = arith.constant 0 : index
    %309 = vector.load %arg2[%c0_122, %c0_123] : memref<32x128xbf16, #tpu.memory_space<vmem>>, vector<32x128xbf16>
    %cst_124 = arith.constant dense<0.000000e+00> : vector<8x128xf32>
    %310 = tpu.matmul %308, %309, %cst_124 {dimension_numbers = #tpu.dot_dimension_numbers<[1], [0], [0], [1], [0, 0, 1, 1], [], []>} : vector<8x32xbf16>, vector<32x128xbf16>, vector<8x128xf32> -> vector<8x128xf32>
    %311 = arith.addf %303, %310 : vector<8x128xf32>
    %312 = arith.truncf %291 : vector<8x32xf32> to vector<8x32xbf16>
    %c0_125 = arith.constant 0 : index
    %c0_126 = arith.constant 0 : index
    %313 = vector.load %arg3[%c0_125, %c0_126] : memref<32x128xbf16, #tpu.memory_space<vmem>>, vector<32x128xbf16>
    %cst_127 = arith.constant dense<0.000000e+00> : vector<8x128xf32>
    %314 = tpu.matmul %312, %313, %cst_127 {dimension_numbers = #tpu.dot_dimension_numbers<[1], [0], [0], [1], [0, 0, 1, 1], [], []>} : vector<8x32xbf16>, vector<32x128xbf16>, vector<8x128xf32> -> vector<8x128xf32>
    %315 = arith.addf %307, %314 : vector<8x128xf32>
    %cst_128 = arith.constant 0.000000e+00 : f32
    %316 = vector.broadcast %cst_128 : f32 to vector<8x128xf32>
    %317 = arith.subf %316, %311 : vector<8x128xf32>
    %318 = math.exp %317 : vector<8x128xf32>
    %cst_129 = arith.constant 1.000000e+00 : f32
    %319 = vector.broadcast %cst_129 : f32 to vector<8x128xf32>
    %320 = arith.addf %319, %318 : vector<8x128xf32>
    %cst_130 = arith.constant 1.000000e+00 : f32
    %321 = vector.broadcast %cst_130 : f32 to vector<8x128xf32>
    %322 = arith.divf %321, %320 : vector<8x128xf32>
    %323 = vector.extract_strided_slice %322 {offsets = [0, 0], sizes = [8, 32], strides = [1, 1]} : vector<8x128xf32> to vector<8x32xf32>
    %324 = vector.extract_strided_slice %322 {offsets = [0, 32], sizes = [8, 32], strides = [1, 1]} : vector<8x128xf32> to vector<8x32xf32>
    %325 = vector.extract_strided_slice %322 {offsets = [0, 96], sizes = [8, 32], strides = [1, 1]} : vector<8x128xf32> to vector<8x32xf32>
    %326 = vector.extract_strided_slice %311 {offsets = [0, 64], sizes = [8, 32], strides = [1, 1]} : vector<8x128xf32> to vector<8x32xf32>
    %327 = math.tanh %326 : vector<8x32xf32>
    %328 = arith.mulf %324, %272 : vector<8x32xf32>
    %329 = arith.mulf %323, %327 : vector<8x32xf32>
    %330 = arith.addf %328, %329 : vector<8x32xf32>
    %331 = math.tanh %330 : vector<8x32xf32>
    %332 = arith.mulf %325, %331 : vector<8x32xf32>
    %cst_131 = arith.constant 0.000000e+00 : f32
    %333 = vector.broadcast %cst_131 : f32 to vector<8x128xf32>
    %334 = arith.subf %333, %315 : vector<8x128xf32>
    %335 = math.exp %334 : vector<8x128xf32>
    %cst_132 = arith.constant 1.000000e+00 : f32
    %336 = vector.broadcast %cst_132 : f32 to vector<8x128xf32>
    %337 = arith.addf %336, %335 : vector<8x128xf32>
    %cst_133 = arith.constant 1.000000e+00 : f32
    %338 = vector.broadcast %cst_133 : f32 to vector<8x128xf32>
    %339 = arith.divf %338, %337 : vector<8x128xf32>
    %340 = vector.extract_strided_slice %339 {offsets = [0, 0], sizes = [8, 32], strides = [1, 1]} : vector<8x128xf32> to vector<8x32xf32>
    %341 = vector.extract_strided_slice %339 {offsets = [0, 32], sizes = [8, 32], strides = [1, 1]} : vector<8x128xf32> to vector<8x32xf32>
    %342 = vector.extract_strided_slice %339 {offsets = [0, 96], sizes = [8, 32], strides = [1, 1]} : vector<8x128xf32> to vector<8x32xf32>
    %343 = vector.extract_strided_slice %315 {offsets = [0, 64], sizes = [8, 32], strides = [1, 1]} : vector<8x128xf32> to vector<8x32xf32>
    %344 = math.tanh %343 : vector<8x32xf32>
    %345 = arith.mulf %341, %289 : vector<8x32xf32>
    %346 = arith.mulf %340, %344 : vector<8x32xf32>
    %347 = arith.addf %345, %346 : vector<8x32xf32>
    %348 = math.tanh %347 : vector<8x32xf32>
    %349 = arith.mulf %342, %348 : vector<8x32xf32>
    %350 = arith.index_cast %c5_i32 : i32 to index
    %c0_134 = arith.constant 0 : index
    %c0_135 = arith.constant 0 : index
    %351 = vector.load %arg5[%350, %c0_134, %c0_135] : memref<8x8x64xf32, #tpu.memory_space<vmem>>, vector<1x8x32xf32>
    %352 = vector.shape_cast %351 : vector<1x8x32xf32> to vector<8x32xf32>
    %353 = vector.shape_cast %332 : vector<8x32xf32> to vector<1x8x32xf32>
    tpu.vector_store %arg5[%350, %c0_134, %c0_135], %353 {strides = array<i32>} : memref<8x8x64xf32, #tpu.memory_space<vmem>>, vector<1x8x32xf32>,
    %c7_i32_136 = arith.constant 7 : i32
    %354 = arith.subi %c7_i32_136, %c5_i32 : i32
    %355 = arith.index_cast %354 : i32 to index
    %c0_137 = arith.constant 0 : index
    %c32_138 = arith.constant 32 : index
    %356 = vector.load %arg5[%355, %c0_137, %c32_138] : memref<8x8x64xf32, #tpu.memory_space<vmem>>, vector<1x8x32xf32>
    %357 = vector.shape_cast %356 : vector<1x8x32xf32> to vector<8x32xf32>
    %358 = vector.shape_cast %349 : vector<8x32xf32> to vector<1x8x32xf32>
    tpu.vector_store %arg5[%355, %c0_137, %c32_138], %358 {strides = array<i32>} : memref<8x8x64xf32, #tpu.memory_space<vmem>>, vector<1x8x32xf32>,
    %c6_i32 = arith.constant 6 : i32
    %359 = arith.index_cast %c6_i32 : i32 to index
    %c0_139 = arith.constant 0 : index
    %c0_140 = arith.constant 0 : index
    %360 = vector.load %arg6[%359, %c0_139, %c0_140] : memref<8x8x256xf32, #tpu.memory_space<vmem>>, vector<1x8x128xf32>
    %361 = vector.shape_cast %360 : vector<1x8x128xf32> to vector<8x128xf32>
    %c7_i32_141 = arith.constant 7 : i32
    %362 = arith.subi %c7_i32_141, %c6_i32 : i32
    %363 = arith.index_cast %362 : i32 to index
    %c0_142 = arith.constant 0 : index
    %c128_143 = arith.constant 128 : index
    %364 = vector.load %arg6[%363, %c0_142, %c128_143] : memref<8x8x256xf32, #tpu.memory_space<vmem>>, vector<1x8x128xf32>
    %365 = vector.shape_cast %364 : vector<1x8x128xf32> to vector<8x128xf32>
    %366 = arith.truncf %332 : vector<8x32xf32> to vector<8x32xbf16>
    %c0_144 = arith.constant 0 : index
    %c0_145 = arith.constant 0 : index
    %367 = vector.load %arg2[%c0_144, %c0_145] : memref<32x128xbf16, #tpu.memory_space<vmem>>, vector<32x128xbf16>
    %cst_146 = arith.constant dense<0.000000e+00> : vector<8x128xf32>
    %368 = tpu.matmul %366, %367, %cst_146 {dimension_numbers = #tpu.dot_dimension_numbers<[1], [0], [0], [1], [0, 0, 1, 1], [], []>} : vector<8x32xbf16>, vector<32x128xbf16>, vector<8x128xf32> -> vector<8x128xf32>
    %369 = arith.addf %361, %368 : vector<8x128xf32>
    %370 = arith.truncf %349 : vector<8x32xf32> to vector<8x32xbf16>
    %c0_147 = arith.constant 0 : index
    %c0_148 = arith.constant 0 : index
    %371 = vector.load %arg3[%c0_147, %c0_148] : memref<32x128xbf16, #tpu.memory_space<vmem>>, vector<32x128xbf16>
    %cst_149 = arith.constant dense<0.000000e+00> : vector<8x128xf32>
    %372 = tpu.matmul %370, %371, %cst_149 {dimension_numbers = #tpu.dot_dimension_numbers<[1], [0], [0], [1], [0, 0, 1, 1], [], []>} : vector<8x32xbf16>, vector<32x128xbf16>, vector<8x128xf32> -> vector<8x128xf32>
    %373 = arith.addf %365, %372 : vector<8x128xf32>
    %cst_150 = arith.constant 0.000000e+00 : f32
    %374 = vector.broadcast %cst_150 : f32 to vector<8x128xf32>
    %375 = arith.subf %374, %369 : vector<8x128xf32>
    %376 = math.exp %375 : vector<8x128xf32>
    %cst_151 = arith.constant 1.000000e+00 : f32
    %377 = vector.broadcast %cst_151 : f32 to vector<8x128xf32>
    %378 = arith.addf %377, %376 : vector<8x128xf32>
    %cst_152 = arith.constant 1.000000e+00 : f32
    %379 = vector.broadcast %cst_152 : f32 to vector<8x128xf32>
    %380 = arith.divf %379, %378 : vector<8x128xf32>
    %381 = vector.extract_strided_slice %380 {offsets = [0, 0], sizes = [8, 32], strides = [1, 1]} : vector<8x128xf32> to vector<8x32xf32>
    %382 = vector.extract_strided_slice %380 {offsets = [0, 32], sizes = [8, 32], strides = [1, 1]} : vector<8x128xf32> to vector<8x32xf32>
    %383 = vector.extract_strided_slice %380 {offsets = [0, 96], sizes = [8, 32], strides = [1, 1]} : vector<8x128xf32> to vector<8x32xf32>
    %384 = vector.extract_strided_slice %369 {offsets = [0, 64], sizes = [8, 32], strides = [1, 1]} : vector<8x128xf32> to vector<8x32xf32>
    %385 = math.tanh %384 : vector<8x32xf32>
    %386 = arith.mulf %382, %330 : vector<8x32xf32>
    %387 = arith.mulf %381, %385 : vector<8x32xf32>
    %388 = arith.addf %386, %387 : vector<8x32xf32>
    %389 = math.tanh %388 : vector<8x32xf32>
    %390 = arith.mulf %383, %389 : vector<8x32xf32>
    %cst_153 = arith.constant 0.000000e+00 : f32
    %391 = vector.broadcast %cst_153 : f32 to vector<8x128xf32>
    %392 = arith.subf %391, %373 : vector<8x128xf32>
    %393 = math.exp %392 : vector<8x128xf32>
    %cst_154 = arith.constant 1.000000e+00 : f32
    %394 = vector.broadcast %cst_154 : f32 to vector<8x128xf32>
    %395 = arith.addf %394, %393 : vector<8x128xf32>
    %cst_155 = arith.constant 1.000000e+00 : f32
    %396 = vector.broadcast %cst_155 : f32 to vector<8x128xf32>
    %397 = arith.divf %396, %395 : vector<8x128xf32>
    %398 = vector.extract_strided_slice %397 {offsets = [0, 0], sizes = [8, 32], strides = [1, 1]} : vector<8x128xf32> to vector<8x32xf32>
    %399 = vector.extract_strided_slice %397 {offsets = [0, 32], sizes = [8, 32], strides = [1, 1]} : vector<8x128xf32> to vector<8x32xf32>
    %400 = vector.extract_strided_slice %397 {offsets = [0, 96], sizes = [8, 32], strides = [1, 1]} : vector<8x128xf32> to vector<8x32xf32>
    %401 = vector.extract_strided_slice %373 {offsets = [0, 64], sizes = [8, 32], strides = [1, 1]} : vector<8x128xf32> to vector<8x32xf32>
    %402 = math.tanh %401 : vector<8x32xf32>
    %403 = arith.mulf %399, %347 : vector<8x32xf32>
    %404 = arith.mulf %398, %402 : vector<8x32xf32>
    %405 = arith.addf %403, %404 : vector<8x32xf32>
    %406 = math.tanh %405 : vector<8x32xf32>
    %407 = arith.mulf %400, %406 : vector<8x32xf32>
    %408 = arith.index_cast %c6_i32 : i32 to index
    %c0_156 = arith.constant 0 : index
    %c0_157 = arith.constant 0 : index
    %409 = vector.load %arg5[%408, %c0_156, %c0_157] : memref<8x8x64xf32, #tpu.memory_space<vmem>>, vector<1x8x32xf32>
    %410 = vector.shape_cast %409 : vector<1x8x32xf32> to vector<8x32xf32>
    %411 = vector.shape_cast %390 : vector<8x32xf32> to vector<1x8x32xf32>
    tpu.vector_store %arg5[%408, %c0_156, %c0_157], %411 {strides = array<i32>} : memref<8x8x64xf32, #tpu.memory_space<vmem>>, vector<1x8x32xf32>,
    %c7_i32_158 = arith.constant 7 : i32
    %412 = arith.subi %c7_i32_158, %c6_i32 : i32
    %413 = arith.index_cast %412 : i32 to index
    %c0_159 = arith.constant 0 : index
    %c32_160 = arith.constant 32 : index
    %414 = vector.load %arg5[%413, %c0_159, %c32_160] : memref<8x8x64xf32, #tpu.memory_space<vmem>>, vector<1x8x32xf32>
    %415 = vector.shape_cast %414 : vector<1x8x32xf32> to vector<8x32xf32>
    %416 = vector.shape_cast %407 : vector<8x32xf32> to vector<1x8x32xf32>
    tpu.vector_store %arg5[%413, %c0_159, %c32_160], %416 {strides = array<i32>} : memref<8x8x64xf32, #tpu.memory_space<vmem>>, vector<1x8x32xf32>,
    %c7_i32_161 = arith.constant 7 : i32
    %417 = arith.index_cast %c7_i32_161 : i32 to index
    %c0_162 = arith.constant 0 : index
    %c0_163 = arith.constant 0 : index
    %418 = vector.load %arg6[%417, %c0_162, %c0_163] : memref<8x8x256xf32, #tpu.memory_space<vmem>>, vector<1x8x128xf32>
    %419 = vector.shape_cast %418 : vector<1x8x128xf32> to vector<8x128xf32>
    %c7_i32_164 = arith.constant 7 : i32
    %420 = arith.subi %c7_i32_164, %c7_i32_161 : i32
    %421 = arith.index_cast %420 : i32 to index
    %c0_165 = arith.constant 0 : index
    %c128_166 = arith.constant 128 : index
    %422 = vector.load %arg6[%421, %c0_165, %c128_166] : memref<8x8x256xf32, #tpu.memory_space<vmem>>, vector<1x8x128xf32>
    %423 = vector.shape_cast %422 : vector<1x8x128xf32> to vector<8x128xf32>
    %424 = arith.truncf %390 : vector<8x32xf32> to vector<8x32xbf16>
    %c0_167 = arith.constant 0 : index
    %c0_168 = arith.constant 0 : index
    %425 = vector.load %arg2[%c0_167, %c0_168] : memref<32x128xbf16, #tpu.memory_space<vmem>>, vector<32x128xbf16>
    %cst_169 = arith.constant dense<0.000000e+00> : vector<8x128xf32>
    %426 = tpu.matmul %424, %425, %cst_169 {dimension_numbers = #tpu.dot_dimension_numbers<[1], [0], [0], [1], [0, 0, 1, 1], [], []>} : vector<8x32xbf16>, vector<32x128xbf16>, vector<8x128xf32> -> vector<8x128xf32>
    %427 = arith.addf %419, %426 : vector<8x128xf32>
    %428 = arith.truncf %407 : vector<8x32xf32> to vector<8x32xbf16>
    %c0_170 = arith.constant 0 : index
    %c0_171 = arith.constant 0 : index
    %429 = vector.load %arg3[%c0_170, %c0_171] : memref<32x128xbf16, #tpu.memory_space<vmem>>, vector<32x128xbf16>
    %cst_172 = arith.constant dense<0.000000e+00> : vector<8x128xf32>
    %430 = tpu.matmul %428, %429, %cst_172 {dimension_numbers = #tpu.dot_dimension_numbers<[1], [0], [0], [1], [0, 0, 1, 1], [], []>} : vector<8x32xbf16>, vector<32x128xbf16>, vector<8x128xf32> -> vector<8x128xf32>
    %431 = arith.addf %423, %430 : vector<8x128xf32>
    %cst_173 = arith.constant 0.000000e+00 : f32
    %432 = vector.broadcast %cst_173 : f32 to vector<8x128xf32>
    %433 = arith.subf %432, %427 : vector<8x128xf32>
    %434 = math.exp %433 : vector<8x128xf32>
    %cst_174 = arith.constant 1.000000e+00 : f32
    %435 = vector.broadcast %cst_174 : f32 to vector<8x128xf32>
    %436 = arith.addf %435, %434 : vector<8x128xf32>
    %cst_175 = arith.constant 1.000000e+00 : f32
    %437 = vector.broadcast %cst_175 : f32 to vector<8x128xf32>
    %438 = arith.divf %437, %436 : vector<8x128xf32>
    %439 = vector.extract_strided_slice %438 {offsets = [0, 0], sizes = [8, 32], strides = [1, 1]} : vector<8x128xf32> to vector<8x32xf32>
    %440 = vector.extract_strided_slice %438 {offsets = [0, 32], sizes = [8, 32], strides = [1, 1]} : vector<8x128xf32> to vector<8x32xf32>
    %441 = vector.extract_strided_slice %438 {offsets = [0, 96], sizes = [8, 32], strides = [1, 1]} : vector<8x128xf32> to vector<8x32xf32>
    %442 = vector.extract_strided_slice %427 {offsets = [0, 64], sizes = [8, 32], strides = [1, 1]} : vector<8x128xf32> to vector<8x32xf32>
    %443 = math.tanh %442 : vector<8x32xf32>
    %444 = arith.mulf %440, %388 : vector<8x32xf32>
    %445 = arith.mulf %439, %443 : vector<8x32xf32>
    %446 = arith.addf %444, %445 : vector<8x32xf32>
    %447 = math.tanh %446 : vector<8x32xf32>
    %448 = arith.mulf %441, %447 : vector<8x32xf32>
    %cst_176 = arith.constant 0.000000e+00 : f32
    %449 = vector.broadcast %cst_176 : f32 to vector<8x128xf32>
    %450 = arith.subf %449, %431 : vector<8x128xf32>
    %451 = math.exp %450 : vector<8x128xf32>
    %cst_177 = arith.constant 1.000000e+00 : f32
    %452 = vector.broadcast %cst_177 : f32 to vector<8x128xf32>
    %453 = arith.addf %452, %451 : vector<8x128xf32>
    %cst_178 = arith.constant 1.000000e+00 : f32
    %454 = vector.broadcast %cst_178 : f32 to vector<8x128xf32>
    %455 = arith.divf %454, %453 : vector<8x128xf32>
    %456 = vector.extract_strided_slice %455 {offsets = [0, 0], sizes = [8, 32], strides = [1, 1]} : vector<8x128xf32> to vector<8x32xf32>
    %457 = vector.extract_strided_slice %455 {offsets = [0, 32], sizes = [8, 32], strides = [1, 1]} : vector<8x128xf32> to vector<8x32xf32>
    %458 = vector.extract_strided_slice %455 {offsets = [0, 96], sizes = [8, 32], strides = [1, 1]} : vector<8x128xf32> to vector<8x32xf32>
    %459 = vector.extract_strided_slice %431 {offsets = [0, 64], sizes = [8, 32], strides = [1, 1]} : vector<8x128xf32> to vector<8x32xf32>
    %460 = math.tanh %459 : vector<8x32xf32>
    %461 = arith.mulf %457, %405 : vector<8x32xf32>
    %462 = arith.mulf %456, %460 : vector<8x32xf32>
    %463 = arith.addf %461, %462 : vector<8x32xf32>
    %464 = math.tanh %463 : vector<8x32xf32>
    %465 = arith.mulf %458, %464 : vector<8x32xf32>
    %466 = arith.index_cast %c7_i32_161 : i32 to index
    %c0_179 = arith.constant 0 : index
    %c0_180 = arith.constant 0 : index
    %467 = vector.load %arg5[%466, %c0_179, %c0_180] : memref<8x8x64xf32, #tpu.memory_space<vmem>>, vector<1x8x32xf32>
    %468 = vector.shape_cast %467 : vector<1x8x32xf32> to vector<8x32xf32>
    %469 = vector.shape_cast %448 : vector<8x32xf32> to vector<1x8x32xf32>
    tpu.vector_store %arg5[%466, %c0_179, %c0_180], %469 {strides = array<i32>} : memref<8x8x64xf32, #tpu.memory_space<vmem>>, vector<1x8x32xf32>,
    %c7_i32_181 = arith.constant 7 : i32
    %470 = arith.subi %c7_i32_181, %c7_i32_161 : i32
    %471 = arith.index_cast %470 : i32 to index
    %c0_182 = arith.constant 0 : index
    %c32_183 = arith.constant 32 : index
    %472 = vector.load %arg5[%471, %c0_182, %c32_183] : memref<8x8x64xf32, #tpu.memory_space<vmem>>, vector<1x8x32xf32>
    %473 = vector.shape_cast %472 : vector<1x8x32xf32> to vector<8x32xf32>
    %474 = vector.shape_cast %465 : vector<8x32xf32> to vector<1x8x32xf32>
    tpu.vector_store %arg5[%471, %c0_182, %c32_183], %474 {strides = array<i32>} : memref<8x8x64xf32, #tpu.memory_space<vmem>>, vector<1x8x32xf32>,
    %c8_i32 = arith.constant 8 : i32
    return
  }
}

</mosaic_0001>

<bundles_post_ra>
// kernel: birnn_forward.2
= control target key start
LH: loop header
LB: loop body
LE: loop exit
PB: predicated region body
PF: predicated region fallthrough
CT: control target
= control target key end

     0   :  { %v2098_v1 = vmov 0.0   ;;  %v2099_v2 = vmov 0   ;;  %vm2100_vm0 = vmmov 0   ;;  %vm69_vm1 = vcmask 261120   ;;  %s2660_s1 = inlined_call_operand.vmem [shape: bf16[32,256], index: 1, kind: input, shape index: {}]   ;;  %s2661_s2 = inlined_call_operand.vmem [shape: bf16[32,128], index: 2, kind: input, shape index: {}]   ;;  %s2662_s0 = inlined_call_operand.vmem [shape: f32[8,8,32], index: 0, kind: input, shape index: {}]   ;;  %s2663_s3 = inlined_call_operand.vmem [shape: bf16[32,128], index: 3, kind: input, shape index: {}]   ;;  %s2664_s4 = inlined_call_operand.vmem [shape: f32[1,256], index: 4, kind: input, shape index: {}]   ;;  %s2665_s5 = inlined_call_operand.vmem [shape: f32[8,8,64], index: 5, kind: output, shape index: {}]  }
   0x1   :  { %v1932_v0 = vld [vmem:[%s2660_s1 + $0x4] ss:$8 sps:$4 sm:$0xff]   ;;  %1799 = vmatprep.subr.bf16.mxu1 %v2098_v1  ;;  %114 = vmatprep.mubr.bf16.mxu0 %v2099_v2  ;;  %v1934_v3 = vld [vmem:[%s2660_s1] ss:$8 sps:$4 sm:$0xff]   ;;  %v1936_v5 = vld [vmem:[%s2660_s1 + $0x14] ss:$8 sps:$4 sm:$0xff]   ;;  %v39_v22 = vlaneseq }
   0x2   :  { %1803 = vmatprep.mubr.msk.bf16.mxu1 %vm2100_vm0, %v2098_v1  ;;  %82 = vmatprep.subr.bf16.mxu0 %v1932_v0  ;;  %v1935_v4 = vld [vmem:[%s2661_s2] sm:$0xff]   ;;  %v1938_v6 = vld [vmem:[%s2660_s1 + $0x10] ss:$8 sps:$4 sm:$0xff]   ;;  %v1939_v7 = vld [vmem:[%s2661_s2 + $0x8] sm:$0xff]   ;;  %vm349_vm2 = vcmask 523520  }
   0x3   :  { %83 = vmatpush1.bf16.msra.mxu0 %v1934_v3  ;;  %1800 = vmatpush3.bf16.msra.mxu1 %v1935_v4  ;;  %v21_v8 = vld [vmem:[%s2662_s0] sm:$0xff]  ;;  %v22_v9 = vld [vmem:[%s2662_s0 + $0x8] sm:$0xff]  ;;  %v23_v12 = vld [vmem:[%s2662_s0 + $0x10] sm:$0xff]  ;;  %v40_v23 = vshrl.u32 %v39_v22, 7 }
   0x4   :  { %84 = vmatprep.subr.bf16.mxu0 %v1936_v5  ;;  %1801 = vmatprep.subr.bf16.mxu1 %v2098_v1  ;;  %v29_v10 = vpack.c.bf16 %v22_v9, %v21_v8  ;;  %v1940_v11 = vld [vmem:[%s2663_s3] sm:$0xff]   ;;  %v24_v13 = vld [vmem:[%s2662_s0 + $0x18] sm:$0xff]  ;;  %v1941_v14 = vld [vmem:[%s2663_s3 + $0x8] sm:$0xff]  }
   0x5   :  { %v30_v15 = vpack.c.bf16 %v24_v13, %v23_v12  ;;  %v25_v16 = vld [vmem:[%s2662_s0 + $0x20] sm:$0xff]  ;;  %v26_v17 = vld [vmem:[%s2662_s0 + $0x28] sm:$0xff]  ;;  %v27_v19 = vld [vmem:[%s2662_s0 + $0x30] sm:$0xff]  ;;  %v41_v24 = vsub.s32 0, %v40_v23  ;;  %v45_v26 = vsub.s32 1, %v40_v23 }
   0x6   :  { %v31_v18 = vpack.c.bf16 %v26_v17, %v25_v16  ;;  %v28_v20 = vld [vmem:[%s2662_s0 + $0x38] sm:$0xff]  ;;  %v37_v25 = vld [vmem:[%s2664_s4] sm:$0x3]  ;;  %s2101_s0 = smov 64   ;;  %s2102_s4 = smov 32  }
   0x7   :  { %85 = vmatpush1.bf16.msra.mxu0 %v1938_v6  ;;  %1802 = vmatpush3.bf16.msra.mxu1 %v1939_v7  ;;  %v32_v21 = vpack.c.bf16 %v28_v20, %v27_v19  ;;  %v42_v27 = vrot.slane %v37_v25, %v41_v24  ;;  %v46_v28 = vrot.slane %v37_v25, %v45_v26 }
   0x8   :  { %1831 = vmatprep.subr.bf16.mxu0 %v2098_v1  ;;  %1807 = vmatprep.subr.bf16.mxu1 %v2098_v1 }
   0xa   :  { %1687 = vmatmul.mubr.msk.bf16.vlgmr.msra.gmra.mrb[0].mxu0 %vm69_vm1, %v29_v10  ;;  %1804 = vmatmul.mubr.bf16.vlgmr.msra.gmra.mrb[0].mxu1 %v2099_v2 }
   0xb   :  { %124 = vmatprep.mubr.bf16.mxu0 %v2099_v2  ;;  %1808 = vmatpush3.bf16.msra.mxu1 %v1940_v11 }
   0xc   :  { %1811 = vmatprep.mubr.msk.bf16.mxu1 %vm2100_vm0, %v2098_v1  ;;  %1809 = vmatprep.subr.bf16.mxu1 %v2098_v1 }
   0xf   :  { %1810 = vmatpush3.bf16.msra.mxu1 %v1941_v14 }
  0x10   :  { %1815 = vmatprep.subr.bf16.mxu1 %v2098_v1 }
  0x12   :  { %1688 = vmatmul.mubr.msk.bf16.gmra.mrb[4].mxu0 %vm69_vm1, %v30_v15  ;;  %1812 = vmatmul.mubr.bf16.vlgmr.msra.gmra.mrb[4].mxu1 %v2099_v2 }
  0x13   :  { %134 = vmatprep.mubr.bf16.mxu0 %v2099_v2  ;;  %1819 = vmatprep.mubr.msk.bf16.mxu1 %vm2100_vm0, %v2098_v1 }
  0x1a   :  { %1689 = vmatmul.mubr.msk.bf16.gmra.mrb[8].mxu0 %vm69_vm1, %v31_v18 }
  0x1b   :  { %144 = vmatprep.mubr.bf16.mxu0 %v2099_v2 }
  0x22   :  { %1690 = vmatmul.mubr.msk.bf16.gmra.mrb[12].mxu0 %vm69_vm1, %v32_v21 }
  0x23   :  { %1835 = vmatprep.mubr.msk.bf16.mxu0 %vm2100_vm0, %v2098_v1 }
  0xdd   :  { %v116_v29 = vpop.f32.mrb[0].mxu0  ;;  %v227_v32 = vpop.f32.mrb[0].mxu1 }
  0xde   :  { %v117_v30 = vadd.f32 %v116_v29, %v42_v27  ;;  %v118_v31 = vpop.f32.mrb[1].mxu0  ;;  %v1805_v35 = vpop.f32.mrb[1].mxu1 }
  0xdf   :  { %v2202_v33 = vadd.f32 %v118_v31, %v46_v28  ;;  %v120_v34 = vpop.f32.mrb[2].mxu0  ;;  %v230_v39 = vpop.f32.mrb[2].mxu1  ;;  %v1942_v31 = vld [vmem:[%s2661_s2] sm:$0xff]  }
  0xe0   :  { %v2204_v36 = vadd.f32 %v120_v34, %v42_v27  ;;  %v233_v37 = vadd.f32 %v227_v32, %v117_v30  ;;  %v122_v38 = vpop.f32.mrb[3].mxu0  ;;  %v1806_v41 = vpop.f32.mrb[3].mxu1  ;;  %1816 = vmatpush3.bf16.msra.mxu1 %v1942_v31  ;;  %v1943_v32 = vld [vmem:[%s2661_s2 + $0x8] sm:$0xff]  }
  0xe1   :  { %v2206_v40 = vadd.f32 %v122_v38, %v46_v28  ;;  %1817 = vmatprep.subr.bf16.mxu1 %v2098_v1 }
  0xe2   :  { %1970 = vtanh.f32 %v233_v37  ;;  %v291_v10 = vsub.f32 0.0, %v233_v37 }
  0xe4   :  { %v292_v11 = vmul.f32 1.442695, %v291_v10  ;;  %1818 = vmatpush3.bf16.msra.mxu1 %v1943_v32 }
  0xe5   :  { %v126_v42 = vpop.f32.mrb[4].mxu0  ;;  %v284_v45 = vpop.f32.mrb[4].mxu1  ;;  %1823 = vmatprep.subr.bf16.mxu1 %v2098_v1 }
  0xe6   :  { %v2208_v43 = vadd.f32 %v126_v42, %v42_v27  ;;  %v128_v44 = vpop.f32.mrb[5].mxu0  ;;  %v1813_v48 = vpop.f32.mrb[5].mxu1 }
  0xe7   :  { %v2210_v46 = vadd.f32 %v128_v44, %v46_v28  ;;  %v130_v47 = vpop.f32.mrb[6].mxu0  ;;  %v287_v51 = vpop.f32.mrb[6].mxu1  ;;  %v1944_v44 = vld [vmem:[%s2663_s3] sm:$0xff]  }
  0xe8   :  { %v2212_v49 = vadd.f32 %v130_v47, %v42_v27  ;;  %v132_v50 = vpop.f32.mrb[7].mxu0  ;;  %v1814_v53 = vpop.f32.mrb[7].mxu1  ;;  %v1945_v47 = vld [vmem:[%s2663_s3 + $0x8] sm:$0xff]  }
  0xe9   :  { %v2214_v52 = vadd.f32 %v132_v50, %v46_v28 }
  0xec   :  { %v1971_v54 = vpop.eup %1970 }
  0xed   :  { %v136_v55 = vpop.f32.mrb[8].mxu0  ;;  %300 = vrot.lane.b32.xlu0 %v1971_v54, %s2101_s0 }
  0xee   :  { %v2217_v56 = vadd.f32 %v136_v55, %v42_v27  ;;  %v138_v57 = vpop.f32.mrb[9].mxu0 }
  0xef   :  { %v2219_v58 = vadd.f32 %v138_v57, %v46_v28  ;;  %v140_v59 = vpop.f32.mrb[10].mxu0 }
  0xf0   :  { %v2221_v60 = vadd.f32 %v140_v59, %v42_v27  ;;  %v142_v61 = vpop.f32.mrb[11].mxu0 }
  0xf1   :  { %v2223_v62 = vadd.f32 %v142_v61, %v46_v28 }
  0xf5   :  { %v146_v63 = vpop.f32.mrb[12].mxu0 }
  0xf6   :  { %v2225_v0 = vadd.f32 %v146_v63, %v42_v27  ;;  %v148_v2 = vpop.f32.mrb[13].mxu0 }
  0xf7   :  { %v2227_v3 = vadd.f32 %v148_v2, %v46_v28  ;;  %v150_v4 = vpop.f32.mrb[14].mxu0 }
  0xf8   :  { %v2229_v5 = vadd.f32 %v150_v4, %v42_v27  ;;  %v152_v6 = vpop.f32.mrb[15].mxu0 }
  0xf9   :  { %v153_v7 = vadd.f32 %v152_v6, %v46_v28 }
  0xfb   :  { %v290_v8 = vadd.f32 %v284_v45, %v153_v7 }
  0xfd   :  { %1972 = vtanh.f32 %v290_v8  ;;  %v315_v14 = vsub.f32 0.0, %v290_v8 }
  0xfe   :  { %1974 = vpow2.f32 %v292_v11 }
  0xff   :  { %v316_v15 = vmul.f32 1.442695, %v315_v14 }
 0x107   :  { %v1973_v9 = vpop.eup %1972 }
 0x108   :  { %324 = vrot.lane.b32.xlu0 %v1973_v9, %s2101_s0  ;;  %v1975_v12 = vpop.eup %1974 }
 0x109   :  { %v294_v13 = vadd.f32 1.0, %v1975_v12 }
 0x10b   :  { %1976 = vrcp.f32 %v294_v13 }
 0x10c   :  { %1978 = vpow2.f32 %v316_v15 }
 0x115   :  { %v1977_v16 = vpop.eup %1976 }
 0x116   :  { %v1979_v19 = vpop.eup %1978  ;;  %v298_v24 = vmul.f32 0.0, %v1977_v16 }
 0x117   :  { %v318_v20 = vadd.f32 1.0, %v1979_v19 }
 0x119   :  { %1980 = vrcp.f32 %v318_v20 }
 0x123   :  { %v1981_v21 = vpop.eup %1980 }
 0x124   :  { %v322_v28 = vmul.f32 0.0, %v1981_v21 }
 0x15f   :  { %v301_v17 = vpop.permute.xlu0 %300 }
 0x160   :  { %v303_v18 = vmul.f32 %v1977_v16, %v301_v17 }
 0x162   :  { %305 = vrot.lane.b32.xlu1 %v303_v18, %s2102_s4 }
 0x17a   :  { %v325_v22 = vpop.permute.xlu0 %324 }
 0x17b   :  { %v327_v23 = vmul.f32 %v1981_v21, %v325_v22 }
 0x17d   :  { %329 = vrot.lane.b32.xlu1 %v327_v23, %s2102_s4 }
 0x1d4   :  { %v306_v25 = vpop.permute.xlu1 %305 }
 0x1d5   :  { %v2234_v26 = vadd.f32 %v306_v25, %v298_v24 }
 0x1d7   :  { %1982 = vtanh.f32 %v2234_v26 }
 0x1e1   :  { %v1983_v27 = vpop.eup %1982 }
 0x1e2   :  { %311 = vrot.lane.b32.xlu0 %v1983_v27, %s2101_s0  ;;  %v1946_v27 = vld [vmem:[%s2661_s2] sm:$0xff]  }
 0x1e3   :  { %1832 = vmatpush3.bf16.msra.mxu0 %v1946_v27 }
 0x1e4   :  { %1833 = vmatprep.subr.bf16.mxu0 %v2098_v1 }
 0x1ef   :  { %v330_v29 = vpop.permute.xlu1 %329 }
 0x1f0   :  { %v2238_v30 = vadd.f32 %v330_v29, %v322_v28  ;;  %v1948_v29 = vld [vmem:[%s2663_s3] sm:$0xff]  }
 0x1f2   :  { %1984 = vtanh.f32 %v2238_v30 }
 0x1fc   :  { %v1985_v34 = vpop.eup %1984 }
 0x1fd   :  { %335 = vrot.lane.b32.xlu1 %v1985_v34, %s2101_s0 }
 0x254   :  { %v312_v35 = vpop.permute.xlu0 %311 }
 0x255   :  { %v2250_v37 = vmul.f32 %v1977_v16, %v312_v35 }
 0x257   :  { %v355_v38 = vpack.c.bf16 %v2250_v37, %v2250_v37 }
 0x259   :  { %361 = vrot.lane.b32.xlu0 %v355_v38, %s2102_s4 }
 0x26f   :  { %v336_v39 = vpop.permute.xlu1 %335 }
 0x270   :  { %v2255_v41 = vmul.f32 %v1981_v21, %v336_v39 }
 0x272   :  { %v419_v42 = vpack.c.bf16 %v2255_v41, %v2255_v41 }
 0x274   :  { %425 = vrot.lane.b32.xlu1 %v419_v42, %s2102_s4 }
 0x2cb   :  { %v362_v45 = vpop.permute.xlu0 %361 }
 0x2cc   :  { %1820 = vmatmul.mubr.msk.bf16.vlgmr.msra.gmra.mrb[8].mxu1 %vm69_vm1, %v362_v45 }
 0x2cd   :  { %1824 = vmatpush3.bf16.msra.mxu1 %v1944_v44  ;;  %1827 = vmatprep.mubr.msk.bf16.mxu1 %vm2100_vm0, %v2098_v1 }
 0x2ce   :  { %1825 = vmatprep.subr.bf16.mxu1 %v2098_v1 }
 0x2d1   :  { %1826 = vmatpush3.bf16.msra.mxu1 %v1945_v47 }
 0x2d2   :  { %1839 = vmatprep.subr.bf16.mxu1 %v2098_v1 }
 0x2e6   :  { %v426_v48 = vpop.permute.xlu1 %425 }
 0x2e7   :  { %1828 = vmatmul.mubr.msk.bf16.vlgmr.msra.gmra.mrb[12].mxu1 %vm69_vm1, %v426_v48 }
 0x2e8   :  { %1843 = vmatprep.mubr.msk.bf16.mxu1 %vm2100_vm0, %v2098_v1  ;;  %1840 = vmatpush3.bf16.msra.mxu1 %v1948_v29 }
 0x2e9   :  { %1841 = vmatprep.subr.bf16.mxu1 %v2098_v1 }
 0x39f   :  { %v412_v50 = vpop.f32.mrb[8].mxu1 }
 0x3a0   :  { %v418_v51 = vadd.f32 %v412_v50, %v2204_v36  ;;  %v1821_v53 = vpop.f32.mrb[9].mxu1 }
 0x3a1   :  { %v415_v54 = vpop.f32.mrb[10].mxu1 }
 0x3a2   :  { %1986 = vtanh.f32 %v418_v51  ;;  %v1822_v55 = vpop.f32.mrb[11].mxu1  ;;  %v483_v7 = vsub.f32 0.0, %v418_v51 }
 0x3a4   :  { %v484_v8 = vmul.f32 1.442695, %v483_v7 }
 0x3ac   :  { %v1987_v57 = vpop.eup %1986 }
 0x3ad   :  { %492 = vrot.lane.b32.xlu0 %v1987_v57, %s2101_s0 }
 0x3ba   :  { %v476_v59 = vpop.f32.mrb[12].mxu1 }
 0x3bb   :  { %v482_v61 = vadd.f32 %v476_v59, %v2227_v3  ;;  %v1829_v63 = vpop.f32.mrb[13].mxu1 }
 0x3bc   :  { %v479_v2 = vpop.f32.mrb[14].mxu1 }
 0x3bd   :  { %1988 = vtanh.f32 %v482_v61  ;;  %v1830_v4 = vpop.f32.mrb[15].mxu1  ;;  %v507_v10 = vsub.f32 0.0, %v482_v61 }
 0x3be   :  { %1990 = vpow2.f32 %v484_v8 }
 0x3bf   :  { %v508_v11 = vmul.f32 1.442695, %v507_v10 }
 0x3c7   :  { %v1989_v6 = vpop.eup %1988 }
 0x3c8   :  { %516 = vrot.lane.b32.xlu1 %v1989_v6, %s2101_s0  ;;  %v1991_v36 = vpop.eup %1990 }
 0x3c9   :  { %v486_v9 = vadd.f32 1.0, %v1991_v36 }
 0x3cb   :  { %1992 = vrcp.f32 %v486_v9 }
 0x3cc   :  { %1994 = vpow2.f32 %v508_v11 }
 0x3d5   :  { %v1993_v12 = vpop.eup %1992 }
 0x3d6   :  { %v1995_v3 = vpop.eup %1994  ;;  %v490_v19 = vmul.f32 %v1993_v12, %v2234_v26  ;;  %v1947_v26 = vld [vmem:[%s2661_s2 + $0x8] sm:$0xff]  }
 0x3d7   :  { %v510_v15 = vadd.f32 1.0, %v1995_v3  ;;  %1834 = vmatpush3.bf16.msra.mxu0 %v1947_v26 }
 0x3d8   :  { %1847 = vmatprep.subr.bf16.mxu0 %v2098_v1 }
 0x3d9   :  { %1996 = vrcp.f32 %v510_v15 }
 0x3e3   :  { %v1997_v16 = vpop.eup %1996 }
 0x3e4   :  { %v514_v23 = vmul.f32 %v1997_v16, %v2238_v30  ;;  %v1949_v30 = vld [vmem:[%s2663_s3 + $0x8] sm:$0xff]  }
 0x3e5   :  { %1842 = vmatpush3.bf16.msra.mxu1 %v1949_v30 }
 0x3e6   :  { %1855 = vmatprep.subr.bf16.mxu1 %v2098_v1 }
 0x41f   :  { %v493_v13 = vpop.permute.xlu0 %492 }
 0x420   :  { %v495_v14 = vmul.f32 %v1993_v12, %v493_v13 }
 0x422   :  { %497 = vrot.lane.b32.xlu0 %v495_v14, %s2102_s4 }
 0x43a   :  { %v517_v17 = vpop.permute.xlu1 %516 }
 0x43b   :  { %v519_v18 = vmul.f32 %v1997_v16, %v517_v17 }
 0x43d   :  { %521 = vrot.lane.b32.xlu1 %v519_v18, %s2102_s4 }
 0x494   :  { %v498_v20 = vpop.permute.xlu0 %497 }
 0x495   :  { %v2281_v21 = vadd.f32 %v498_v20, %v490_v19 }
 0x497   :  { %1998 = vtanh.f32 %v2281_v21 }
 0x4a1   :  { %v1999_v22 = vpop.eup %1998 }
 0x4a2   :  { %503 = vrot.lane.b32.xlu0 %v1999_v22, %s2101_s0  ;;  %v1950_v22 = vld [vmem:[%s2661_s2] sm:$0xff]  }
 0x4af   :  { %v522_v24 = vpop.permute.xlu1 %521 }
 0x4b0   :  { %v2286_v25 = vadd.f32 %v522_v24, %v514_v23  ;;  %v1952_v24 = vld [vmem:[%s2663_s3] sm:$0xff]  }
 0x4b2   :  { %2000 = vtanh.f32 %v2286_v25 }
 0x4bc   :  { %v2001_v28 = vpop.eup %2000 }
 0x4bd   :  { %527 = vrot.lane.b32.xlu1 %v2001_v28, %s2101_s0 }
 0x514   :  { %v504_v31 = vpop.permute.xlu0 %503 }
 0x515   :  { %v2306_v32 = vmul.f32 %v1993_v12, %v504_v31 }
 0x517   :  { %v547_v34 = vpack.c.bf16 %v2306_v32, %v2306_v32 }
 0x519   :  { %553 = vrot.lane.b32.xlu0 %v547_v34, %s2102_s4 }
 0x52f   :  { %v528_v35 = vpop.permute.xlu1 %527 }
 0x530   :  { %v2311_v38 = vmul.f32 %v1997_v16, %v528_v35 }
 0x532   :  { %v611_v39 = vpack.c.bf16 %v2311_v38, %v2311_v38 }
 0x534   :  { %617 = vrot.lane.b32.xlu1 %v611_v39, %s2102_s4 }
 0x58b   :  { %v554_v42 = vpop.permute.xlu0 %553 }
 0x58c   :  { %1836 = vmatmul.mubr.msk.bf16.vlgmr.msra.gmra.mrb[16].mxu0 %vm69_vm1, %v554_v42 }
 0x58d   :  { %1851 = vmatprep.mubr.msk.bf16.mxu0 %vm2100_vm0, %v2098_v1  ;;  %1848 = vmatpush3.bf16.msra.mxu0 %v1950_v22 }
 0x58e   :  { %1849 = vmatprep.subr.bf16.mxu0 %v2098_v1 }
 0x5a6   :  { %v618_v44 = vpop.permute.xlu1 %617 }
 0x5a7   :  { %1844 = vmatmul.mubr.msk.bf16.vlgmr.msra.gmra.mrb[16].mxu1 %vm69_vm1, %v618_v44 }
 0x5a8   :  { %1859 = vmatprep.mubr.msk.bf16.mxu1 %vm2100_vm0, %v2098_v1  ;;  %1856 = vmatpush3.bf16.msra.mxu1 %v1952_v24 }
 0x5a9   :  { %1857 = vmatprep.subr.bf16.mxu1 %v2098_v1 }
 0x65f   :  { %v604_v45 = vpop.f32.mrb[16].mxu0 }
 0x660   :  { %v610_v47 = vadd.f32 %v604_v45, %v2208_v43  ;;  %v1837_v48 = vpop.f32.mrb[17].mxu0 }
 0x661   :  { %v607_v50 = vpop.f32.mrb[18].mxu0 }
 0x662   :  { %2002 = vtanh.f32 %v610_v47  ;;  %v1838_v51 = vpop.f32.mrb[19].mxu0  ;;  %v675_v2 = vsub.f32 0.0, %v610_v47 }
 0x664   :  { %v676_v4 = vmul.f32 1.442695, %v675_v2 }
 0x66c   :  { %v2003_v53 = vpop.eup %2002 }
 0x66d   :  { %684 = vrot.lane.b32.xlu0 %v2003_v53, %s2101_s0 }
 0x67a   :  { %v668_v54 = vpop.f32.mrb[16].mxu1 }
 0x67b   :  { %v674_v55 = vadd.f32 %v668_v54, %v2223_v62  ;;  %v1845_v57 = vpop.f32.mrb[17].mxu1 }
 0x67c   :  { %v671_v59 = vpop.f32.mrb[18].mxu1 }
 0x67d   :  { %2004 = vtanh.f32 %v674_v55  ;;  %v1846_v61 = vpop.f32.mrb[19].mxu1  ;;  %v699_v7 = vsub.f32 0.0, %v674_v55 }
 0x67e   :  { %2006 = vpow2.f32 %v676_v4 }
 0x67f   :  { %v700_v8 = vmul.f32 1.442695, %v699_v7 }
 0x687   :  { %v2005_v63 = vpop.eup %2004 }
 0x688   :  { %708 = vrot.lane.b32.xlu1 %v2005_v63, %s2101_s0  ;;  %v2007_v43 = vpop.eup %2006 }
 0x689   :  { %v678_v6 = vadd.f32 1.0, %v2007_v43 }
 0x68b   :  { %2008 = vrcp.f32 %v678_v6 }
 0x68c   :  { %2010 = vpow2.f32 %v700_v8 }
 0x695   :  { %v2009_v36 = vpop.eup %2008 }
 0x696   :  { %v2011_v62 = vpop.eup %2010  ;;  %v682_v3 = vmul.f32 %v2009_v36, %v2281_v21  ;;  %v1951_v21 = vld [vmem:[%s2661_s2 + $0x8] sm:$0xff]  }
 0x697   :  { %v702_v11 = vadd.f32 1.0, %v2011_v62  ;;  %1850 = vmatpush3.bf16.msra.mxu0 %v1951_v21 }
 0x698   :  { %1863 = vmatprep.subr.bf16.mxu0 %v2098_v1 }
 0x699   :  { %2012 = vrcp.f32 %v702_v11 }
 0x6a3   :  { %v2013_v12 = vpop.eup %2012 }
 0x6a4   :  { %v706_v18 = vmul.f32 %v2013_v12, %v2286_v25  ;;  %v1953_v25 = vld [vmem:[%s2663_s3 + $0x8] sm:$0xff]  }
 0x6a5   :  { %1858 = vmatpush3.bf16.msra.mxu1 %v1953_v25 }
 0x6a6   :  { %1871 = vmatprep.subr.bf16.mxu1 %v2098_v1 }
 0x6df   :  { %v685_v9 = vpop.permute.xlu0 %684 }
 0x6e0   :  { %v687_v10 = vmul.f32 %v2009_v36, %v685_v9 }
 0x6e2   :  { %689 = vrot.lane.b32.xlu0 %v687_v10, %s2102_s4 }
 0x6fa   :  { %v709_v13 = vpop.permute.xlu1 %708 }
 0x6fb   :  { %v711_v14 = vmul.f32 %v2013_v12, %v709_v13 }
 0x6fd   :  { %713 = vrot.lane.b32.xlu1 %v711_v14, %s2102_s4 }
 0x754   :  { %v690_v15 = vpop.permute.xlu0 %689 }
 0x755   :  { %v2329_v16 = vadd.f32 %v690_v15, %v682_v3 }
 0x757   :  { %2014 = vtanh.f32 %v2329_v16 }
 0x761   :  { %v2015_v17 = vpop.eup %2014 }
 0x762   :  { %695 = vrot.lane.b32.xlu0 %v2015_v17, %s2101_s0  ;;  %v1954_v17 = vld [vmem:[%s2661_s2] sm:$0xff]  }
 0x76f   :  { %v714_v19 = vpop.permute.xlu1 %713 }
 0x770   :  { %v2334_v20 = vadd.f32 %v714_v19, %v706_v18  ;;  %v1956_v19 = vld [vmem:[%s2663_s3] sm:$0xff]  }
 0x772   :  { %2016 = vtanh.f32 %v2334_v20 }
 0x77c   :  { %v2017_v23 = vpop.eup %2016 }
 0x77d   :  { %719 = vrot.lane.b32.xlu1 %v2017_v23, %s2101_s0 }
 0x7d4   :  { %v696_v27 = vpop.permute.xlu0 %695 }
 0x7d5   :  { %v2354_v26 = vmul.f32 %v2009_v36, %v696_v27 }
 0x7d7   :  { %v739_v28 = vpack.c.bf16 %v2354_v26, %v2354_v26 }
 0x7d9   :  { %745 = vrot.lane.b32.xlu0 %v739_v28, %s2102_s4 }
 0x7ef   :  { %v720_v29 = vpop.permute.xlu1 %719 }
 0x7f0   :  { %v2359_v30 = vmul.f32 %v2013_v12, %v720_v29 }
 0x7f2   :  { %v803_v31 = vpack.c.bf16 %v2359_v30, %v2359_v30 }
 0x7f4   :  { %809 = vrot.lane.b32.xlu1 %v803_v31, %s2102_s4 }
 0x84b   :  { %v746_v34 = vpop.permute.xlu0 %745 }
 0x84c   :  { %1852 = vmatmul.mubr.msk.bf16.vlgmr.msra.gmra.mrb[20].mxu0 %vm69_vm1, %v746_v34 }
 0x84d   :  { %1867 = vmatprep.mubr.msk.bf16.mxu0 %vm2100_vm0, %v2098_v1  ;;  %1864 = vmatpush3.bf16.msra.mxu0 %v1954_v17 }
 0x84e   :  { %1865 = vmatprep.subr.bf16.mxu0 %v2098_v1 }
 0x866   :  { %v810_v35 = vpop.permute.xlu1 %809 }
 0x867   :  { %1860 = vmatmul.mubr.msk.bf16.vlgmr.msra.gmra.mrb[20].mxu1 %vm69_vm1, %v810_v35 }
 0x868   :  { %1875 = vmatprep.mubr.msk.bf16.mxu1 %vm2100_vm0, %v2098_v1  ;;  %1872 = vmatpush3.bf16.msra.mxu1 %v1956_v19 }
 0x869   :  { %1873 = vmatprep.subr.bf16.mxu1 %v2098_v1 }
 0x91f   :  { %v796_v39 = vpop.f32.mrb[20].mxu0 }
 0x920   :  { %v802_v42 = vadd.f32 %v796_v39, %v2212_v49  ;;  %v1853_v44 = vpop.f32.mrb[21].mxu0 }
 0x921   :  { %v799_v45 = vpop.f32.mrb[22].mxu0 }
 0x922   :  { %2018 = vtanh.f32 %v802_v42  ;;  %v1854_v47 = vpop.f32.mrb[23].mxu0  ;;  %v867_v59 = vsub.f32 0.0, %v802_v42 }
 0x924   :  { %v868_v61 = vmul.f32 1.442695, %v867_v59 }
 0x92c   :  { %v2019_v48 = vpop.eup %2018 }
 0x92d   :  { %876 = vrot.lane.b32.xlu0 %v2019_v48, %s2101_s0 }
 0x93a   :  { %v860_v50 = vpop.f32.mrb[20].mxu1 }
 0x93b   :  { %v866_v51 = vadd.f32 %v860_v50, %v2219_v58  ;;  %v1861_v53 = vpop.f32.mrb[21].mxu1 }
 0x93c   :  { %v863_v54 = vpop.f32.mrb[22].mxu1 }
 0x93d   :  { %2020 = vtanh.f32 %v866_v51  ;;  %v1862_v55 = vpop.f32.mrb[23].mxu1  ;;  %v891_v2 = vsub.f32 0.0, %v866_v51 }
 0x93e   :  { %2022 = vpow2.f32 %v868_v61 }
 0x93f   :  { %v892_v4 = vmul.f32 1.442695, %v891_v2 }
 0x947   :  { %v2021_v57 = vpop.eup %2020 }
 0x948   :  { %900 = vrot.lane.b32.xlu1 %v2021_v57, %s2101_s0  ;;  %v2023_v49 = vpop.eup %2022 }
 0x949   :  { %v870_v63 = vadd.f32 1.0, %v2023_v49 }
 0x94b   :  { %2024 = vrcp.f32 %v870_v63 }
 0x94c   :  { %2026 = vpow2.f32 %v892_v4 }
 0x955   :  { %v2025_v43 = vpop.eup %2024 }
 0x956   :  { %v2027_v58 = vpop.eup %2026  ;;  %v874_v62 = vmul.f32 %v2025_v43, %v2329_v16  ;;  %v1955_v16 = vld [vmem:[%s2661_s2 + $0x8] sm:$0xff]  }
 0x957   :  { %v894_v8 = vadd.f32 1.0, %v2027_v58  ;;  %1866 = vmatpush3.bf16.msra.mxu0 %v1955_v16 }
 0x958   :  { %1879 = vmatprep.subr.bf16.mxu0 %v2098_v1 }
 0x959   :  { %2028 = vrcp.f32 %v894_v8 }
 0x963   :  { %v2029_v36 = vpop.eup %2028 }
 0x964   :  { %v898_v14 = vmul.f32 %v2029_v36, %v2334_v20  ;;  %v1957_v20 = vld [vmem:[%s2663_s3 + $0x8] sm:$0xff]  }
 0x965   :  { %1874 = vmatpush3.bf16.msra.mxu1 %v1957_v20 }
 0x966   :  { %1887 = vmatprep.subr.bf16.mxu1 %v2098_v1 }
 0x99f   :  { %v877_v6 = vpop.permute.xlu0 %876 }
 0x9a0   :  { %v879_v7 = vmul.f32 %v2025_v43, %v877_v6 }
 0x9a2   :  { %881 = vrot.lane.b32.xlu0 %v879_v7, %s2102_s4 }
 0x9ba   :  { %v901_v9 = vpop.permute.xlu1 %900 }
 0x9bb   :  { %v903_v10 = vmul.f32 %v2029_v36, %v901_v9 }
 0x9bd   :  { %905 = vrot.lane.b32.xlu1 %v903_v10, %s2102_s4 }
 0xa14   :  { %v882_v11 = vpop.permute.xlu0 %881 }
 0xa15   :  { %v2377_v12 = vadd.f32 %v882_v11, %v874_v62 }
 0xa17   :  { %2030 = vtanh.f32 %v2377_v12 }
 0xa21   :  { %v2031_v13 = vpop.eup %2030 }
 0xa22   :  { %887 = vrot.lane.b32.xlu0 %v2031_v13, %s2101_s0  ;;  %v1958_v13 = vld [vmem:[%s2661_s2] sm:$0xff]  }
 0xa2f   :  { %v906_v3 = vpop.permute.xlu1 %905 }
 0xa30   :  { %v2382_v15 = vadd.f32 %v906_v3, %v898_v14  ;;  %v1960_v3 = vld [vmem:[%s2663_s3] sm:$0xff]  }
 0xa32   :  { %2032 = vtanh.f32 %v2382_v15 }
 0xa3c   :  { %v2033_v18 = vpop.eup %2032 }
 0xa3d   :  { %911 = vrot.lane.b32.xlu1 %v2033_v18, %s2101_s0 }
 0xa94   :  { %v888_v22 = vpop.permute.xlu0 %887 }
 0xa95   :  { %v2402_v21 = vmul.f32 %v2025_v43, %v888_v22 }
 0xa97   :  { %v929_v23 = vpack.c.bf16 %v2402_v21, %v2402_v21 }
 0xa99   :  { %935 = vrot.lane.b32.xlu0 %v929_v23, %s2102_s4 }
 0xaaf   :  { %v912_v24 = vpop.permute.xlu1 %911 }
 0xab0   :  { %v2407_v25 = vmul.f32 %v2029_v36, %v912_v24 }
 0xab2   :  { %v993_v27 = vpack.c.bf16 %v2407_v25, %v2407_v25 }
 0xab4   :  { %999 = vrot.lane.b32.xlu1 %v993_v27, %s2102_s4 }
 0xb0b   :  { %v936_v28 = vpop.permute.xlu0 %935 }
 0xb0c   :  { %1868 = vmatmul.mubr.msk.bf16.vlgmr.msra.gmra.mrb[24].mxu0 %vm69_vm1, %v936_v28 }
 0xb0d   :  { %1883 = vmatprep.mubr.msk.bf16.mxu0 %vm2100_vm0, %v2098_v1  ;;  %1880 = vmatpush3.bf16.msra.mxu0 %v1958_v13 }
 0xb0e   :  { %1881 = vmatprep.subr.bf16.mxu0 %v2098_v1 }
 0xb26   :  { %v1000_v29 = vpop.permute.xlu1 %999 }
 0xb27   :  { %1876 = vmatmul.mubr.msk.bf16.vlgmr.msra.gmra.mrb[24].mxu1 %vm69_vm1, %v1000_v29 }
 0xb28   :  { %1891 = vmatprep.mubr.msk.bf16.mxu1 %vm2100_vm0, %v2098_v1  ;;  %1888 = vmatpush3.bf16.msra.mxu1 %v1960_v3 }
 0xb29   :  { %1889 = vmatprep.subr.bf16.mxu1 %v2098_v1 }
 0xbdf   :  { %v986_v31 = vpop.f32.mrb[24].mxu0 }
 0xbe0   :  { %v992_v34 = vadd.f32 %v986_v31, %v2217_v56  ;;  %v1869_v35 = vpop.f32.mrb[25].mxu0 }
 0xbe1   :  { %v989_v39 = vpop.f32.mrb[26].mxu0 }
 0xbe2   :  { %2034 = vtanh.f32 %v992_v34  ;;  %v1870_v42 = vpop.f32.mrb[27].mxu0  ;;  %v1057_v54 = vsub.f32 0.0, %v992_v34 }
 0xbe4   :  { %v1058_v55 = vmul.f32 1.442695, %v1057_v54 }
 0xbec   :  { %v2035_v44 = vpop.eup %2034 }
 0xbed   :  { %1066 = vrot.lane.b32.xlu0 %v2035_v44, %s2101_s0 }
 0xbfa   :  { %v1050_v45 = vpop.f32.mrb[24].mxu1 }
 0xbfb   :  { %v1056_v47 = vadd.f32 %v1050_v45, %v2214_v52  ;;  %v1877_v48 = vpop.f32.mrb[25].mxu1 }
 0xbfc   :  { %v1053_v50 = vpop.f32.mrb[26].mxu1 }
 0xbfd   :  { %2036 = vtanh.f32 %v1056_v47  ;;  %v1878_v51 = vpop.f32.mrb[27].mxu1  ;;  %v1081_v59 = vsub.f32 0.0, %v1056_v47 }
 0xbfe   :  { %2038 = vpow2.f32 %v1058_v55 }
 0xbff   :  { %v1082_v61 = vmul.f32 1.442695, %v1081_v59 }
 0xc07   :  { %v2037_v53 = vpop.eup %2036 }
 0xc08   :  { %1090 = vrot.lane.b32.xlu1 %v2037_v53, %s2101_s0  ;;  %v2039_v56 = vpop.eup %2038 }
 0xc09   :  { %v1060_v57 = vadd.f32 1.0, %v2039_v56 }
 0xc0b   :  { %2040 = vrcp.f32 %v1060_v57 }
 0xc0c   :  { %2042 = vpow2.f32 %v1082_v61 }
 0xc15   :  { %v2041_v49 = vpop.eup %2040 }
 0xc16   :  { %v2043_v52 = vpop.eup %2042  ;;  %v1064_v58 = vmul.f32 %v2041_v49, %v2377_v12  ;;  %v1959_v12 = vld [vmem:[%s2661_s2 + $0x8] sm:$0xff]  }
 0xc17   :  { %v1084_v4 = vadd.f32 1.0, %v2043_v52  ;;  %1882 = vmatpush3.bf16.msra.mxu0 %v1959_v12 }
 0xc18   :  { %1895 = vmatprep.subr.bf16.mxu0 %v2098_v1 }
 0xc19   :  { %2044 = vrcp.f32 %v1084_v4 }
 0xc23   :  { %v2045_v43 = vpop.eup %2044 }
 0xc24   :  { %v1088_v10 = vmul.f32 %v2045_v43, %v2382_v15  ;;  %v1961_v15 = vld [vmem:[%s2663_s3 + $0x8] sm:$0xff]  }
 0xc25   :  { %1890 = vmatpush3.bf16.msra.mxu1 %v1961_v15 }
 0xc26   :  { %1903 = vmatprep.subr.bf16.mxu1 %v2098_v1 }
 0xc5f   :  { %v1067_v63 = vpop.permute.xlu0 %1066 }
 0xc60   :  { %v1069_v2 = vmul.f32 %v2041_v49, %v1067_v63 }
 0xc62   :  { %1071 = vrot.lane.b32.xlu0 %v1069_v2, %s2102_s4 }
 0xc7a   :  { %v1091_v6 = vpop.permute.xlu1 %1090 }
 0xc7b   :  { %v1093_v7 = vmul.f32 %v2045_v43, %v1091_v6 }
 0xc7d   :  { %1095 = vrot.lane.b32.xlu1 %v1093_v7, %s2102_s4 }
 0xcd4   :  { %v1072_v8 = vpop.permute.xlu0 %1071 }
 0xcd5   :  { %v2425_v36 = vadd.f32 %v1072_v8, %v1064_v58 }
 0xcd7   :  { %2046 = vtanh.f32 %v2425_v36 }
 0xce1   :  { %v2047_v9 = vpop.eup %2046 }
 0xce2   :  { %1077 = vrot.lane.b32.xlu0 %v2047_v9, %s2101_s0  ;;  %v1962_v9 = vld [vmem:[%s2661_s2] sm:$0xff]  }
 0xcef   :  { %v1096_v62 = vpop.permute.xlu1 %1095 }
 0xcf0   :  { %v2430_v11 = vadd.f32 %v1096_v62, %v1088_v10  ;;  %v1964_v62 = vld [vmem:[%s2663_s3] sm:$0xff]  }
 0xcf2   :  { %2048 = vtanh.f32 %v2430_v11 }
 0xcfc   :  { %v2049_v14 = vpop.eup %2048 }
 0xcfd   :  { %1101 = vrot.lane.b32.xlu1 %v2049_v14, %s2101_s0 }
 0xd54   :  { %v1078_v17 = vpop.permute.xlu0 %1077 }
 0xd55   :  { %v2450_v16 = vmul.f32 %v2041_v49, %v1078_v17 }
 0xd57   :  { %v1117_v18 = vpack.c.bf16 %v2450_v16, %v2450_v16 }
 0xd59   :  { %1123 = vrot.lane.b32.xlu0 %v1117_v18, %s2102_s4 }
 0xd6f   :  { %v1102_v19 = vpop.permute.xlu1 %1101 }
 0xd70   :  { %v2455_v20 = vmul.f32 %v2045_v43, %v1102_v19 }
 0xd72   :  { %v1181_v22 = vpack.c.bf16 %v2455_v20, %v2455_v20 }
 0xd74   :  { %1187 = vrot.lane.b32.xlu1 %v1181_v22, %s2102_s4 }
 0xdcb   :  { %v1124_v23 = vpop.permute.xlu0 %1123 }
 0xdcc   :  { %1884 = vmatmul.mubr.msk.bf16.vlgmr.msra.gmra.mrb[28].mxu0 %vm69_vm1, %v1124_v23 }
 0xdcd   :  { %1899 = vmatprep.mubr.msk.bf16.mxu0 %vm2100_vm0, %v2098_v1  ;;  %1896 = vmatpush3.bf16.msra.mxu0 %v1962_v9 }
 0xdce   :  { %1897 = vmatprep.subr.bf16.mxu0 %v2098_v1 }
 0xde6   :  { %v1188_v24 = vpop.permute.xlu1 %1187 }
 0xde7   :  { %1892 = vmatmul.mubr.msk.bf16.vlgmr.msra.gmra.mrb[28].mxu1 %vm69_vm1, %v1188_v24 }
 0xde8   :  { %1907 = vmatprep.mubr.msk.bf16.mxu1 %vm2100_vm0, %v2098_v1  ;;  %1904 = vmatpush3.bf16.msra.mxu1 %v1964_v62 }
 0xde9   :  { %1905 = vmatprep.subr.bf16.mxu1 %v2098_v1 }
 0xe9f   :  { %v1174_v27 = vpop.f32.mrb[28].mxu0 }
 0xea0   :  { %v1180_v28 = vadd.f32 %v1174_v27, %v2221_v60  ;;  %v1885_v29 = vpop.f32.mrb[29].mxu0 }
 0xea1   :  { %v1177_v31 = vpop.f32.mrb[30].mxu0 }
 0xea2   :  { %2050 = vtanh.f32 %v1180_v28  ;;  %v1886_v34 = vpop.f32.mrb[31].mxu0  ;;  %v1245_v50 = vsub.f32 0.0, %v1180_v28 }
 0xea4   :  { %v1246_v51 = vmul.f32 1.442695, %v1245_v50 }
 0xeac   :  { %v2051_v35 = vpop.eup %2050 }
 0xead   :  { %1254 = vrot.lane.b32.xlu0 %v2051_v35, %s2101_s0 }
 0xeba   :  { %v1238_v39 = vpop.f32.mrb[28].mxu1 }
 0xebb   :  { %v1244_v42 = vadd.f32 %v1238_v39, %v2210_v46  ;;  %v1893_v44 = vpop.f32.mrb[29].mxu1 }
 0xebc   :  { %v1241_v45 = vpop.f32.mrb[30].mxu1 }
 0xebd   :  { %2052 = vtanh.f32 %v1244_v42  ;;  %v1894_v47 = vpop.f32.mrb[31].mxu1  ;;  %v1269_v54 = vsub.f32 0.0, %v1244_v42 }
 0xebe   :  { %2054 = vpow2.f32 %v1246_v51 }
 0xebf   :  { %v1270_v55 = vmul.f32 1.442695, %v1269_v54 }
 0xec7   :  { %v2053_v48 = vpop.eup %2052 }
 0xec8   :  { %1278 = vrot.lane.b32.xlu1 %v2053_v48, %s2101_s0  ;;  %v2055_v60 = vpop.eup %2054 }
 0xec9   :  { %v1248_v53 = vadd.f32 1.0, %v2055_v60 }
 0xecb   :  { %2056 = vrcp.f32 %v1248_v53 }
 0xecc   :  { %2058 = vpow2.f32 %v1270_v55 }
 0xed5   :  { %v2057_v56 = vpop.eup %2056 }
 0xed6   :  { %v2059_v46 = vpop.eup %2058  ;;  %v1252_v52 = vmul.f32 %v2057_v56, %v2425_v36  ;;  %v1963_v36 = vld [vmem:[%s2661_s2 + $0x8] sm:$0xff]  }
 0xed7   :  { %v1272_v61 = vadd.f32 1.0, %v2059_v46  ;;  %1898 = vmatpush3.bf16.msra.mxu0 %v1963_v36 }
 0xed8   :  { %1911 = vmatprep.subr.bf16.mxu0 %v2098_v1 }
 0xed9   :  { %2060 = vrcp.f32 %v1272_v61 }
 0xee3   :  { %v2061_v49 = vpop.eup %2060 }
 0xee4   :  { %v1276_v7 = vmul.f32 %v2061_v49, %v2430_v11  ;;  %v1965_v11 = vld [vmem:[%s2663_s3 + $0x8] sm:$0xff]  }
 0xee5   :  { %1906 = vmatpush3.bf16.msra.mxu1 %v1965_v11 }
 0xee6   :  { %1919 = vmatprep.subr.bf16.mxu1 %v2098_v1 }
 0xf1f   :  { %v1255_v57 = vpop.permute.xlu0 %1254 }
 0xf20   :  { %v1257_v59 = vmul.f32 %v2057_v56, %v1255_v57 }
 0xf22   :  { %1259 = vrot.lane.b32.xlu0 %v1257_v59, %s2102_s4 }
 0xf3a   :  { %v1279_v63 = vpop.permute.xlu1 %1278 }
 0xf3b   :  { %v1281_v2 = vmul.f32 %v2061_v49, %v1279_v63 }
 0xf3d   :  { %1283 = vrot.lane.b32.xlu1 %v1281_v2, %s2102_s4 }
 0xf94   :  { %v1260_v4 = vpop.permute.xlu0 %1259 }
 0xf95   :  { %v2473_v43 = vadd.f32 %v1260_v4, %v1252_v52 }
 0xf97   :  { %2062 = vtanh.f32 %v2473_v43 }
 0xfa1   :  { %v2063_v6 = vpop.eup %2062 }
 0xfa2   :  { %1265 = vrot.lane.b32.xlu0 %v2063_v6, %s2101_s0  ;;  %v1966_v6 = vld [vmem:[%s2661_s2] sm:$0xff]  }
 0xfaf   :  { %v1284_v58 = vpop.permute.xlu1 %1283 }
 0xfb0   :  { %v2478_v8 = vadd.f32 %v1284_v58, %v1276_v7  ;;  %v1968_v58 = vld [vmem:[%s2663_s3] sm:$0xff]  }
 0xfb2   :  { %2064 = vtanh.f32 %v2478_v8 }
 0xfbc   :  { %v2065_v10 = vpop.eup %2064 }
 0xfbd   :  { %1289 = vrot.lane.b32.xlu1 %v2065_v10, %s2101_s0 }
0x1014   :  { %v1266_v13 = vpop.permute.xlu0 %1265 }
0x1015   :  { %v2498_v12 = vmul.f32 %v2057_v56, %v1266_v13 }
0x1017   :  { %v1305_v14 = vpack.c.bf16 %v2498_v12, %v2498_v12 }
0x1019   :  { %1311 = vrot.lane.b32.xlu0 %v1305_v14, %s2102_s4 }
0x102f   :  { %v1290_v3 = vpop.permute.xlu1 %1289 }
0x1030   :  { %v2503_v15 = vmul.f32 %v2061_v49, %v1290_v3 }
0x1032   :  { %v1369_v17 = vpack.c.bf16 %v2503_v15, %v2503_v15 }
0x1034   :  { %1375 = vrot.lane.b32.xlu1 %v1369_v17, %s2102_s4 }
0x108b   :  { %v1312_v18 = vpop.permute.xlu0 %1311 }
0x108c   :  { %1900 = vmatmul.mubr.msk.bf16.vlgmr.msra.gmra.mrb[32].mxu0 %vm69_vm1, %v1312_v18 }
0x108d   :  { %1915 = vmatprep.mubr.msk.bf16.mxu0 %vm2100_vm0, %v2098_v1  ;;  %1912 = vmatpush3.bf16.msra.mxu0 %v1966_v6 }
0x108e   :  { %1913 = vmatprep.subr.bf16.mxu0 %v2098_v1 }
0x10a6   :  { %v1376_v19 = vpop.permute.xlu1 %1375 }
0x10a7   :  { %1908 = vmatmul.mubr.msk.bf16.vlgmr.msra.gmra.mrb[32].mxu1 %vm69_vm1, %v1376_v19 }
0x10a8   :  { %1923 = vmatprep.mubr.msk.bf16.mxu1 %vm2100_vm0, %v2098_v1  ;;  %1920 = vmatpush3.bf16.msra.mxu1 %v1968_v58 }
0x10a9   :  { %1921 = vmatprep.subr.bf16.mxu1 %v2098_v1 }
0x115f   :  { %v1362_v22 = vpop.f32.mrb[32].mxu0 }
0x1160   :  { %v1368_v23 = vadd.f32 %v1362_v22, %v2225_v0  ;;  %v1901_v24 = vpop.f32.mrb[33].mxu0 }
0x1161   :  { %v1365_v27 = vpop.f32.mrb[34].mxu0 }
0x1162   :  { %2066 = vtanh.f32 %v1368_v23  ;;  %v1902_v28 = vpop.f32.mrb[35].mxu0  ;;  %v1433_v45 = vsub.f32 0.0, %v1368_v23 }
0x1164   :  { %v1434_v47 = vmul.f32 1.442695, %v1433_v45 }
0x116c   :  { %v2067_v29 = vpop.eup %2066 }
0x116d   :  { %1442 = vrot.lane.b32.xlu0 %v2067_v29, %s2101_s0 }
0x117a   :  { %v1426_v31 = vpop.f32.mrb[32].mxu1 }
0x117b   :  { %v1432_v34 = vadd.f32 %v1426_v31, %v2206_v40  ;;  %v1909_v35 = vpop.f32.mrb[33].mxu1 }
0x117c   :  { %v1429_v39 = vpop.f32.mrb[34].mxu1 }
0x117d   :  { %2068 = vtanh.f32 %v1432_v34  ;;  %v1910_v42 = vpop.f32.mrb[35].mxu1  ;;  %v1457_v50 = vsub.f32 0.0, %v1432_v34 }
0x117e   :  { %2070 = vpow2.f32 %v1434_v47 }
0x117f   :  { %v1458_v51 = vmul.f32 1.442695, %v1457_v50 }
0x1187   :  { %v2069_v44 = vpop.eup %2068 }
0x1188   :  { %1466 = vrot.lane.b32.xlu1 %v2069_v44, %s2101_s0  ;;  %v2071_v0 = vpop.eup %2070 }
0x1189   :  { %v1436_v48 = vadd.f32 1.0, %v2071_v0 }
0x118b   :  { %2072 = vrcp.f32 %v1436_v48 }
0x118c   :  { %2074 = vpow2.f32 %v1458_v51 }
0x1195   :  { %v2073_v60 = vpop.eup %2072 }
0x1196   :  { %v2075_v40 = vpop.eup %2074  ;;  %v1440_v46 = vmul.f32 %v2073_v60, %v2473_v43  ;;  %v1967_v43 = vld [vmem:[%s2661_s2 + $0x8] sm:$0xff]  }
0x1197   :  { %v1460_v55 = vadd.f32 1.0, %v2075_v40  ;;  %1914 = vmatpush3.bf16.msra.mxu0 %v1967_v43 }
0x1199   :  { %2076 = vrcp.f32 %v1460_v55 }
0x11a3   :  { %v2077_v56 = vpop.eup %2076 }
0x11a4   :  { %v1464_v2 = vmul.f32 %v2077_v56, %v2478_v8  ;;  %v1969_v8 = vld [vmem:[%s2663_s3 + $0x8] sm:$0xff]  }
0x11a5   :  { %1922 = vmatpush3.bf16.msra.mxu1 %v1969_v8 }
0x11df   :  { %v1443_v53 = vpop.permute.xlu0 %1442 }
0x11e0   :  { %v1445_v54 = vmul.f32 %v2073_v60, %v1443_v53 }
0x11e2   :  { %1447 = vrot.lane.b32.xlu0 %v1445_v54, %s2102_s4 }
0x11fa   :  { %v1467_v57 = vpop.permute.xlu1 %1466 }
0x11fb   :  { %v1469_v59 = vmul.f32 %v2077_v56, %v1467_v57 }
0x11fd   :  { %1471 = vrot.lane.b32.xlu1 %v1469_v59, %s2102_s4 }
0x1254   :  { %v1448_v61 = vpop.permute.xlu0 %1447 }
0x1255   :  { %v2521_v49 = vadd.f32 %v1448_v61, %v1440_v46 }
0x1257   :  { %2078 = vtanh.f32 %v2521_v49 }
0x1261   :  { %v2079_v63 = vpop.eup %2078 }
0x1262   :  { %1453 = vrot.lane.b32.xlu0 %v2079_v63, %s2101_s0 }
0x126f   :  { %v1472_v52 = vpop.permute.xlu1 %1471 }
0x1270   :  { %v2526_v4 = vadd.f32 %v1472_v52, %v1464_v2 }
0x1272   :  { %2080 = vtanh.f32 %v2526_v4 }
0x127c   :  { %v2081_v7 = vpop.eup %2080 }
0x127d   :  { %1477 = vrot.lane.b32.xlu1 %v2081_v7, %s2101_s0 }
0x12d4   :  { %v1454_v9 = vpop.permute.xlu0 %1453 }
0x12d5   :  { %v2544_v36 = vmul.f32 %v2073_v60, %v1454_v9 }
0x12d7   :  { %v1493_v10 = vpack.c.bf16 %v2544_v36, %v2544_v36 }
0x12d9   :  { %1499 = vrot.lane.b32.xlu0 %v1493_v10, %s2102_s4 }
0x12ef   :  { %v1478_v62 = vpop.permute.xlu1 %1477 }
0x12f0   :  { %v2549_v11 = vmul.f32 %v2077_v56, %v1478_v62 }
0x12f2   :  { %v1557_v13 = vpack.c.bf16 %v2549_v11, %v2549_v11 }
0x12f4   :  { %1563 = vrot.lane.b32.xlu1 %v1557_v13, %s2102_s4 }
0x134b   :  { %v1500_v14 = vpop.permute.xlu0 %1499 }
0x134c   :  { %1916 = vmatmul.mubr.msk.bf16.vlgmr.msra.gmra.mrb[36].mxu0 %vm69_vm1, %v1500_v14 }
0x1366   :  { %v1564_v1 = vpop.permute.xlu1 %1563 }
0x1367   :  { %1924 = vmatmul.mubr.msk.bf16.vlgmr.msra.gmra.mrb[36].mxu1 %vm69_vm1, %v1564_v1 }
0x141f   :  { %v1550_v3 = vpop.f32.mrb[36].mxu0 }
0x1420   :  { %v1556_v17 = vadd.f32 %v1550_v3, %v2229_v5  ;;  %v1917_v18 = vpop.f32.mrb[37].mxu0 }
0x1421   :  { %v1553_v19 = vpop.f32.mrb[38].mxu0 }
0x1422   :  { %2082 = vtanh.f32 %v1556_v17  ;;  %v1918_v22 = vpop.f32.mrb[39].mxu0  ;;  %v1621_v35 = vsub.f32 0.0, %v1556_v17 }
0x1424   :  { %v1622_v39 = vmul.f32 1.442695, %v1621_v35 }
0x142c   :  { %v2083_v23 = vpop.eup %2082 }
0x142d   :  { %1630 = vrot.lane.b32.xlu0 %v2083_v23, %s2101_s0 }
0x143a   :  { %v1614_v24 = vpop.f32.mrb[36].mxu1 }
0x143b   :  { %v1620_v27 = vadd.f32 %v1614_v24, %v2202_v33  ;;  %v1925_v28 = vpop.f32.mrb[37].mxu1 }
0x143c   :  { %v1617_v29 = vpop.f32.mrb[38].mxu1 }
0x143d   :  { %2084 = vtanh.f32 %v1620_v27  ;;  %v1926_v31 = vpop.f32.mrb[39].mxu1  ;;  %v1645_v44 = vsub.f32 0.0, %v1620_v27 }
0x143e   :  { %2086 = vpow2.f32 %v1622_v39 }
0x143f   :  { %v1646_v45 = vmul.f32 1.442695, %v1645_v44 }
0x1447   :  { %v2085_v34 = vpop.eup %2084 }
0x1448   :  { %1654 = vrot.lane.b32.xlu1 %v2085_v34, %s2101_s0  ;;  %v2087_v5 = vpop.eup %2086 }
0x1449   :  { %v1624_v42 = vadd.f32 1.0, %v2087_v5 }
0x144b   :  { %2088 = vrcp.f32 %v1624_v42 }
0x144c   :  { %2090 = vpow2.f32 %v1646_v45 }
0x1455   :  { %v2089_v47 = vpop.eup %2088 }
0x1456   :  { %v2091_v33 = vpop.eup %2090  ;;  %v1628_v54 = vmul.f32 %v2089_v47, %v2521_v49 }
0x1457   :  { %v1648_v50 = vadd.f32 1.0, %v2091_v33 }
0x1459   :  { %2092 = vrcp.f32 %v1648_v50 }
0x1463   :  { %v2093_v51 = vpop.eup %2092 }
0x1464   :  { %v1652_v57 = vmul.f32 %v2093_v51, %v2526_v4 }
0x149f   :  { %v1631_v0 = vpop.permute.xlu0 %1630 }
0x14a0   :  { %v1633_v48 = vmul.f32 %v2089_v47, %v1631_v0 }
0x14a2   :  { %1635 = vrot.lane.b32.xlu0 %v1633_v48, %s2102_s4 }
0x14ba   :  { %v1655_v60 = vpop.permute.xlu1 %1654 }
0x14bb   :  { %v1657_v53 = vmul.f32 %v2093_v51, %v1655_v60 }
0x14bd   :  { %1659 = vrot.lane.b32.xlu1 %v1657_v53, %s2102_s4 }
0x1514   :  { %v1636_v40 = vpop.permute.xlu0 %1635 }
0x1515   :  { %v1638_v55 = vadd.f32 %v1636_v40, %v1628_v54 }
0x1517   :  { %2094 = vtanh.f32 %v1638_v55 }
0x1521   :  { %v2095_v56 = vpop.eup %2094 }
0x1522   :  { %1641 = vrot.lane.b32.xlu0 %v2095_v56, %s2101_s0 }
0x1526   :  { %340 = vrot.lane.b32.xlu0 %v2250_v37, %s2102_s4 }
0x152a   :  { %532 = vrot.lane.b32.xlu0 %v2306_v32, %s2102_s4 }
0x152e   :  { %724 = vrot.lane.b32.xlu0 %v2354_v26, %s2102_s4 }
0x152f   :  { %v1660_v59 = vpop.permute.xlu1 %1659 }
0x1530   :  { %v1662_v46 = vadd.f32 %v1660_v59, %v1652_v57 }
0x1532   :  { %2096 = vtanh.f32 %v1662_v46  ;;  %916 = vrot.lane.b32.xlu0 %v2402_v21, %s2102_s4 }
0x1536   :  { %1106 = vrot.lane.b32.xlu0 %v2450_v16, %s2102_s4 }
0x153a   :  { %1294 = vrot.lane.b32.xlu0 %v2498_v12, %s2102_s4 }
0x153c   :  { %v2097_v37 = vpop.eup %2096 }
0x153d   :  { %1665 = vrot.lane.b32.xlu1 %v2097_v37, %s2101_s0 }
0x153e   :  { %1482 = vrot.lane.b32.xlu0 %v2544_v36, %s2102_s4 }
0x1541   :  { %345 = vrot.lane.b32.xlu1 %v2255_v41, %s2101_s0 }
0x1545   :  { %538 = vrot.lane.b32.xlu1 %v2311_v38, %s2101_s0 }
0x1549   :  { %730 = vrot.lane.b32.xlu1 %v2359_v30, %s2101_s0 }
0x154d   :  { %922 = vrot.lane.b32.xlu1 %v2407_v25, %s2101_s0 }
0x1551   :  { %1111 = vrot.lane.b32.xlu1 %v2455_v20, %s2101_s0 }
0x1555   :  { %1299 = vrot.lane.b32.xlu1 %v2503_v15, %s2101_s0 }
0x1559   :  { %1487 = vrot.lane.b32.xlu1 %v2549_v11, %s2101_s0 }
0x1594   :  { %v1642_v32 = vpop.permute.xlu0 %1641 }
0x1595   :  { %v1644_v41 = vmul.f32 %v2089_v47, %v1642_v32 }
0x1597   :  { %1670 = vrot.lane.b32.xlu0 %v1644_v41, %s2102_s4 }
0x1598   :  { %v341_v38 = vpop.permute.xlu0 %340 }
0x1599   :  { %343 = vst.msk [vmem:[%s2665_s5] sm:$0xff] %vm69_vm1, %v341_v38 }
0x159c   :  { %v533_v26 = vpop.permute.xlu0 %532 }
0x159d   :  { %1702 = vst.msk [vmem:[%s2665_s5 + $0x8] sm:$0xff] %vm69_vm1, %v533_v26 }
0x15a0   :  { %v725_v30 = vpop.permute.xlu0 %724 }
0x15a1   :  { %1710 = vst.msk [vmem:[%s2665_s5 + $0x10] sm:$0xff] %vm69_vm1, %v725_v30 }
0x15a4   :  { %v917_v21 = vpop.permute.xlu0 %916 }
0x15a5   :  { %1718 = vst.msk [vmem:[%s2665_s5 + $0x18] sm:$0xff] %vm69_vm1, %v917_v21 }
0x15a8   :  { %v1107_v25 = vpop.permute.xlu0 %1106 }
0x15ac   :  { %v1295_v12 = vpop.permute.xlu0 %1294 }
0x15af   :  { %v1666_v16 = vpop.permute.xlu1 %1665 }
0x15b0   :  { %v1668_v20 = vmul.f32 %v2093_v51, %v1666_v16  ;;  %v1483_v49 = vpop.permute.xlu0 %1482 }
0x15b2   :  { %1675 = vrot.lane.b32.xlu1 %v1668_v20, %s2101_s0 }
0x15b3   :  { %v346_v15 = vpop.permute.xlu1 %345 }
0x15b4   :  { %1695 = vst.msk [vmem:[%s2665_s5 + $0x38] sm:$0xff] %vm349_vm2, %v346_v15 }
0x15b7   :  { %v539_v61 = vpop.permute.xlu1 %538 }
0x15b8   :  { %1703 = vst.msk [vmem:[%s2665_s5 + $0x30] sm:$0xff] %vm349_vm2, %v539_v61 }
0x15b9   :  { %1742 = vst.msk [vmem:[%s2665_s5 + $0x30] sm:$0xff] %vm69_vm1, %v1483_v49 }
0x15bb   :  { %v731_v63 = vpop.permute.xlu1 %730 }
0x15bc   :  { %1711 = vst.msk [vmem:[%s2665_s5 + $0x28] sm:$0xff] %vm349_vm2, %v731_v63 }
0x15bd   :  { %1734 = vst.msk [vmem:[%s2665_s5 + $0x28] sm:$0xff] %vm69_vm1, %v1295_v12 }
0x15bf   :  { %v923_v2 = vpop.permute.xlu1 %922 }
0x15c0   :  { %1719 = vst.msk [vmem:[%s2665_s5 + $0x20] sm:$0xff] %vm349_vm2, %v923_v2 }
0x15c1   :  { %1726 = vst.msk [vmem:[%s2665_s5 + $0x20] sm:$0xff] %vm69_vm1, %v1107_v25 }
0x15c3   :  { %v1112_v52 = vpop.permute.xlu1 %1111 }
0x15c4   :  { %1727 = vst.msk [vmem:[%s2665_s5 + $0x18] sm:$0xff] %vm349_vm2, %v1112_v52 }
0x15c7   :  { %v1300_v4 = vpop.permute.xlu1 %1299 }
0x15c8   :  { %1735 = vst.msk [vmem:[%s2665_s5 + $0x10] sm:$0xff] %vm349_vm2, %v1300_v4 }
0x15cb   :  { %v1488_v6 = vpop.permute.xlu1 %1487 }
0x15cc   :  { %1743 = vst.msk [vmem:[%s2665_s5 + $0x8] sm:$0xff] %vm349_vm2, %v1488_v6 }
0x1609   :  { %v1671_v43 = vpop.permute.xlu0 %1670 }
0x160a   :  { %1750 = vst.msk [vmem:[%s2665_s5 + $0x38] sm:$0xff] %vm69_vm1, %v1671_v43 }
0x1624   :  { %v1676_v7 = vpop.permute.xlu1 %1675 }
0x1625   :  { %1678 = vst.msk [vmem:[%s2665_s5] sm:$0xff] %vm349_vm2, %v1676_v7 }

// kernel: birnn_forward.3
= control target key start
LH: loop header
LB: loop body
LE: loop exit
PB: predicated region body
PF: predicated region fallthrough
CT: control target
= control target key end

     0   :  { %v2133_v1 = vmov 0.0   ;;  %v2134_v2 = vmov 0   ;;  %vm2135_vm0 = vmmov 0   ;;  %vm93_vm1 = vcmask 523264   ;;  %s2707_s1 = inlined_call_operand.vmem [shape: bf16[64,256], index: 1, kind: input, shape index: {}]   ;;  %s2708_s2 = inlined_call_operand.vmem [shape: bf16[32,128], index: 2, kind: input, shape index: {}]   ;;  %s2709_s3 = inlined_call_operand.vmem [shape: bf16[32,128], index: 3, kind: input, shape index: {}]   ;;  %s2710_s0 = inlined_call_operand.vmem [shape: f32[8,8,64], index: 0, kind: input, shape index: {}]   ;;  %s2711_s4 = inlined_call_operand.vmem [shape: f32[1,256], index: 4, kind: input, shape index: {}]   ;;  %s2712_s5 = inlined_call_operand.vmem [shape: f32[8,8,64], index: 5, kind: output, shape index: {}]  }
   0x1   :  { %v1961_v0 = vld [vmem:[%s2707_s1 + $0x4] ss:$8 sps:$4 sm:$0xff]   ;;  %1828 = vmatprep.subr.bf16.mxu1 %v2133_v1  ;;  %138 = vmatprep.mubr.bf16.mxu0 %v2134_v2  ;;  %v1963_v3 = vld [vmem:[%s2707_s1] ss:$8 sps:$4 sm:$0xff]   ;;  %v1964_v4 = vld [vmem:[%s2707_s1 + $0x14] ss:$8 sps:$4 sm:$0xff]   ;;  %v43_v26 = vlaneseq }
   0x2   :  { %1832 = vmatprep.mubr.msk.bf16.mxu1 %vm2135_vm0, %v2133_v1  ;;  %106 = vmatprep.subr.bf16.mxu0 %v1961_v0  ;;  %v1966_v5 = vld [vmem:[%s2707_s1 + $0x10] ss:$8 sps:$4 sm:$0xff]   ;;  %v1967_v6 = vld [vmem:[%s2707_s1 + $0x24] ss:$8 sps:$4 sm:$0xff]   ;;  %v1969_v8 = vld [vmem:[%s2707_s1 + $0x20] ss:$8 sps:$4 sm:$0xff]  }
   0x3   :  { %107 = vmatpush1.bf16.msra.mxu0 %v1963_v3  ;;  %v1970_v7 = vld [vmem:[%s2708_s2] sm:$0xff]   ;;  %v1974_v9 = vld [vmem:[%s2708_s2 + $0x8] sm:$0xff]   ;;  %v1971_v10 = vld [vmem:[%s2707_s1 + $0x34] ss:$8 sps:$4 sm:$0xff]   ;;  %v44_v27 = vshrl.u32 %v43_v26, 7  ;;  %vm214_vm2 = vcmask 261120  }
   0x4   :  { %108 = vmatprep.subr.bf16.mxu0 %v1964_v4  ;;  %1829 = vmatpush3.bf16.msra.mxu1 %v1970_v7  ;;  %v1975_v11 = vld [vmem:[%s2709_s3] sm:$0xff]   ;;  %v1973_v12 = vld [vmem:[%s2707_s1 + $0x30] ss:$8 sps:$4 sm:$0xff]   ;;  %v22_v14 = vld [vmem:[%s2710_s0 + $0x8] sm:$0xff]  ;;  %vm374_vm3 = vcmask 523520  }
   0x5   :  { %1830 = vmatprep.subr.bf16.mxu1 %v2133_v1  ;;  %v21_v13 = vld [vmem:[%s2710_s0] sm:$0xff]  ;;  %v1976_v15 = vld [vmem:[%s2709_s3 + $0x8] sm:$0xff]   ;;  %v23_v17 = vld [vmem:[%s2710_s0 + $0x10] sm:$0xff]  ;;  %v45_v28 = vsub.s32 0, %v44_v27  ;;  %v49_v30 = vsub.s32 1, %v44_v27 }
   0x6   :  { %v29_v16 = vpack.c.bf16 %v22_v14, %v21_v13  ;;  %v24_v18 = vld [vmem:[%s2710_s0 + $0x18] sm:$0xff]  ;;  %v25_v20 = vld [vmem:[%s2710_s0 + $0x20] sm:$0xff]  ;;  %v26_v21 = vld [vmem:[%s2710_s0 + $0x28] sm:$0xff] }
   0x7   :  { %109 = vmatpush1.bf16.msra.mxu0 %v1966_v5  ;;  %v30_v19 = vpack.c.bf16 %v24_v18, %v23_v17  ;;  %v31_v22 = vpack.c.bf16 %v26_v21, %v25_v20  ;;  %v27_v23 = vld [vmem:[%s2710_s0 + $0x30] sm:$0xff]  ;;  %v28_v24 = vld [vmem:[%s2710_s0 + $0x38] sm:$0xff]  ;;  %v41_v29 = vld [vmem:[%s2711_s4] sm:$0x3]  ;;  %s2136_s0 = smov 64   ;;  %s2137_s4 = smov 32  }
   0x8   :  { %110 = vmatprep.subr.bf16.mxu0 %v1967_v6  ;;  %1831 = vmatpush3.bf16.msra.mxu1 %v1974_v9  ;;  %v32_v25 = vpack.c.bf16 %v28_v24, %v27_v23  ;;  %v46_v33 = vrot.slane %v41_v29, %v45_v28  ;;  %v50_v35 = vrot.slane %v41_v29, %v49_v30 }
   0x9   :  { %1836 = vmatprep.subr.bf16.mxu1 %v2133_v1 }
   0xb   :  { %111 = vmatpush1.bf16.msra.mxu0 %v1969_v8  ;;  %1833 = vmatmul.mubr.bf16.vlgmr.msra.gmra.mrb[0].mxu1 %v2134_v2 }
   0xc   :  { %112 = vmatprep.subr.bf16.mxu0 %v1971_v10  ;;  %1837 = vmatpush3.bf16.msra.mxu1 %v1975_v11 }
   0xd   :  { %1840 = vmatprep.mubr.msk.bf16.mxu1 %vm2135_vm0, %v2133_v1  ;;  %1838 = vmatprep.subr.bf16.mxu1 %v2133_v1 }
   0xf   :  { %113 = vmatpush1.bf16.msra.mxu0 %v1973_v12 }
  0x10   :  { %1868 = vmatprep.subr.bf16.mxu0 %v2133_v1  ;;  %1839 = vmatpush3.bf16.msra.mxu1 %v1976_v15 }
  0x11   :  { %1844 = vmatprep.subr.bf16.mxu1 %v2133_v1 }
  0x12   :  { %1716 = vmatmul.mubr.msk.bf16.vlgmr.msra.gmra.mrb[0].mxu0 %vm93_vm1, %v29_v16 }
  0x13   :  { %148 = vmatprep.mubr.bf16.mxu0 %v2134_v2  ;;  %1841 = vmatmul.mubr.bf16.vlgmr.msra.gmra.mrb[4].mxu1 %v2134_v2 }
  0x14   :  { %1848 = vmatprep.mubr.msk.bf16.mxu1 %vm2135_vm0, %v2133_v1 }
  0x1a   :  { %1717 = vmatmul.mubr.msk.bf16.gmra.mrb[4].mxu0 %vm93_vm1, %v30_v19 }
  0x1b   :  { %158 = vmatprep.mubr.bf16.mxu0 %v2134_v2 }
  0x22   :  { %1718 = vmatmul.mubr.msk.bf16.gmra.mrb[8].mxu0 %vm93_vm1, %v31_v22 }
  0x23   :  { %168 = vmatprep.mubr.bf16.mxu0 %v2134_v2 }
  0x2a   :  { %1719 = vmatmul.mubr.msk.bf16.gmra.mrb[12].mxu0 %vm93_vm1, %v32_v25 }
  0x2b   :  { %1872 = vmatprep.mubr.msk.bf16.mxu0 %vm2135_vm0, %v2133_v1 }
  0xde   :  { %v252_v31 = vpop.f32.mrb[0].mxu1 }
  0xdf   :  { %v1834_v32 = vpop.f32.mrb[1].mxu1 }
  0xe0   :  { %v255_v34 = vpop.f32.mrb[2].mxu1 }
  0xe1   :  { %v1835_v36 = vpop.f32.mrb[3].mxu1 }
  0xe2   :  { %v1978_v36 = vld [vmem:[%s2708_s2 + $0x8] sm:$0xff]  }
  0xe5   :  { %v140_v37 = vpop.f32.mrb[0].mxu0 }
  0xe6   :  { %v141_v38 = vadd.f32 %v140_v37, %v46_v33  ;;  %v142_v39 = vpop.f32.mrb[1].mxu0  ;;  %v309_v45 = vpop.f32.mrb[4].mxu1 }
  0xe7   :  { %v2249_v40 = vadd.f32 %v142_v39, %v50_v35  ;;  %v144_v41 = vpop.f32.mrb[2].mxu0  ;;  %v1842_v47 = vpop.f32.mrb[5].mxu1 }
  0xe8   :  { %v2251_v42 = vadd.f32 %v144_v41, %v46_v33  ;;  %v258_v43 = vadd.f32 %v252_v31, %v141_v38  ;;  %v146_v44 = vpop.f32.mrb[3].mxu0  ;;  %v312_v48 = vpop.f32.mrb[6].mxu1  ;;  %v1979_v47 = vld [vmem:[%s2709_s3] sm:$0xff]  }
  0xe9   :  { %v2253_v46 = vadd.f32 %v146_v44, %v50_v35  ;;  %v1843_v49 = vpop.f32.mrb[7].mxu1 }
  0xea   :  { %2005 = vtanh.f32 %v258_v43  ;;  %v316_v14 = vsub.f32 0.0, %v258_v43  ;;  %v1980_v49 = vld [vmem:[%s2709_s3 + $0x8] sm:$0xff]  }
  0xec   :  { %v317_v15 = vmul.f32 1.442695, %v316_v14 }
  0xed   :  { %v150_v50 = vpop.f32.mrb[4].mxu0 }
  0xee   :  { %v2255_v51 = vadd.f32 %v150_v50, %v46_v33  ;;  %v152_v52 = vpop.f32.mrb[5].mxu0 }
  0xef   :  { %v2257_v53 = vadd.f32 %v152_v52, %v50_v35  ;;  %v154_v54 = vpop.f32.mrb[6].mxu0 }
  0xf0   :  { %v2259_v55 = vadd.f32 %v154_v54, %v46_v33  ;;  %v156_v56 = vpop.f32.mrb[7].mxu0 }
  0xf1   :  { %v2261_v57 = vadd.f32 %v156_v56, %v50_v35 }
  0xf4   :  { %v2006_v58 = vpop.eup %2005 }
  0xf5   :  { %v160_v59 = vpop.f32.mrb[8].mxu0  ;;  %325 = vrot.lane.b32.xlu0 %v2006_v58, %s2136_s0 }
  0xf6   :  { %v2264_v60 = vadd.f32 %v160_v59, %v46_v33  ;;  %v162_v61 = vpop.f32.mrb[9].mxu0 }
  0xf7   :  { %v2266_v62 = vadd.f32 %v162_v61, %v50_v35  ;;  %v164_v63 = vpop.f32.mrb[10].mxu0 }
  0xf8   :  { %v2268_v0 = vadd.f32 %v164_v63, %v46_v33  ;;  %v166_v2 = vpop.f32.mrb[11].mxu0 }
  0xf9   :  { %v2270_v3 = vadd.f32 %v166_v2, %v50_v35 }
  0xfd   :  { %v170_v4 = vpop.f32.mrb[12].mxu0 }
  0xfe   :  { %v2272_v5 = vadd.f32 %v170_v4, %v46_v33  ;;  %v172_v6 = vpop.f32.mrb[13].mxu0 }
  0xff   :  { %v2274_v7 = vadd.f32 %v172_v6, %v50_v35  ;;  %v174_v8 = vpop.f32.mrb[14].mxu0 }
 0x100   :  { %v2276_v9 = vadd.f32 %v174_v8, %v46_v33  ;;  %v176_v10 = vpop.f32.mrb[15].mxu0 }
 0x101   :  { %v177_v11 = vadd.f32 %v176_v10, %v50_v35  ;;  %v1977_v35 = vld [vmem:[%s2708_s2] sm:$0xff]  }
 0x102   :  { %1845 = vmatpush3.bf16.msra.mxu1 %v1977_v35 }
 0x103   :  { %v315_v12 = vadd.f32 %v309_v45, %v177_v11  ;;  %1846 = vmatprep.subr.bf16.mxu1 %v2133_v1 }
 0x105   :  { %2007 = vtanh.f32 %v315_v12  ;;  %v340_v18 = vsub.f32 0.0, %v315_v12 }
 0x106   :  { %2009 = vpow2.f32 %v317_v15  ;;  %1847 = vmatpush3.bf16.msra.mxu1 %v1978_v36 }
 0x107   :  { %v341_v19 = vmul.f32 1.442695, %v340_v18  ;;  %1852 = vmatprep.subr.bf16.mxu1 %v2133_v1 }
 0x10f   :  { %v2008_v13 = vpop.eup %2007 }
 0x110   :  { %349 = vrot.lane.b32.xlu0 %v2008_v13, %s2136_s0  ;;  %v2010_v16 = vpop.eup %2009 }
 0x111   :  { %v319_v17 = vadd.f32 1.0, %v2010_v16 }
 0x113   :  { %2011 = vrcp.f32 %v319_v17 }
 0x114   :  { %2013 = vpow2.f32 %v341_v19 }
 0x11d   :  { %v2012_v20 = vpop.eup %2011 }
 0x11e   :  { %v2014_v23 = vpop.eup %2013  ;;  %v323_v28 = vmul.f32 0.0, %v2012_v20 }
 0x11f   :  { %v343_v24 = vadd.f32 1.0, %v2014_v23 }
 0x121   :  { %2015 = vrcp.f32 %v343_v24 }
 0x12b   :  { %v2016_v25 = vpop.eup %2015 }
 0x12c   :  { %v347_v32 = vmul.f32 0.0, %v2016_v25 }
 0x167   :  { %v326_v21 = vpop.permute.xlu0 %325 }
 0x168   :  { %v328_v22 = vmul.f32 %v2012_v20, %v326_v21 }
 0x16a   :  { %330 = vrot.lane.b32.xlu1 %v328_v22, %s2137_s4 }
 0x182   :  { %v350_v26 = vpop.permute.xlu0 %349 }
 0x183   :  { %v352_v27 = vmul.f32 %v2016_v25, %v350_v26 }
 0x185   :  { %354 = vrot.lane.b32.xlu1 %v352_v27, %s2137_s4 }
 0x1dc   :  { %v331_v29 = vpop.permute.xlu1 %330 }
 0x1dd   :  { %v2281_v30 = vadd.f32 %v331_v29, %v323_v28 }
 0x1df   :  { %2017 = vtanh.f32 %v2281_v30 }
 0x1e9   :  { %v2018_v31 = vpop.eup %2017 }
 0x1ea   :  { %336 = vrot.lane.b32.xlu0 %v2018_v31, %s2136_s0  ;;  %v1981_v31 = vld [vmem:[%s2708_s2] sm:$0xff]  }
 0x1f7   :  { %v355_v33 = vpop.permute.xlu1 %354 }
 0x1f8   :  { %v2285_v34 = vadd.f32 %v355_v33, %v347_v32  ;;  %v1983_v32 = vld [vmem:[%s2708_s2 + $0x8] sm:$0xff]  }
 0x1fa   :  { %2019 = vtanh.f32 %v2285_v34 }
 0x204   :  { %v2020_v37 = vpop.eup %2019 }
 0x205   :  { %360 = vrot.lane.b32.xlu1 %v2020_v37, %s2136_s0 }
 0x25c   :  { %v337_v38 = vpop.permute.xlu0 %336 }
 0x25d   :  { %v2297_v39 = vmul.f32 %v2012_v20, %v337_v38 }
 0x25f   :  { %v380_v41 = vpack.c.bf16 %v2297_v39, %v2297_v39 }
 0x261   :  { %386 = vrot.lane.b32.xlu0 %v380_v41, %s2137_s4 }
 0x277   :  { %v361_v43 = vpop.permute.xlu1 %360 }
 0x278   :  { %v2302_v44 = vmul.f32 %v2016_v25, %v361_v43 }
 0x27a   :  { %v444_v45 = vpack.c.bf16 %v2302_v44, %v2302_v44 }
 0x27c   :  { %450 = vrot.lane.b32.xlu1 %v444_v45, %s2137_s4 }
 0x2d3   :  { %v387_v48 = vpop.permute.xlu0 %386 }
 0x2d4   :  { %1849 = vmatmul.mubr.msk.bf16.vlgmr.msra.gmra.mrb[8].mxu1 %vm214_vm2, %v387_v48 }
 0x2d5   :  { %1853 = vmatpush3.bf16.msra.mxu1 %v1979_v47  ;;  %1856 = vmatprep.mubr.msk.bf16.mxu1 %vm2135_vm0, %v2133_v1 }
 0x2d6   :  { %1854 = vmatprep.subr.bf16.mxu1 %v2133_v1 }
 0x2d9   :  { %1855 = vmatpush3.bf16.msra.mxu1 %v1980_v49 }
 0x2da   :  { %1860 = vmatprep.subr.bf16.mxu1 %v2133_v1 }
 0x2ee   :  { %v451_v50 = vpop.permute.xlu1 %450 }
 0x2ef   :  { %1857 = vmatmul.mubr.msk.bf16.vlgmr.msra.gmra.mrb[12].mxu1 %vm214_vm2, %v451_v50 }
 0x2f0   :  { %1864 = vmatprep.mubr.msk.bf16.mxu1 %vm2135_vm0, %v2133_v1  ;;  %1861 = vmatpush3.bf16.msra.mxu1 %v1981_v31 }
 0x2f1   :  { %1862 = vmatprep.subr.bf16.mxu1 %v2133_v1 }
 0x2f4   :  { %1863 = vmatpush3.bf16.msra.mxu1 %v1983_v32 }
 0x2f5   :  { %1876 = vmatprep.subr.bf16.mxu1 %v2133_v1 }
 0x3a7   :  { %v437_v52 = vpop.f32.mrb[8].mxu1 }
 0x3a8   :  { %v443_v54 = vadd.f32 %v437_v52, %v2251_v42  ;;  %v1850_v56 = vpop.f32.mrb[9].mxu1 }
 0x3a9   :  { %v440_v58 = vpop.f32.mrb[10].mxu1 }
 0x3aa   :  { %2021 = vtanh.f32 %v443_v54  ;;  %v1851_v59 = vpop.f32.mrb[11].mxu1  ;;  %v508_v11 = vsub.f32 0.0, %v443_v54 }
 0x3ac   :  { %v509_v12 = vmul.f32 1.442695, %v508_v11 }
 0x3b4   :  { %v2022_v61 = vpop.eup %2021 }
 0x3b5   :  { %517 = vrot.lane.b32.xlu0 %v2022_v61, %s2136_s0 }
 0x3c2   :  { %v501_v63 = vpop.f32.mrb[12].mxu1 }
 0x3c3   :  { %v507_v2 = vadd.f32 %v501_v63, %v2274_v7  ;;  %v1858_v4 = vpop.f32.mrb[13].mxu1 }
 0x3c4   :  { %v504_v6 = vpop.f32.mrb[14].mxu1 }
 0x3c5   :  { %2023 = vtanh.f32 %v507_v2  ;;  %v1859_v8 = vpop.f32.mrb[15].mxu1  ;;  %v532_v14 = vsub.f32 0.0, %v507_v2 }
 0x3c6   :  { %2025 = vpow2.f32 %v509_v12 }
 0x3c7   :  { %v533_v15 = vmul.f32 1.442695, %v532_v14 }
 0x3cf   :  { %v2024_v10 = vpop.eup %2023 }
 0x3d0   :  { %541 = vrot.lane.b32.xlu1 %v2024_v10, %s2136_s0  ;;  %v2026_v42 = vpop.eup %2025 }
 0x3d1   :  { %v511_v13 = vadd.f32 1.0, %v2026_v42 }
 0x3d3   :  { %2027 = vrcp.f32 %v511_v13 }
 0x3d4   :  { %2029 = vpow2.f32 %v533_v15 }
 0x3dd   :  { %v2028_v16 = vpop.eup %2027 }
 0x3de   :  { %v2030_v7 = vpop.eup %2029  ;;  %v515_v23 = vmul.f32 %v2028_v16, %v2281_v30  ;;  %v1982_v30 = vld [vmem:[%s2709_s3] sm:$0xff]  }
 0x3df   :  { %v535_v19 = vadd.f32 1.0, %v2030_v7  ;;  %1869 = vmatpush3.bf16.msra.mxu0 %v1982_v30 }
 0x3e0   :  { %1870 = vmatprep.subr.bf16.mxu0 %v2133_v1 }
 0x3e1   :  { %2031 = vrcp.f32 %v535_v19 }
 0x3eb   :  { %v2032_v20 = vpop.eup %2031 }
 0x3ec   :  { %v539_v27 = vmul.f32 %v2032_v20, %v2285_v34  ;;  %v1984_v34 = vld [vmem:[%s2709_s3 + $0x8] sm:$0xff]  }
 0x3ed   :  { %1871 = vmatpush3.bf16.msra.mxu0 %v1984_v34 }
 0x3ee   :  { %1884 = vmatprep.subr.bf16.mxu0 %v2133_v1 }
 0x427   :  { %v518_v17 = vpop.permute.xlu0 %517 }
 0x428   :  { %v520_v18 = vmul.f32 %v2028_v16, %v518_v17 }
 0x42a   :  { %522 = vrot.lane.b32.xlu0 %v520_v18, %s2137_s4 }
 0x442   :  { %v542_v21 = vpop.permute.xlu1 %541 }
 0x443   :  { %v544_v22 = vmul.f32 %v2032_v20, %v542_v21 }
 0x445   :  { %546 = vrot.lane.b32.xlu1 %v544_v22, %s2137_s4 }
 0x49c   :  { %v523_v24 = vpop.permute.xlu0 %522 }
 0x49d   :  { %v2328_v25 = vadd.f32 %v523_v24, %v515_v23 }
 0x49f   :  { %2033 = vtanh.f32 %v2328_v25 }
 0x4a9   :  { %v2034_v26 = vpop.eup %2033 }
 0x4aa   :  { %528 = vrot.lane.b32.xlu0 %v2034_v26, %s2136_s0  ;;  %v1985_v26 = vld [vmem:[%s2708_s2] sm:$0xff]  }
 0x4b7   :  { %v547_v28 = vpop.permute.xlu1 %546 }
 0x4b8   :  { %v2333_v29 = vadd.f32 %v547_v28, %v539_v27  ;;  %v1987_v28 = vld [vmem:[%s2709_s3] sm:$0xff]  }
 0x4ba   :  { %2035 = vtanh.f32 %v2333_v29 }
 0x4c4   :  { %v2036_v33 = vpop.eup %2035 }
 0x4c5   :  { %552 = vrot.lane.b32.xlu1 %v2036_v33, %s2136_s0 }
 0x51c   :  { %v529_v35 = vpop.permute.xlu0 %528 }
 0x51d   :  { %v2353_v36 = vmul.f32 %v2028_v16, %v529_v35 }
 0x51f   :  { %v572_v37 = vpack.c.bf16 %v2353_v36, %v2353_v36 }
 0x521   :  { %578 = vrot.lane.b32.xlu0 %v572_v37, %s2137_s4 }
 0x537   :  { %v553_v38 = vpop.permute.xlu1 %552 }
 0x538   :  { %v2358_v41 = vmul.f32 %v2032_v20, %v553_v38 }
 0x53a   :  { %v636_v43 = vpack.c.bf16 %v2358_v41, %v2358_v41 }
 0x53c   :  { %642 = vrot.lane.b32.xlu1 %v636_v43, %s2137_s4 }
 0x593   :  { %v579_v45 = vpop.permute.xlu0 %578 }
 0x594   :  { %1865 = vmatmul.mubr.msk.bf16.vlgmr.msra.gmra.mrb[16].mxu1 %vm214_vm2, %v579_v45 }
 0x595   :  { %1880 = vmatprep.mubr.msk.bf16.mxu1 %vm2135_vm0, %v2133_v1  ;;  %1877 = vmatpush3.bf16.msra.mxu1 %v1985_v26 }
 0x596   :  { %1878 = vmatprep.subr.bf16.mxu1 %v2133_v1 }
 0x5ae   :  { %v643_v47 = vpop.permute.xlu1 %642 }
 0x5af   :  { %1873 = vmatmul.mubr.msk.bf16.vlgmr.msra.gmra.mrb[16].mxu0 %vm214_vm2, %v643_v47 }
 0x5b0   :  { %1888 = vmatprep.mubr.msk.bf16.mxu0 %vm2135_vm0, %v2133_v1  ;;  %1885 = vmatpush3.bf16.msra.mxu0 %v1987_v28 }
 0x5b1   :  { %1886 = vmatprep.subr.bf16.mxu0 %v2133_v1 }
 0x667   :  { %v629_v48 = vpop.f32.mrb[16].mxu1 }
 0x668   :  { %v635_v49 = vadd.f32 %v629_v48, %v2255_v51  ;;  %v1866_v50 = vpop.f32.mrb[17].mxu1 }
 0x669   :  { %v632_v52 = vpop.f32.mrb[18].mxu1 }
 0x66a   :  { %2037 = vtanh.f32 %v635_v49  ;;  %v1867_v54 = vpop.f32.mrb[19].mxu1  ;;  %v700_v6 = vsub.f32 0.0, %v635_v49 }
 0x66c   :  { %v701_v8 = vmul.f32 1.442695, %v700_v6 }
 0x674   :  { %v2038_v56 = vpop.eup %2037 }
 0x675   :  { %709 = vrot.lane.b32.xlu0 %v2038_v56, %s2136_s0 }
 0x682   :  { %v693_v58 = vpop.f32.mrb[16].mxu0 }
 0x683   :  { %v699_v59 = vadd.f32 %v693_v58, %v2270_v3  ;;  %v1874_v61 = vpop.f32.mrb[17].mxu0 }
 0x684   :  { %v696_v63 = vpop.f32.mrb[18].mxu0 }
 0x685   :  { %2039 = vtanh.f32 %v699_v59  ;;  %v1875_v2 = vpop.f32.mrb[19].mxu0  ;;  %v724_v11 = vsub.f32 0.0, %v699_v59 }
 0x686   :  { %2041 = vpow2.f32 %v701_v8 }
 0x687   :  { %v725_v12 = vmul.f32 1.442695, %v724_v11 }
 0x68f   :  { %v2040_v4 = vpop.eup %2039 }
 0x690   :  { %733 = vrot.lane.b32.xlu1 %v2040_v4, %s2136_s0  ;;  %v2042_v51 = vpop.eup %2041 }
 0x691   :  { %v703_v10 = vadd.f32 1.0, %v2042_v51 }
 0x693   :  { %2043 = vrcp.f32 %v703_v10 }
 0x694   :  { %2045 = vpow2.f32 %v725_v12 }
 0x69d   :  { %v2044_v42 = vpop.eup %2043 }
 0x69e   :  { %v2046_v3 = vpop.eup %2045  ;;  %v707_v7 = vmul.f32 %v2044_v42, %v2328_v25  ;;  %v1986_v25 = vld [vmem:[%s2708_s2 + $0x8] sm:$0xff]  }
 0x69f   :  { %v727_v15 = vadd.f32 1.0, %v2046_v3  ;;  %1879 = vmatpush3.bf16.msra.mxu1 %v1986_v25 }
 0x6a0   :  { %1892 = vmatprep.subr.bf16.mxu1 %v2133_v1 }
 0x6a1   :  { %2047 = vrcp.f32 %v727_v15 }
 0x6ab   :  { %v2048_v16 = vpop.eup %2047 }
 0x6ac   :  { %v731_v22 = vmul.f32 %v2048_v16, %v2333_v29  ;;  %v1988_v29 = vld [vmem:[%s2709_s3 + $0x8] sm:$0xff]  }
 0x6ad   :  { %1887 = vmatpush3.bf16.msra.mxu0 %v1988_v29 }
 0x6ae   :  { %1900 = vmatprep.subr.bf16.mxu0 %v2133_v1 }
 0x6e7   :  { %v710_v13 = vpop.permute.xlu0 %709 }
 0x6e8   :  { %v712_v14 = vmul.f32 %v2044_v42, %v710_v13 }
 0x6ea   :  { %714 = vrot.lane.b32.xlu0 %v712_v14, %s2137_s4 }
 0x702   :  { %v734_v17 = vpop.permute.xlu1 %733 }
 0x703   :  { %v736_v18 = vmul.f32 %v2048_v16, %v734_v17 }
 0x705   :  { %738 = vrot.lane.b32.xlu1 %v736_v18, %s2137_s4 }
 0x75c   :  { %v715_v19 = vpop.permute.xlu0 %714 }
 0x75d   :  { %v2376_v20 = vadd.f32 %v715_v19, %v707_v7 }
 0x75f   :  { %2049 = vtanh.f32 %v2376_v20 }
 0x769   :  { %v2050_v21 = vpop.eup %2049 }
 0x76a   :  { %720 = vrot.lane.b32.xlu0 %v2050_v21, %s2136_s0  ;;  %v1989_v21 = vld [vmem:[%s2708_s2] sm:$0xff]  }
 0x777   :  { %v739_v23 = vpop.permute.xlu1 %738 }
 0x778   :  { %v2381_v24 = vadd.f32 %v739_v23, %v731_v22  ;;  %v1991_v23 = vld [vmem:[%s2709_s3] sm:$0xff]  }
 0x77a   :  { %2051 = vtanh.f32 %v2381_v24 }
 0x784   :  { %v2052_v27 = vpop.eup %2051 }
 0x785   :  { %744 = vrot.lane.b32.xlu1 %v2052_v27, %s2136_s0 }
 0x7dc   :  { %v721_v31 = vpop.permute.xlu0 %720 }
 0x7dd   :  { %v2401_v30 = vmul.f32 %v2044_v42, %v721_v31 }
 0x7df   :  { %v764_v32 = vpack.c.bf16 %v2401_v30, %v2401_v30 }
 0x7e1   :  { %770 = vrot.lane.b32.xlu0 %v764_v32, %s2137_s4 }
 0x7f7   :  { %v745_v33 = vpop.permute.xlu1 %744 }
 0x7f8   :  { %v2406_v34 = vmul.f32 %v2048_v16, %v745_v33 }
 0x7fa   :  { %v828_v35 = vpack.c.bf16 %v2406_v34, %v2406_v34 }
 0x7fc   :  { %834 = vrot.lane.b32.xlu1 %v828_v35, %s2137_s4 }
 0x853   :  { %v771_v37 = vpop.permute.xlu0 %770 }
 0x854   :  { %1881 = vmatmul.mubr.msk.bf16.vlgmr.msra.gmra.mrb[20].mxu1 %vm214_vm2, %v771_v37 }
 0x855   :  { %1896 = vmatprep.mubr.msk.bf16.mxu1 %vm2135_vm0, %v2133_v1  ;;  %1893 = vmatpush3.bf16.msra.mxu1 %v1989_v21 }
 0x856   :  { %1894 = vmatprep.subr.bf16.mxu1 %v2133_v1 }
 0x86e   :  { %v835_v38 = vpop.permute.xlu1 %834 }
 0x86f   :  { %1889 = vmatmul.mubr.msk.bf16.vlgmr.msra.gmra.mrb[20].mxu0 %vm214_vm2, %v835_v38 }
 0x870   :  { %1904 = vmatprep.mubr.msk.bf16.mxu0 %vm2135_vm0, %v2133_v1  ;;  %1901 = vmatpush3.bf16.msra.mxu0 %v1991_v23 }
 0x871   :  { %1902 = vmatprep.subr.bf16.mxu0 %v2133_v1 }
 0x927   :  { %v821_v43 = vpop.f32.mrb[20].mxu1 }
 0x928   :  { %v827_v45 = vadd.f32 %v821_v43, %v2259_v55  ;;  %v1882_v47 = vpop.f32.mrb[21].mxu1 }
 0x929   :  { %v824_v48 = vpop.f32.mrb[22].mxu1 }
 0x92a   :  { %2053 = vtanh.f32 %v827_v45  ;;  %v1883_v49 = vpop.f32.mrb[23].mxu1  ;;  %v892_v63 = vsub.f32 0.0, %v827_v45 }
 0x92c   :  { %v893_v2 = vmul.f32 1.442695, %v892_v63 }
 0x934   :  { %v2054_v50 = vpop.eup %2053 }
 0x935   :  { %901 = vrot.lane.b32.xlu0 %v2054_v50, %s2136_s0 }
 0x942   :  { %v885_v52 = vpop.f32.mrb[20].mxu0 }
 0x943   :  { %v891_v54 = vadd.f32 %v885_v52, %v2266_v62  ;;  %v1890_v56 = vpop.f32.mrb[21].mxu0 }
 0x944   :  { %v888_v58 = vpop.f32.mrb[22].mxu0 }
 0x945   :  { %2055 = vtanh.f32 %v891_v54  ;;  %v1891_v59 = vpop.f32.mrb[23].mxu0  ;;  %v916_v6 = vsub.f32 0.0, %v891_v54 }
 0x946   :  { %2057 = vpow2.f32 %v893_v2 }
 0x947   :  { %v917_v8 = vmul.f32 1.442695, %v916_v6 }
 0x94f   :  { %v2056_v61 = vpop.eup %2055 }
 0x950   :  { %925 = vrot.lane.b32.xlu1 %v2056_v61, %s2136_s0  ;;  %v2058_v55 = vpop.eup %2057 }
 0x951   :  { %v895_v4 = vadd.f32 1.0, %v2058_v55 }
 0x953   :  { %2059 = vrcp.f32 %v895_v4 }
 0x954   :  { %2061 = vpow2.f32 %v917_v8 }
 0x95d   :  { %v2060_v51 = vpop.eup %2059 }
 0x95e   :  { %v2062_v62 = vpop.eup %2061  ;;  %v899_v3 = vmul.f32 %v2060_v51, %v2376_v20  ;;  %v1990_v20 = vld [vmem:[%s2708_s2 + $0x8] sm:$0xff]  }
 0x95f   :  { %v919_v12 = vadd.f32 1.0, %v2062_v62  ;;  %1895 = vmatpush3.bf16.msra.mxu1 %v1990_v20 }
 0x960   :  { %1908 = vmatprep.subr.bf16.mxu1 %v2133_v1 }
 0x961   :  { %2063 = vrcp.f32 %v919_v12 }
 0x96b   :  { %v2064_v42 = vpop.eup %2063 }
 0x96c   :  { %v923_v18 = vmul.f32 %v2064_v42, %v2381_v24  ;;  %v1992_v24 = vld [vmem:[%s2709_s3 + $0x8] sm:$0xff]  }
 0x96d   :  { %1903 = vmatpush3.bf16.msra.mxu0 %v1992_v24 }
 0x96e   :  { %1916 = vmatprep.subr.bf16.mxu0 %v2133_v1 }
 0x9a7   :  { %v902_v10 = vpop.permute.xlu0 %901 }
 0x9a8   :  { %v904_v11 = vmul.f32 %v2060_v51, %v902_v10 }
 0x9aa   :  { %906 = vrot.lane.b32.xlu0 %v904_v11, %s2137_s4 }
 0x9c2   :  { %v926_v13 = vpop.permute.xlu1 %925 }
 0x9c3   :  { %v928_v14 = vmul.f32 %v2064_v42, %v926_v13 }
 0x9c5   :  { %930 = vrot.lane.b32.xlu1 %v928_v14, %s2137_s4 }
 0xa1c   :  { %v907_v15 = vpop.permute.xlu0 %906 }
 0xa1d   :  { %v2424_v16 = vadd.f32 %v907_v15, %v899_v3 }
 0xa1f   :  { %2065 = vtanh.f32 %v2424_v16 }
 0xa29   :  { %v2066_v17 = vpop.eup %2065 }
 0xa2a   :  { %912 = vrot.lane.b32.xlu0 %v2066_v17, %s2136_s0  ;;  %v1993_v17 = vld [vmem:[%s2708_s2] sm:$0xff]  }
 0xa37   :  { %v931_v7 = vpop.permute.xlu1 %930 }
 0xa38   :  { %v2429_v19 = vadd.f32 %v931_v7, %v923_v18  ;;  %v1995_v7 = vld [vmem:[%s2709_s3] sm:$0xff]  }
 0xa3a   :  { %2067 = vtanh.f32 %v2429_v19 }
 0xa44   :  { %v2068_v22 = vpop.eup %2067 }
 0xa45   :  { %936 = vrot.lane.b32.xlu1 %v2068_v22, %s2136_s0 }
 0xa9c   :  { %v913_v26 = vpop.permute.xlu0 %912 }
 0xa9d   :  { %v2449_v25 = vmul.f32 %v2060_v51, %v913_v26 }
 0xa9f   :  { %v954_v27 = vpack.c.bf16 %v2449_v25, %v2449_v25 }
 0xaa1   :  { %960 = vrot.lane.b32.xlu0 %v954_v27, %s2137_s4 }
 0xab7   :  { %v937_v28 = vpop.permute.xlu1 %936 }
 0xab8   :  { %v2454_v29 = vmul.f32 %v2064_v42, %v937_v28 }
 0xaba   :  { %v1018_v31 = vpack.c.bf16 %v2454_v29, %v2454_v29 }
 0xabc   :  { %1024 = vrot.lane.b32.xlu1 %v1018_v31, %s2137_s4 }
 0xb13   :  { %v961_v32 = vpop.permute.xlu0 %960 }
 0xb14   :  { %1897 = vmatmul.mubr.msk.bf16.vlgmr.msra.gmra.mrb[24].mxu1 %vm214_vm2, %v961_v32 }
 0xb15   :  { %1912 = vmatprep.mubr.msk.bf16.mxu1 %vm2135_vm0, %v2133_v1  ;;  %1909 = vmatpush3.bf16.msra.mxu1 %v1993_v17 }
 0xb16   :  { %1910 = vmatprep.subr.bf16.mxu1 %v2133_v1 }
 0xb2e   :  { %v1025_v33 = vpop.permute.xlu1 %1024 }
 0xb2f   :  { %1905 = vmatmul.mubr.msk.bf16.vlgmr.msra.gmra.mrb[24].mxu0 %vm214_vm2, %v1025_v33 }
 0xb30   :  { %1920 = vmatprep.mubr.msk.bf16.mxu0 %vm2135_vm0, %v2133_v1  ;;  %1917 = vmatpush3.bf16.msra.mxu0 %v1995_v7 }
 0xb31   :  { %1918 = vmatprep.subr.bf16.mxu0 %v2133_v1 }
 0xbe7   :  { %v1011_v35 = vpop.f32.mrb[24].mxu1 }
 0xbe8   :  { %v1017_v37 = vadd.f32 %v1011_v35, %v2264_v60  ;;  %v1898_v38 = vpop.f32.mrb[25].mxu1 }
 0xbe9   :  { %v1014_v43 = vpop.f32.mrb[26].mxu1 }
 0xbea   :  { %2069 = vtanh.f32 %v1017_v37  ;;  %v1899_v45 = vpop.f32.mrb[27].mxu1  ;;  %v1082_v58 = vsub.f32 0.0, %v1017_v37 }
 0xbec   :  { %v1083_v59 = vmul.f32 1.442695, %v1082_v58 }
 0xbf4   :  { %v2070_v47 = vpop.eup %2069 }
 0xbf5   :  { %1091 = vrot.lane.b32.xlu0 %v2070_v47, %s2136_s0 }
 0xc02   :  { %v1075_v48 = vpop.f32.mrb[24].mxu0 }
 0xc03   :  { %v1081_v49 = vadd.f32 %v1075_v48, %v2261_v57  ;;  %v1906_v50 = vpop.f32.mrb[25].mxu0 }
 0xc04   :  { %v1078_v52 = vpop.f32.mrb[26].mxu0 }
 0xc05   :  { %2071 = vtanh.f32 %v1081_v49  ;;  %v1907_v54 = vpop.f32.mrb[27].mxu0  ;;  %v1106_v63 = vsub.f32 0.0, %v1081_v49 }
 0xc06   :  { %2073 = vpow2.f32 %v1083_v59 }
 0xc07   :  { %v1107_v2 = vmul.f32 1.442695, %v1106_v63 }
 0xc0f   :  { %v2072_v56 = vpop.eup %2071 }
 0xc10   :  { %1115 = vrot.lane.b32.xlu1 %v2072_v56, %s2136_s0  ;;  %v2074_v60 = vpop.eup %2073 }
 0xc11   :  { %v1085_v61 = vadd.f32 1.0, %v2074_v60 }
 0xc13   :  { %2075 = vrcp.f32 %v1085_v61 }
 0xc14   :  { %2077 = vpow2.f32 %v1107_v2 }
 0xc1d   :  { %v2076_v55 = vpop.eup %2075 }
 0xc1e   :  { %v2078_v57 = vpop.eup %2077  ;;  %v1089_v62 = vmul.f32 %v2076_v55, %v2424_v16  ;;  %v1994_v16 = vld [vmem:[%s2708_s2 + $0x8] sm:$0xff]  }
 0xc1f   :  { %v1109_v8 = vadd.f32 1.0, %v2078_v57  ;;  %1911 = vmatpush3.bf16.msra.mxu1 %v1994_v16 }
 0xc20   :  { %1924 = vmatprep.subr.bf16.mxu1 %v2133_v1 }
 0xc21   :  { %2079 = vrcp.f32 %v1109_v8 }
 0xc2b   :  { %v2080_v51 = vpop.eup %2079 }
 0xc2c   :  { %v1113_v14 = vmul.f32 %v2080_v51, %v2429_v19  ;;  %v1996_v19 = vld [vmem:[%s2709_s3 + $0x8] sm:$0xff]  }
 0xc2d   :  { %1919 = vmatpush3.bf16.msra.mxu0 %v1996_v19 }
 0xc2e   :  { %1932 = vmatprep.subr.bf16.mxu0 %v2133_v1 }
 0xc67   :  { %v1092_v4 = vpop.permute.xlu0 %1091 }
 0xc68   :  { %v1094_v6 = vmul.f32 %v2076_v55, %v1092_v4 }
 0xc6a   :  { %1096 = vrot.lane.b32.xlu0 %v1094_v6, %s2137_s4 }
 0xc82   :  { %v1116_v10 = vpop.permute.xlu1 %1115 }
 0xc83   :  { %v1118_v11 = vmul.f32 %v2080_v51, %v1116_v10 }
 0xc85   :  { %1120 = vrot.lane.b32.xlu1 %v1118_v11, %s2137_s4 }
 0xcdc   :  { %v1097_v12 = vpop.permute.xlu0 %1096 }
 0xcdd   :  { %v2472_v42 = vadd.f32 %v1097_v12, %v1089_v62 }
 0xcdf   :  { %2081 = vtanh.f32 %v2472_v42 }
 0xce9   :  { %v2082_v13 = vpop.eup %2081 }
 0xcea   :  { %1102 = vrot.lane.b32.xlu0 %v2082_v13, %s2136_s0  ;;  %v1997_v13 = vld [vmem:[%s2708_s2] sm:$0xff]  }
 0xcf7   :  { %v1121_v3 = vpop.permute.xlu1 %1120 }
 0xcf8   :  { %v2477_v15 = vadd.f32 %v1121_v3, %v1113_v14  ;;  %v1999_v3 = vld [vmem:[%s2709_s3] sm:$0xff]  }
 0xcfa   :  { %2083 = vtanh.f32 %v2477_v15 }
 0xd04   :  { %v2084_v18 = vpop.eup %2083 }
 0xd05   :  { %1126 = vrot.lane.b32.xlu1 %v2084_v18, %s2136_s0 }
 0xd5c   :  { %v1103_v21 = vpop.permute.xlu0 %1102 }
 0xd5d   :  { %v2497_v20 = vmul.f32 %v2076_v55, %v1103_v21 }
 0xd5f   :  { %v1142_v22 = vpack.c.bf16 %v2497_v20, %v2497_v20 }
 0xd61   :  { %1148 = vrot.lane.b32.xlu0 %v1142_v22, %s2137_s4 }
 0xd77   :  { %v1127_v23 = vpop.permute.xlu1 %1126 }
 0xd78   :  { %v2502_v24 = vmul.f32 %v2080_v51, %v1127_v23 }
 0xd7a   :  { %v1206_v26 = vpack.c.bf16 %v2502_v24, %v2502_v24 }
 0xd7c   :  { %1212 = vrot.lane.b32.xlu1 %v1206_v26, %s2137_s4 }
 0xdd3   :  { %v1149_v27 = vpop.permute.xlu0 %1148 }
 0xdd4   :  { %1913 = vmatmul.mubr.msk.bf16.vlgmr.msra.gmra.mrb[28].mxu1 %vm214_vm2, %v1149_v27 }
 0xdd5   :  { %1928 = vmatprep.mubr.msk.bf16.mxu1 %vm2135_vm0, %v2133_v1  ;;  %1925 = vmatpush3.bf16.msra.mxu1 %v1997_v13 }
 0xdd6   :  { %1926 = vmatprep.subr.bf16.mxu1 %v2133_v1 }
 0xdee   :  { %v1213_v28 = vpop.permute.xlu1 %1212 }
 0xdef   :  { %1921 = vmatmul.mubr.msk.bf16.vlgmr.msra.gmra.mrb[28].mxu0 %vm214_vm2, %v1213_v28 }
 0xdf0   :  { %1936 = vmatprep.mubr.msk.bf16.mxu0 %vm2135_vm0, %v2133_v1  ;;  %1933 = vmatpush3.bf16.msra.mxu0 %v1999_v3 }
 0xdf1   :  { %1934 = vmatprep.subr.bf16.mxu0 %v2133_v1 }
 0xea7   :  { %v1199_v31 = vpop.f32.mrb[28].mxu1 }
 0xea8   :  { %v1205_v32 = vadd.f32 %v1199_v31, %v2268_v0  ;;  %v1914_v33 = vpop.f32.mrb[29].mxu1 }
 0xea9   :  { %v1202_v35 = vpop.f32.mrb[30].mxu1 }
 0xeaa   :  { %2085 = vtanh.f32 %v1205_v32  ;;  %v1915_v37 = vpop.f32.mrb[31].mxu1  ;;  %v1270_v52 = vsub.f32 0.0, %v1205_v32 }
 0xeac   :  { %v1271_v54 = vmul.f32 1.442695, %v1270_v52 }
 0xeb4   :  { %v2086_v38 = vpop.eup %2085 }
 0xeb5   :  { %1279 = vrot.lane.b32.xlu0 %v2086_v38, %s2136_s0 }
 0xec2   :  { %v1263_v43 = vpop.f32.mrb[28].mxu0 }
 0xec3   :  { %v1269_v45 = vadd.f32 %v1263_v43, %v2257_v53  ;;  %v1922_v47 = vpop.f32.mrb[29].mxu0 }
 0xec4   :  { %v1266_v48 = vpop.f32.mrb[30].mxu0 }
 0xec5   :  { %2087 = vtanh.f32 %v1269_v45  ;;  %v1923_v49 = vpop.f32.mrb[31].mxu0  ;;  %v1294_v58 = vsub.f32 0.0, %v1269_v45 }
 0xec6   :  { %2089 = vpow2.f32 %v1271_v54 }
 0xec7   :  { %v1295_v59 = vmul.f32 1.442695, %v1294_v58 }
 0xecf   :  { %v2088_v50 = vpop.eup %2087 }
 0xed0   :  { %1303 = vrot.lane.b32.xlu1 %v2088_v50, %s2136_s0  ;;  %v2090_v0 = vpop.eup %2089 }
 0xed1   :  { %v1273_v56 = vadd.f32 1.0, %v2090_v0 }
 0xed3   :  { %2091 = vrcp.f32 %v1273_v56 }
 0xed4   :  { %2093 = vpow2.f32 %v1295_v59 }
 0xedd   :  { %v2092_v60 = vpop.eup %2091 }
 0xede   :  { %v2094_v53 = vpop.eup %2093  ;;  %v1277_v57 = vmul.f32 %v2092_v60, %v2472_v42  ;;  %v1998_v42 = vld [vmem:[%s2708_s2 + $0x8] sm:$0xff]  }
 0xedf   :  { %v1297_v2 = vadd.f32 1.0, %v2094_v53  ;;  %1927 = vmatpush3.bf16.msra.mxu1 %v1998_v42 }
 0xee0   :  { %1940 = vmatprep.subr.bf16.mxu1 %v2133_v1 }
 0xee1   :  { %2095 = vrcp.f32 %v1297_v2 }
 0xeeb   :  { %v2096_v55 = vpop.eup %2095 }
 0xeec   :  { %v1301_v11 = vmul.f32 %v2096_v55, %v2477_v15  ;;  %v2000_v15 = vld [vmem:[%s2709_s3 + $0x8] sm:$0xff]  }
 0xeed   :  { %1935 = vmatpush3.bf16.msra.mxu0 %v2000_v15 }
 0xeee   :  { %1948 = vmatprep.subr.bf16.mxu0 %v2133_v1 }
 0xf27   :  { %v1280_v61 = vpop.permute.xlu0 %1279 }
 0xf28   :  { %v1282_v63 = vmul.f32 %v2092_v60, %v1280_v61 }
 0xf2a   :  { %1284 = vrot.lane.b32.xlu0 %v1282_v63, %s2137_s4 }
 0xf42   :  { %v1304_v4 = vpop.permute.xlu1 %1303 }
 0xf43   :  { %v1306_v6 = vmul.f32 %v2096_v55, %v1304_v4 }
 0xf45   :  { %1308 = vrot.lane.b32.xlu1 %v1306_v6, %s2137_s4 }
 0xf9c   :  { %v1285_v8 = vpop.permute.xlu0 %1284 }
 0xf9d   :  { %v2520_v51 = vadd.f32 %v1285_v8, %v1277_v57 }
 0xf9f   :  { %2097 = vtanh.f32 %v2520_v51 }
 0xfa9   :  { %v2098_v10 = vpop.eup %2097 }
 0xfaa   :  { %1290 = vrot.lane.b32.xlu0 %v2098_v10, %s2136_s0  ;;  %v2001_v10 = vld [vmem:[%s2708_s2] sm:$0xff]  }
 0xfb7   :  { %v1309_v62 = vpop.permute.xlu1 %1308 }
 0xfb8   :  { %v2525_v12 = vadd.f32 %v1309_v62, %v1301_v11  ;;  %v2003_v62 = vld [vmem:[%s2709_s3] sm:$0xff]  }
 0xfba   :  { %2099 = vtanh.f32 %v2525_v12 }
 0xfc4   :  { %v2100_v14 = vpop.eup %2099 }
 0xfc5   :  { %1314 = vrot.lane.b32.xlu1 %v2100_v14, %s2136_s0 }
0x101c   :  { %v1291_v17 = vpop.permute.xlu0 %1290 }
0x101d   :  { %v2545_v16 = vmul.f32 %v2092_v60, %v1291_v17 }
0x101f   :  { %v1330_v18 = vpack.c.bf16 %v2545_v16, %v2545_v16 }
0x1021   :  { %1336 = vrot.lane.b32.xlu0 %v1330_v18, %s2137_s4 }
0x1037   :  { %v1315_v7 = vpop.permute.xlu1 %1314 }
0x1038   :  { %v2550_v19 = vmul.f32 %v2096_v55, %v1315_v7 }
0x103a   :  { %v1394_v21 = vpack.c.bf16 %v2550_v19, %v2550_v19 }
0x103c   :  { %1400 = vrot.lane.b32.xlu1 %v1394_v21, %s2137_s4 }
0x1093   :  { %v1337_v22 = vpop.permute.xlu0 %1336 }
0x1094   :  { %1929 = vmatmul.mubr.msk.bf16.vlgmr.msra.gmra.mrb[32].mxu1 %vm214_vm2, %v1337_v22 }
0x1095   :  { %1944 = vmatprep.mubr.msk.bf16.mxu1 %vm2135_vm0, %v2133_v1  ;;  %1941 = vmatpush3.bf16.msra.mxu1 %v2001_v10 }
0x1096   :  { %1942 = vmatprep.subr.bf16.mxu1 %v2133_v1 }
0x10ae   :  { %v1401_v23 = vpop.permute.xlu1 %1400 }
0x10af   :  { %1937 = vmatmul.mubr.msk.bf16.vlgmr.msra.gmra.mrb[32].mxu0 %vm214_vm2, %v1401_v23 }
0x10b0   :  { %1952 = vmatprep.mubr.msk.bf16.mxu0 %vm2135_vm0, %v2133_v1  ;;  %1949 = vmatpush3.bf16.msra.mxu0 %v2003_v62 }
0x10b1   :  { %1950 = vmatprep.subr.bf16.mxu0 %v2133_v1 }
0x1167   :  { %v1387_v26 = vpop.f32.mrb[32].mxu1 }
0x1168   :  { %v1393_v27 = vadd.f32 %v1387_v26, %v2272_v5  ;;  %v1930_v28 = vpop.f32.mrb[33].mxu1 }
0x1169   :  { %v1390_v31 = vpop.f32.mrb[34].mxu1 }
0x116a   :  { %2101 = vtanh.f32 %v1393_v27  ;;  %v1931_v32 = vpop.f32.mrb[35].mxu1  ;;  %v1458_v48 = vsub.f32 0.0, %v1393_v27 }
0x116c   :  { %v1459_v49 = vmul.f32 1.442695, %v1458_v48 }
0x1174   :  { %v2102_v33 = vpop.eup %2101 }
0x1175   :  { %1467 = vrot.lane.b32.xlu0 %v2102_v33, %s2136_s0 }
0x1182   :  { %v1451_v35 = vpop.f32.mrb[32].mxu0 }
0x1183   :  { %v1457_v37 = vadd.f32 %v1451_v35, %v2253_v46  ;;  %v1938_v38 = vpop.f32.mrb[33].mxu0 }
0x1184   :  { %v1454_v43 = vpop.f32.mrb[34].mxu0 }
0x1185   :  { %2103 = vtanh.f32 %v1457_v37  ;;  %v1939_v45 = vpop.f32.mrb[35].mxu0  ;;  %v1482_v52 = vsub.f32 0.0, %v1457_v37 }
0x1186   :  { %2105 = vpow2.f32 %v1459_v49 }
0x1187   :  { %v1483_v54 = vmul.f32 1.442695, %v1482_v52 }
0x118f   :  { %v2104_v47 = vpop.eup %2103 }
0x1190   :  { %1491 = vrot.lane.b32.xlu1 %v2104_v47, %s2136_s0  ;;  %v2106_v5 = vpop.eup %2105 }
0x1191   :  { %v1461_v50 = vadd.f32 1.0, %v2106_v5 }
0x1193   :  { %2107 = vrcp.f32 %v1461_v50 }
0x1194   :  { %2109 = vpow2.f32 %v1483_v54 }
0x119d   :  { %v2108_v0 = vpop.eup %2107 }
0x119e   :  { %v2110_v46 = vpop.eup %2109  ;;  %v1465_v53 = vmul.f32 %v2108_v0, %v2520_v51  ;;  %v2002_v51 = vld [vmem:[%s2708_s2 + $0x8] sm:$0xff]  }
0x119f   :  { %v1485_v59 = vadd.f32 1.0, %v2110_v46  ;;  %1943 = vmatpush3.bf16.msra.mxu1 %v2002_v51 }
0x11a1   :  { %2111 = vrcp.f32 %v1485_v59 }
0x11ab   :  { %v2112_v60 = vpop.eup %2111 }
0x11ac   :  { %v1489_v6 = vmul.f32 %v2112_v60, %v2525_v12  ;;  %v2004_v12 = vld [vmem:[%s2709_s3 + $0x8] sm:$0xff]  }
0x11ad   :  { %1951 = vmatpush3.bf16.msra.mxu0 %v2004_v12 }
0x11e7   :  { %v1468_v56 = vpop.permute.xlu0 %1467 }
0x11e8   :  { %v1470_v58 = vmul.f32 %v2108_v0, %v1468_v56 }
0x11ea   :  { %1472 = vrot.lane.b32.xlu0 %v1470_v58, %s2137_s4 }
0x1202   :  { %v1492_v61 = vpop.permute.xlu1 %1491 }
0x1203   :  { %v1494_v63 = vmul.f32 %v2112_v60, %v1492_v61 }
0x1205   :  { %1496 = vrot.lane.b32.xlu1 %v1494_v63, %s2137_s4 }
0x125c   :  { %v1473_v2 = vpop.permute.xlu0 %1472 }
0x125d   :  { %v2568_v55 = vadd.f32 %v1473_v2, %v1465_v53 }
0x125f   :  { %2113 = vtanh.f32 %v2568_v55 }
0x1269   :  { %v2114_v4 = vpop.eup %2113 }
0x126a   :  { %1478 = vrot.lane.b32.xlu0 %v2114_v4, %s2136_s0 }
0x1277   :  { %v1497_v57 = vpop.permute.xlu1 %1496 }
0x1278   :  { %v2573_v8 = vadd.f32 %v1497_v57, %v1489_v6 }
0x127a   :  { %2115 = vtanh.f32 %v2573_v8 }
0x1284   :  { %v2116_v11 = vpop.eup %2115 }
0x1285   :  { %1502 = vrot.lane.b32.xlu1 %v2116_v11, %s2136_s0 }
0x12dc   :  { %v1479_v13 = vpop.permute.xlu0 %1478 }
0x12dd   :  { %v2591_v42 = vmul.f32 %v2108_v0, %v1479_v13 }
0x12df   :  { %v1518_v14 = vpack.c.bf16 %v2591_v42, %v2591_v42 }
0x12e1   :  { %1524 = vrot.lane.b32.xlu0 %v1518_v14, %s2137_s4 }
0x12f7   :  { %v1503_v3 = vpop.permute.xlu1 %1502 }
0x12f8   :  { %v2596_v15 = vmul.f32 %v2112_v60, %v1503_v3 }
0x12fa   :  { %v1582_v17 = vpack.c.bf16 %v2596_v15, %v2596_v15 }
0x12fc   :  { %1588 = vrot.lane.b32.xlu1 %v1582_v17, %s2137_s4 }
0x1353   :  { %v1525_v18 = vpop.permute.xlu0 %1524 }
0x1354   :  { %1945 = vmatmul.mubr.msk.bf16.vlgmr.msra.gmra.mrb[36].mxu1 %vm214_vm2, %v1525_v18 }
0x136e   :  { %v1589_v1 = vpop.permute.xlu1 %1588 }
0x136f   :  { %1953 = vmatmul.mubr.msk.bf16.vlgmr.msra.gmra.mrb[36].mxu0 %vm214_vm2, %v1589_v1 }
0x1427   :  { %v1575_v7 = vpop.f32.mrb[36].mxu1 }
0x1428   :  { %v1581_v21 = vadd.f32 %v1575_v7, %v2276_v9  ;;  %v1946_v22 = vpop.f32.mrb[37].mxu1 }
0x1429   :  { %v1578_v23 = vpop.f32.mrb[38].mxu1 }
0x142a   :  { %2117 = vtanh.f32 %v1581_v21  ;;  %v1947_v26 = vpop.f32.mrb[39].mxu1  ;;  %v1646_v38 = vsub.f32 0.0, %v1581_v21 }
0x142c   :  { %v1647_v43 = vmul.f32 1.442695, %v1646_v38 }
0x1434   :  { %v2118_v27 = vpop.eup %2117 }
0x1435   :  { %1655 = vrot.lane.b32.xlu0 %v2118_v27, %s2136_s0 }
0x1442   :  { %v1639_v28 = vpop.f32.mrb[36].mxu0 }
0x1443   :  { %v1645_v31 = vadd.f32 %v1639_v28, %v2249_v40  ;;  %v1954_v32 = vpop.f32.mrb[37].mxu0 }
0x1444   :  { %v1642_v33 = vpop.f32.mrb[38].mxu0 }
0x1445   :  { %2119 = vtanh.f32 %v1645_v31  ;;  %v1955_v35 = vpop.f32.mrb[39].mxu0  ;;  %v1670_v47 = vsub.f32 0.0, %v1645_v31 }
0x1446   :  { %2121 = vpow2.f32 %v1647_v43 }
0x1447   :  { %v1671_v48 = vmul.f32 1.442695, %v1670_v47 }
0x144f   :  { %v2120_v37 = vpop.eup %2119 }
0x1450   :  { %1679 = vrot.lane.b32.xlu1 %v2120_v37, %s2136_s0  ;;  %v2122_v9 = vpop.eup %2121 }
0x1451   :  { %v1649_v45 = vadd.f32 1.0, %v2122_v9 }
0x1453   :  { %2123 = vrcp.f32 %v1649_v45 }
0x1454   :  { %2125 = vpow2.f32 %v1671_v48 }
0x145d   :  { %v2124_v49 = vpop.eup %2123 }
0x145e   :  { %v2126_v40 = vpop.eup %2125  ;;  %v1653_v58 = vmul.f32 %v2124_v49, %v2568_v55 }
0x145f   :  { %v1673_v52 = vadd.f32 1.0, %v2126_v40 }
0x1461   :  { %2127 = vrcp.f32 %v1673_v52 }
0x146b   :  { %v2128_v54 = vpop.eup %2127 }
0x146c   :  { %v1677_v61 = vmul.f32 %v2128_v54, %v2573_v8 }
0x14a7   :  { %v1656_v5 = vpop.permute.xlu0 %1655 }
0x14a8   :  { %v1658_v50 = vmul.f32 %v2124_v49, %v1656_v5 }
0x14aa   :  { %1660 = vrot.lane.b32.xlu0 %v1658_v50, %s2137_s4 }
0x14c2   :  { %v1680_v0 = vpop.permute.xlu1 %1679 }
0x14c3   :  { %v1682_v56 = vmul.f32 %v2128_v54, %v1680_v0 }
0x14c5   :  { %1684 = vrot.lane.b32.xlu1 %v1682_v56, %s2137_s4 }
0x151c   :  { %v1661_v46 = vpop.permute.xlu0 %1660 }
0x151d   :  { %v1663_v59 = vadd.f32 %v1661_v46, %v1653_v58 }
0x151f   :  { %2129 = vtanh.f32 %v1663_v59 }
0x1529   :  { %v2130_v60 = vpop.eup %2129 }
0x152a   :  { %1666 = vrot.lane.b32.xlu0 %v2130_v60, %s2136_s0 }
0x152e   :  { %365 = vrot.lane.b32.xlu0 %v2297_v39, %s2137_s4 }
0x1532   :  { %557 = vrot.lane.b32.xlu0 %v2353_v36, %s2137_s4 }
0x1536   :  { %749 = vrot.lane.b32.xlu0 %v2401_v30, %s2137_s4 }
0x1537   :  { %v1685_v63 = vpop.permute.xlu1 %1684 }
0x1538   :  { %v1687_v53 = vadd.f32 %v1685_v63, %v1677_v61 }
0x153a   :  { %2131 = vtanh.f32 %v1687_v53  ;;  %941 = vrot.lane.b32.xlu0 %v2449_v25, %s2137_s4 }
0x153e   :  { %1131 = vrot.lane.b32.xlu0 %v2497_v20, %s2137_s4 }
0x1542   :  { %1319 = vrot.lane.b32.xlu0 %v2545_v16, %s2137_s4 }
0x1544   :  { %v2132_v39 = vpop.eup %2131 }
0x1545   :  { %1690 = vrot.lane.b32.xlu1 %v2132_v39, %s2136_s0 }
0x1546   :  { %1507 = vrot.lane.b32.xlu0 %v2591_v42, %s2137_s4 }
0x1549   :  { %370 = vrot.lane.b32.xlu1 %v2302_v44, %s2136_s0 }
0x154d   :  { %563 = vrot.lane.b32.xlu1 %v2358_v41, %s2136_s0 }
0x1551   :  { %755 = vrot.lane.b32.xlu1 %v2406_v34, %s2136_s0 }
0x1555   :  { %947 = vrot.lane.b32.xlu1 %v2454_v29, %s2136_s0 }
0x1559   :  { %1136 = vrot.lane.b32.xlu1 %v2502_v24, %s2136_s0 }
0x155d   :  { %1324 = vrot.lane.b32.xlu1 %v2550_v19, %s2136_s0 }
0x1561   :  { %1512 = vrot.lane.b32.xlu1 %v2596_v15, %s2136_s0 }
0x159c   :  { %v1667_v36 = vpop.permute.xlu0 %1666 }
0x159d   :  { %v1669_v44 = vmul.f32 %v2124_v49, %v1667_v36 }
0x159f   :  { %1695 = vrot.lane.b32.xlu0 %v1669_v44, %s2137_s4 }
0x15a0   :  { %v366_v41 = vpop.permute.xlu0 %365 }
0x15a1   :  { %368 = vst.msk [vmem:[%s2712_s5] sm:$0xff] %vm214_vm2, %v366_v41 }
0x15a4   :  { %v558_v30 = vpop.permute.xlu0 %557 }
0x15a5   :  { %1731 = vst.msk [vmem:[%s2712_s5 + $0x8] sm:$0xff] %vm214_vm2, %v558_v30 }
0x15a8   :  { %v750_v34 = vpop.permute.xlu0 %749 }
0x15a9   :  { %1739 = vst.msk [vmem:[%s2712_s5 + $0x10] sm:$0xff] %vm214_vm2, %v750_v34 }
0x15ac   :  { %v942_v25 = vpop.permute.xlu0 %941 }
0x15ad   :  { %1747 = vst.msk [vmem:[%s2712_s5 + $0x18] sm:$0xff] %vm214_vm2, %v942_v25 }
0x15b0   :  { %v1132_v29 = vpop.permute.xlu0 %1131 }
0x15b4   :  { %v1320_v16 = vpop.permute.xlu0 %1319 }
0x15b7   :  { %v1691_v20 = vpop.permute.xlu1 %1690 }
0x15b8   :  { %v1693_v24 = vmul.f32 %v2128_v54, %v1691_v20  ;;  %v1508_v55 = vpop.permute.xlu0 %1507 }
0x15ba   :  { %1700 = vrot.lane.b32.xlu1 %v1693_v24, %s2136_s0 }
0x15bb   :  { %v371_v19 = vpop.permute.xlu1 %370 }
0x15bc   :  { %1724 = vst.msk [vmem:[%s2712_s5 + $0x38] sm:$0xff] %vm374_vm3, %v371_v19 }
0x15bf   :  { %v564_v2 = vpop.permute.xlu1 %563 }
0x15c0   :  { %1732 = vst.msk [vmem:[%s2712_s5 + $0x30] sm:$0xff] %vm374_vm3, %v564_v2 }
0x15c1   :  { %1771 = vst.msk [vmem:[%s2712_s5 + $0x30] sm:$0xff] %vm214_vm2, %v1508_v55 }
0x15c3   :  { %v756_v4 = vpop.permute.xlu1 %755 }
0x15c4   :  { %1740 = vst.msk [vmem:[%s2712_s5 + $0x28] sm:$0xff] %vm374_vm3, %v756_v4 }
0x15c5   :  { %1763 = vst.msk [vmem:[%s2712_s5 + $0x28] sm:$0xff] %vm214_vm2, %v1320_v16 }
0x15c7   :  { %v948_v6 = vpop.permute.xlu1 %947 }
0x15c8   :  { %1748 = vst.msk [vmem:[%s2712_s5 + $0x20] sm:$0xff] %vm374_vm3, %v948_v6 }
0x15c9   :  { %1755 = vst.msk [vmem:[%s2712_s5 + $0x20] sm:$0xff] %vm214_vm2, %v1132_v29 }
0x15cb   :  { %v1137_v57 = vpop.permute.xlu1 %1136 }
0x15cc   :  { %1756 = vst.msk [vmem:[%s2712_s5 + $0x18] sm:$0xff] %vm374_vm3, %v1137_v57 }
0x15cf   :  { %v1325_v8 = vpop.permute.xlu1 %1324 }
0x15d0   :  { %1764 = vst.msk [vmem:[%s2712_s5 + $0x10] sm:$0xff] %vm374_vm3, %v1325_v8 }
0x15d3   :  { %v1513_v10 = vpop.permute.xlu1 %1512 }
0x15d4   :  { %1772 = vst.msk [vmem:[%s2712_s5 + $0x8] sm:$0xff] %vm374_vm3, %v1513_v10 }
0x1611   :  { %v1696_v51 = vpop.permute.xlu0 %1695 }
0x1612   :  { %1779 = vst.msk [vmem:[%s2712_s5 + $0x38] sm:$0xff] %vm214_vm2, %v1696_v51 }
0x162c   :  { %v1701_v11 = vpop.permute.xlu1 %1700 }
0x162d   :  { %1703 = vst.msk [vmem:[%s2712_s5] sm:$0xff] %vm374_vm3, %v1701_v11 }

</bundles_post_ra>
